<compile_context>
chip_gen: v5e
topology: v5e:2x2
jax: 0.10.0
libtpu: 0.0.40
codegen_flags: <defaults>
</compile_context>

<pallas_src>
import jax
import jax.numpy as jnp
from jax.experimental import pallas as pl
from jax.experimental.pallas import tpu as pltpu

EPS = 1e-5                      # nn.BatchNorm2d default eps
VMEM_LIMIT = 48 * 1024 * 1024   # explicit scoped-VMEM request, safe on v5e/v6e/v7x
ROW_TILE = 512                  # target rows per block (review: 512-1024)
K_TILE = 512                    # target contraction columns per block


def _cparams(semantics):
    return pltpu.CompilerParams(dimension_semantics=semantics,
                                vmem_limit_bytes=VMEM_LIMIT)


def _pick_tile(dim, target):
    """Largest multiple-of-8 divisor of `dim` that is <= target (else full dim)."""
    if dim <= target:
        return dim
    t = (target // 8) * 8
    while t >= 8:
        if dim % t == 0:
            return t
        t -= 8
    return dim


# ------------------------------------------------------------------ kernels --
def _matmul_stats_kernel(x_ref, w_ref, y_ref, ssum_ref, ssq_ref, acc_ref):
    """(TM, TK) @ (TK, C), accumulated over the K grid axis in f32 VMEM scratch.
    On the last K step write the f32 tile plus per-channel sum / sum-of-squares."""
    @pl.when(pl.program_id(1) == 0)
    def _init():
        acc_ref[...] = jnp.zeros_like(acc_ref)

    acc_ref[...] += jnp.dot(x_ref[...], w_ref[...],
                            preferred_element_type=jnp.float32)

    @pl.when(pl.program_id(1) == pl.num_programs(1) - 1)
    def _finalize():
        y = acc_ref[...]
        y_ref[...] = y
        ssum_ref[...] = jnp.sum(y, axis=0, keepdims=True)[None]
        ssq_ref[...] = jnp.sum(y * y, axis=0, keepdims=True)[None]


def _dual_matmul_stats_kernel(a_ref, wa_ref, b_ref, wb_ref,
                              ya_ref, yb_ref,
                              sa_sum_ref, sa_sq_ref, sb_sum_ref, sb_sq_ref):
    """Fused conv3 matmul + downsample matmul over the same row tile, plus both
    sets of partial BN statistics (one pass over the rows instead of two)."""
    ya = jnp.dot(a_ref[...], wa_ref[...], preferred_element_type=jnp.float32)
    yb = jnp.dot(b_ref[...], wb_ref[...], preferred_element_type=jnp.float32)
    ya_ref[...] = ya
    yb_ref[...] = yb
    sa_sum_ref[...] = jnp.sum(ya, axis=0, keepdims=True)[None]
    sa_sq_ref[...] = jnp.sum(ya * ya, axis=0, keepdims=True)[None]
    sb_sum_ref[...] = jnp.sum(yb, axis=0, keepdims=True)[None]
    sb_sq_ref[...] = jnp.sum(yb * yb, axis=0, keepdims=True)[None]


def _bn_relu_kernel(y_ref, s_ref, t_ref, o_ref):
    o_ref[...] = jnp.maximum(y_ref[...] * s_ref[...] + t_ref[...],
                             0.0).astype(o_ref.dtype)


def _bn_add_relu_kernel(y_ref, r_ref, s_ref, t_ref, o_ref):
    out = y_ref[...] * s_ref[...] + t_ref[...] + r_ref[...].astype(jnp.float32)
    o_ref[...] = jnp.maximum(out, 0.0).astype(o_ref.dtype)


def _dual_bn_add_relu_kernel(ya_ref, yb_ref, sa_ref, ta_ref, sb_ref, tb_ref, o_ref):
    out = (ya_ref[...] * sa_ref[...] + ta_ref[...]
           + yb_ref[...] * sb_ref[...] + tb_ref[...])
    o_ref[...] = jnp.maximum(out, 0.0).astype(o_ref.dtype)


# ---------------------------------------------------------------- wrappers ---
def matmul_stats(x2d, w2d):
    """Pass 1: tiled matmul + per-tile partial BN stats."""
    M, K = x2d.shape
    cout = w2d.shape[1]
    tm = _pick_tile(M, ROW_TILE)
    tk = _pick_tile(K, K_TILE)
    mt, kt = M // tm, K // tk
    stat = jax.ShapeDtypeStruct((mt, 1, cout), jnp.float32)
    stat_spec = pl.BlockSpec((1, 1, cout), lambda i, k: (i, 0, 0))
    return pl.pallas_call(
        _matmul_stats_kernel,
        grid=(mt, kt),
        in_specs=[pl.BlockSpec((tm, tk), lambda i, k: (i, k)),
                  pl.BlockSpec((tk, cout), lambda i, k: (k, 0))],
        out_specs=[pl.BlockSpec((tm, cout), lambda i, k: (i, 0)),
                   stat_spec, stat_spec],
        out_shape=[jax.ShapeDtypeStruct((M, cout), jnp.float32), stat, stat],
        scratch_shapes=[pltpu.VMEM((tm, cout), jnp.float32)],
        compiler_params=_cparams(("parallel", "arbitrary")),
    )(x2d, w2d)


def dual_matmul_stats(a2d, wa, b2d, wb):
    """Pass 1 for conv3 fused with the downsample 1x1 conv (same row tiling)."""
    M, ka = a2d.shape
    kb = b2d.shape[1]
    cout = wa.shape[1]
    tm = _pick_tile(M, ROW_TILE)
    mt = M // tm
    stat = jax.ShapeDtypeStruct((mt, 1, cout), jnp.float32)
    stat_spec = pl.BlockSpec((1, 1, cout), lambda i: (i, 0, 0))
    row_spec = pl.BlockSpec((tm, cout), lambda i: (i, 0))
    return pl.pallas_call(
        _dual_matmul_stats_kernel,
        grid=(mt,),
        in_specs=[pl.BlockSpec((tm, ka), lambda i: (i, 0)),
                  pl.BlockSpec((ka, cout), lambda i: (0, 0)),
                  pl.BlockSpec((tm, kb), lambda i: (i, 0)),
                  pl.BlockSpec((kb, cout), lambda i: (0, 0))],
        out_specs=[row_spec, row_spec, stat_spec, stat_spec, stat_spec, stat_spec],
        out_shape=[jax.ShapeDtypeStruct((M, cout), jnp.float32),
                   jax.ShapeDtypeStruct((M, cout), jnp.float32),
                   stat, stat, stat, stat],
        compiler_params=_cparams(("parallel",)),
    )(a2d, wa, b2d, wb)


def _bn_scale_shift(ssum, ssq, count, gamma, beta):
    """Reduce per-tile partial stats into per-channel affine scale/shift (O(C))."""
    s = jnp.sum(ssum, axis=0).reshape(-1)
    sq = jnp.sum(ssq, axis=0).reshape(-1)
    mean = s / count
    var = jnp.maximum(sq / count - mean * mean, 0.0)   # biased training-mode var
    scale = gamma * jax.lax.rsqrt(var + EPS)
    shift = beta - mean * scale
    return scale.reshape(1, -1), shift.reshape(1, -1)


def _epilogue(kernel, row_arrays, vec_arrays, out_dtype):
    """Pass 2: tiled elementwise normalize (+residual) + ReLU."""
    M, cout = row_arrays[0].shape
    tm = _pick_tile(M, ROW_TILE)
    mt = M // tm
    in_specs = ([pl.BlockSpec((tm, a.shape[1]), lambda i: (i, 0)) for a in row_arrays]
                + [pl.BlockSpec((1, v.shape[1]), lambda i: (0, 0)) for v in vec_arrays])
    return pl.pallas_call(
        kernel,
        grid=(mt,),
        in_specs=in_specs,
        out_specs=pl.BlockSpec((tm, cout), lambda i: (i, 0)),
        out_shape=jax.ShapeDtypeStruct((M, cout), out_dtype),
        compiler_params=_cparams(("parallel",)),
    )(*row_arrays, *vec_arrays)


def conv_bn_relu(x2d, w2d, gamma, beta, out_dtype=jnp.bfloat16):
    M = x2d.shape[0]
    y, ssum, ssq = matmul_stats(x2d, w2d)
    scale, shift = _bn_scale_shift(ssum, ssq, M, gamma, beta)
    return _epilogue(_bn_relu_kernel, [y], [scale, shift], out_dtype)


def im2col_3x3(x_nhwc, stride, pad=1):
    """3x3 patches with PyTorch conv semantics; patch channel layout = (kh, kw, c).
    Kept in bf16 to halve the im2col HBM blow-up.
    # TODO(synk): express conv2 as a (kh, kw) reduction grid with shifted BlockSpec
    # offsets instead of materializing 9x patches in HBM (biggest remaining win on v5e).
    """
    N, H, W, C = x_nhwc.shape
    xp = jnp.pad(x_nhwc, ((0, 0), (pad, pad), (pad, pad), (0, 0)))
    Ho = (H + 2 * pad - 3) // stride + 1
    Wo = (W + 2 * pad - 3) // stride + 1
    cols = [xp[:, kh:kh + Ho * stride:stride, kw:kw + Wo * stride:stride, :]
            for kh in range(3) for kw in range(3)]
    return jnp.concatenate(cols, axis=-1), Ho, Wo


def prepare_params(params):
    """One-time weight relayout: OIHW -> (K, Cout) matmul layout, cast to bf16."""
    base, cin = params["w1"].shape[:2]
    prep = {
        "w1": params["w1"].reshape(base, cin).T.astype(jnp.bfloat16),
        "w2": jnp.transpose(params["w2"], (2, 3, 1, 0)).reshape(9 * base, base)
                 .astype(jnp.bfloat16),
        "w3": params["w3"].reshape(4 * base, base).T.astype(jnp.bfloat16),
        "g1": params["g1"], "b1": params["b1"],
        "g2": params["g2"], "b2": params["b2"],
        "g3": params["g3"], "b3": params["b3"],
    }
    if "wd" in params:
        prep["wd"] = params["wd"].reshape(4 * base, cin).T.astype(jnp.bfloat16)
        prep["gd"] = params["gd"]
        prep["bd"] = params["bd"]
    return prep


def bottleneck_forward(x_nchw, prep, stride):
    cin, base = prep["w1"].shape
    N, _, H, W = x_nchw.shape
    x_nhwc = jnp.transpose(x_nchw, (0, 2, 3, 1)).astype(jnp.float32)  # NCHW -> NHWC
    x_bf = x_nhwc.astype(jnp.bfloat16)
    M1 = N * H * W

    # conv1 (1x1, no bias) + bn1 + relu1 -> bf16 activation for the next MXU stage
    a1 = conv_bn_relu(x_bf.reshape(M1, cin), prep["w1"], prep["g1"], prep["b1"])
    a1 = a1.reshape(N, H, W, base)

    # conv2 (3x3, stride, pad=1, no bias) + bn2 + relu2   (bf16 im2col -> matmul)
    patches, Ho, Wo = im2col_3x3(a1, stride)
    M2 = N * Ho * Wo
    a2 = conv_bn_relu(patches.reshape(M2, 9 * base), prep["w2"], prep["g2"], prep["b2"])

    cout = 4 * base
    if "wd" in prep:
        # Fused downsample branch: its matmul + stats share the conv3 pass-1 kernel,
        # and both BN affines + residual add + relu3 run in one pass-2 kernel.
        # TODO(synk): fold the ::stride gather into the pass-1 BlockSpec index_map
        # instead of materializing the strided slice in HBM.
        xs = x_bf[:, ::stride, ::stride, :].reshape(M2, cin)
        y3, yd, s3s, s3q, sds, sdq = dual_matmul_stats(a2, prep["w3"], xs, prep["wd"])
        sc3, sh3 = _bn_scale_shift(s3s, s3q, M2, prep["g3"], prep["b3"])
        scd, shd = _bn_scale_shift(sds, sdq, M2, prep["gd"], prep["bd"])
        out2d = _epilogue(_dual_bn_add_relu_kernel, [y3, yd],
                          [sc3, sh3, scd, shd], jnp.float32)
    else:
        # identity residual: stride == 1 and cin == 4*base
        y3, s3s, s3q = matmul_stats(a2, prep["w3"])
        sc3, sh3 = _bn_scale_shift(s3s, s3q, M2, prep["g3"], prep["b3"])
        res = x_nhwc.reshape(M2, cout)
        out2d = _epilogue(_bn_add_relu_kernel, [y3, res], [sc3, sh3], jnp.float32)

    out = out2d.reshape(N, Ho, Wo, cout)
    return jnp.transpose(out, (0, 3, 1, 2))  # NHWC -> NCHW


# --------------------------------------------------------- pure-JAX reference
def ref_forward(x, params, stride):
    def conv(x, w, s, p):
        return jax.lax.conv_general_dilated(
            x, w, (s, s), [(p, p), (p, p)],
            dimension_numbers=("NCHW", "OIHW", "NCHW"),
            precision=jax.lax.Precision.HIGHEST)

    def bn(x, g, b):
        m = jnp.mean(x, axis=(0, 2, 3), keepdims=True)
        v = jnp.mean(jnp.square(x - m), axis=(0, 2, 3), keepdims=True)
        return (x - m) / jnp.sqrt(v + EPS) * g.reshape(1, -1, 1, 1) + b.reshape(1, -1, 1, 1)

    y = jax.nn.relu(bn(conv(x, params["w1"], 1, 0), params["g1"], params["b1"]))
    y = jax.nn.relu(bn(conv(y, params["w2"], stride, 1), params["g2"], params["b2"]))
    y = bn(conv(y, params["w3"], 1, 0), params["g3"], params["b3"])
    res = x
    if "wd" in params:
        res = bn(conv(x, params["wd"], stride, 0), params["gd"], params["bd"])
    return jax.nn.relu(y + res)


# -------------------------------------------------------------------- main ---
if __name__ == "__main__":
    in_channels, base_channels, stride = 4, 4, 2   # downsample path is exercised
    N, H, W = 2, 16, 16

    key = jax.random.PRNGKey(0)
    k = jax.random.split(key, 8)
    params = {
        # conv weights in PyTorch OIHW layout; BN affine params match nn.BatchNorm2d init.
        "w1": 0.1 * jax.random.normal(k[0], (base_channels, in_channels, 1, 1), jnp.float32),
        "g1": jnp.ones((base_channels,), jnp.float32),
        "b1": jnp.zeros((base_channels,), jnp.float32),
        "w2": 0.1 * jax.random.normal(k[1], (base_channels, base_channels, 3, 3), jnp.float32),
        "g2": jnp.ones((base_channels,), jnp.float32),
        "b2": jnp.zeros((base_channels,), jnp.float32),
        "w3": 0.1 * jax.random.normal(k[2], (4 * base_channels, base_channels, 1, 1), jnp.float32),
        "g3": jnp.ones((4 * base_channels,), jnp.float32),
        "b3": jnp.zeros((4 * base_channels,), jnp.float32),
    }
    if stride != 1 or in_channels != 4 * base_channels:
        params["wd"] = 0.1 * jax.random.normal(
            k[3], (4 * base_channels, in_channels, 1, 1), jnp.float32)
        params["gd"] = jnp.ones((4 * base_channels,), jnp.float32)
        params["bd"] = jnp.zeros((4 * base_channels,), jnp.float32)

    x = jax.random.normal(k[4], (N, in_channels, H, W), jnp.float32)

    prep = prepare_params(params)
    fwd = jax.jit(bottleneck_forward, static_argnums=2)
    out = jax.block_until_ready(fwd(x, prep, stride))
    ref = jax.block_until_ready(ref_forward(x, params, stride))

    assert out.shape == ref.shape == (N, 4 * base_channels, H // stride, W // stride)
    max_err = float(jnp.max(jnp.abs(out - ref)))
    # bf16 MXU inputs (f32 accumulation, f32 BN math) per the performance review;
    # training-mode BN normalization amplifies the bf16 input rounding slightly.
    assert jnp.allclose(out, ref, atol=2e-2, rtol=2e-2), f"max abs err = {max_err}"
    print("KERNEL_OK")
</pallas_src>

<mosaic_0001>
module attributes {stable_mosaic.version = 11 : i64} {
  func.func @_matmul_stats_kernel(%arg0: i32, %arg1: i32, %arg2: memref<512x4xbf16, #tpu.memory_space<vmem>>, %arg3: memref<4x4xbf16, #tpu.memory_space<vmem>>, %arg4: memref<512x4xf32, #tpu.memory_space<vmem>>, %arg5: memref<1x1x4xf32, #tpu.memory_space<vmem>>, %arg6: memref<1x1x4xf32, #tpu.memory_space<vmem>>, %arg7: memref<512x4xf32, #tpu.memory_space<vmem>>) attributes {dimension_semantics = [#tpu.dimension_semantics<parallel>, #tpu.dimension_semantics<arbitrary>], iteration_bounds = array<i64: 1, 1>, scalar_prefetch = 0 : i64, scratch_operands = 1 : i64, tpu.core_type = #tpu.core_type<tc>, window_params = [{transform_indices = @transform_0, window_bounds = array<i64: 512, 4>}, {transform_indices = @transform_1, window_bounds = array<i64: 4, 4>}, {transform_indices = @transform_2, window_bounds = array<i64: 512, 4>}, {transform_indices = @transform_3, window_bounds = array<i64: 1, 1, 4>}, {transform_indices = @transform_4, window_bounds = array<i64: 1, 1, 4>}]} {
    %c0_i32 = arith.constant 0 : i32
    %0 = arith.cmpi eq, %arg1, %c0_i32 : i32
    %1 = arith.extui %0 : i1 to i32
    %c0_i32_0 = arith.constant 0 : i32
    %2 = arith.cmpi ne, %1, %c0_i32_0 : i32
    scf.if %2 {
      %cst_10 = arith.constant 0.000000e+00 : f32
      %12 = vector.broadcast %cst_10 : f32 to vector<512x4xf32>
      %c0_11 = arith.constant 0 : index
      %c0_12 = arith.constant 0 : index
      %13 = vector.load %arg7[%c0_11, %c0_12] : memref<512x4xf32, #tpu.memory_space<vmem>>, vector<512x4xf32>
      tpu.vector_store %arg7[%c0_11, %c0_12], %12 {strides = array<i32>} : memref<512x4xf32, #tpu.memory_space<vmem>>, vector<512x4xf32>,
    } else {
    }
    %c0 = arith.constant 0 : index
    %c0_1 = arith.constant 0 : index
    %3 = vector.load %arg7[%c0, %c0_1] : memref<512x4xf32, #tpu.memory_space<vmem>>, vector<512x4xf32>
    %c0_2 = arith.constant 0 : index
    %c0_3 = arith.constant 0 : index
    %4 = vector.load %arg2[%c0_2, %c0_3] : memref<512x4xbf16, #tpu.memory_space<vmem>>, vector<512x4xbf16>
    %c0_4 = arith.constant 0 : index
    %c0_5 = arith.constant 0 : index
    %5 = vector.load %arg3[%c0_4, %c0_5] : memref<4x4xbf16, #tpu.memory_space<vmem>>, vector<4x4xbf16>
    %cst = arith.constant dense<0.000000e+00> : vector<512x4xf32>
    %6 = tpu.matmul %4, %5, %cst {dimension_numbers = #tpu.dot_dimension_numbers<[1], [0], [0], [1], [0, 0, 1, 1], [], []>} : vector<512x4xbf16>, vector<4x4xbf16>, vector<512x4xf32> -> vector<512x4xf32>
    %7 = arith.addf %3, %6 : vector<512x4xf32>
    %c0_6 = arith.constant 0 : index
    %c0_7 = arith.constant 0 : index
    %8 = vector.load %arg7[%c0_6, %c0_7] : memref<512x4xf32, #tpu.memory_space<vmem>>, vector<512x4xf32>
    tpu.vector_store %arg7[%c0_6, %c0_7], %7 {strides = array<i32>} : memref<512x4xf32, #tpu.memory_space<vmem>>, vector<512x4xf32>,
    %c0_i32_8 = arith.constant 0 : i32
    %9 = arith.cmpi eq, %arg1, %c0_i32_8 : i32
    %10 = arith.extui %9 : i1 to i32
    %c0_i32_9 = arith.constant 0 : i32
    %11 = arith.cmpi ne, %10, %c0_i32_9 : i32
    scf.if %11 {
      %c0_10 = arith.constant 0 : index
      %c0_11 = arith.constant 0 : index
      %12 = vector.load %arg7[%c0_10, %c0_11] : memref<512x4xf32, #tpu.memory_space<vmem>>, vector<512x4xf32>
      %c0_12 = arith.constant 0 : index
      %c0_13 = arith.constant 0 : index
      %13 = vector.load %arg4[%c0_12, %c0_13] : memref<512x4xf32, #tpu.memory_space<vmem>>, vector<512x4xf32>
      tpu.vector_store %arg4[%c0_12, %c0_13], %12 {strides = array<i32>} : memref<512x4xf32, #tpu.memory_space<vmem>>, vector<512x4xf32>,
      %cst_14 = arith.constant dense<0.000000e+00> : vector<4xf32>
      %14 = vector.multi_reduction <add>, %12, %cst_14 [0] : vector<512x4xf32> to vector<4xf32>
      %15 = vector.shape_cast %14 : vector<4xf32> to vector<1x4xf32>
      %16 = vector.shape_cast %15 : vector<1x4xf32> to vector<1x1x4xf32>
      %c0_15 = arith.constant 0 : index
      %c0_16 = arith.constant 0 : index
      %c0_17 = arith.constant 0 : index
      %17 = vector.load %arg5[%c0_15, %c0_16, %c0_17] : memref<1x1x4xf32, #tpu.memory_space<vmem>>, vector<1x1x4xf32>
      tpu.vector_store %arg5[%c0_15, %c0_16, %c0_17], %16 {strides = array<i32>} : memref<1x1x4xf32, #tpu.memory_space<vmem>>, vector<1x1x4xf32>,
      %18 = arith.mulf %12, %12 : vector<512x4xf32>
      %cst_18 = arith.constant dense<0.000000e+00> : vector<4xf32>
      %19 = vector.multi_reduction <add>, %18, %cst_18 [0] : vector<512x4xf32> to vector<4xf32>
      %20 = vector.shape_cast %19 : vector<4xf32> to vector<1x4xf32>
      %21 = vector.shape_cast %20 : vector<1x4xf32> to vector<1x1x4xf32>
      %c0_19 = arith.constant 0 : index
      %c0_20 = arith.constant 0 : index
      %c0_21 = arith.constant 0 : index
      %22 = vector.load %arg6[%c0_19, %c0_20, %c0_21] : memref<1x1x4xf32, #tpu.memory_space<vmem>>, vector<1x1x4xf32>
      tpu.vector_store %arg6[%c0_19, %c0_20, %c0_21], %21 {strides = array<i32>} : memref<1x1x4xf32, #tpu.memory_space<vmem>>, vector<1x1x4xf32>,
    } else {
    }
    return
  }
  func.func @transform_0(%arg0: i32, %arg1: i32) -> (i32, i32) {
    %c0_i32 = arith.constant 0 : i32
    return %arg0, %arg1 : i32, i32
  }
  func.func @transform_1(%arg0: i32, %arg1: i32) -> (i32, i32) {
    %c0_i32 = arith.constant 0 : i32
    %c0_i32_0 = arith.constant 0 : i32
    return %arg1, %c0_i32 : i32, i32
  }
  func.func @transform_2(%arg0: i32, %arg1: i32) -> (i32, i32) {
    %c0_i32 = arith.constant 0 : i32
    %c0_i32_0 = arith.constant 0 : i32
    return %arg0, %c0_i32 : i32, i32
  }
  func.func @transform_3(%arg0: i32, %arg1: i32) -> (i32, i32, i32) {
    %c0_i32 = arith.constant 0 : i32
    %c0_i32_0 = arith.constant 0 : i32
    %c0_i32_1 = arith.constant 0 : i32
    return %arg0, %c0_i32, %c0_i32_0 : i32, i32, i32
  }
  func.func @transform_4(%arg0: i32, %arg1: i32) -> (i32, i32, i32) {
    %c0_i32 = arith.constant 0 : i32
    %c0_i32_0 = arith.constant 0 : i32
    %c0_i32_1 = arith.constant 0 : i32
    return %arg0, %c0_i32, %c0_i32_0 : i32, i32, i32
  }
}

module attributes {stable_mosaic.version = 11 : i64} {
  func.func @_bn_relu_kernel(%arg0: i32, %arg1: memref<512x4xf32, #tpu.memory_space<vmem>>, %arg2: memref<1x4xf32, #tpu.memory_space<vmem>>, %arg3: memref<1x4xf32, #tpu.memory_space<vmem>>, %arg4: memref<512x4xbf16, #tpu.memory_space<vmem>>) attributes {dimension_semantics = [#tpu.dimension_semantics<parallel>], iteration_bounds = array<i64: 1>, scalar_prefetch = 0 : i64, scratch_operands = 0 : i64, tpu.core_type = #tpu.core_type<tc>, window_params = [{transform_indices = @transform_0, window_bounds = array<i64: 512, 4>}, {pipeline_mode = #tpu.pipeline_mode<synchronous>, transform_indices = @transform_1, window_bounds = array<i64: 1, 4>}, {pipeline_mode = #tpu.pipeline_mode<synchronous>, transform_indices = @transform_2, window_bounds = array<i64: 1, 4>}, {transform_indices = @transform_3, window_bounds = array<i64: 512, 4>}]} {
    %c0 = arith.constant 0 : index
    %c0_0 = arith.constant 0 : index
    %0 = vector.load %arg1[%c0, %c0_0] : memref<512x4xf32, #tpu.memory_space<vmem>>, vector<512x4xf32>
    %c0_1 = arith.constant 0 : index
    %c0_2 = arith.constant 0 : index
    %1 = vector.load %arg2[%c0_1, %c0_2] : memref<1x4xf32, #tpu.memory_space<vmem>>, vector<1x4xf32>
    %2 = vector.broadcast %1 : vector<1x4xf32> to vector<512x4xf32>
    %3 = arith.mulf %0, %2 : vector<512x4xf32>
    %c0_3 = arith.constant 0 : index
    %c0_4 = arith.constant 0 : index
    %4 = vector.load %arg3[%c0_3, %c0_4] : memref<1x4xf32, #tpu.memory_space<vmem>>, vector<1x4xf32>
    %5 = vector.broadcast %4 : vector<1x4xf32> to vector<512x4xf32>
    %6 = arith.addf %3, %5 : vector<512x4xf32>
    %cst = arith.constant 0.000000e+00 : f32
    %7 = vector.broadcast %cst : f32 to vector<512x4xf32>
    %8 = arith.maximumf %6, %7 : vector<512x4xf32>
    %9 = arith.truncf %8 : vector<512x4xf32> to vector<512x4xbf16>
    %c0_5 = arith.constant 0 : index
    %c0_6 = arith.constant 0 : index
    %10 = vector.load %arg4[%c0_5, %c0_6] : memref<512x4xbf16, #tpu.memory_space<vmem>>, vector<512x4xbf16>
    tpu.vector_store %arg4[%c0_5, %c0_6], %9 {strides = array<i32>} : memref<512x4xbf16, #tpu.memory_space<vmem>>, vector<512x4xbf16>,
    return
  }
  func.func @transform_0(%arg0: i32) -> (i32, i32) {
    %c0_i32 = arith.constant 0 : i32
    %c0_i32_0 = arith.constant 0 : i32
    return %arg0, %c0_i32 : i32, i32
  }
  func.func @transform_1(%arg0: i32) -> (i32, i32) {
    %c0_i32 = arith.constant 0 : i32
    %c0_i32_0 = arith.constant 0 : i32
    %c0_i32_1 = arith.constant 0 : i32
    return %c0_i32, %c0_i32_0 : i32, i32
  }
  func.func @transform_2(%arg0: i32) -> (i32, i32) {
    %c0_i32 = arith.constant 0 : i32
    %c0_i32_0 = arith.constant 0 : i32
    %c0_i32_1 = arith.constant 0 : i32
    return %c0_i32, %c0_i32_0 : i32, i32
  }
  func.func @transform_3(%arg0: i32) -> (i32, i32) {
    %c0_i32 = arith.constant 0 : i32
    %c0_i32_0 = arith.constant 0 : i32
    return %arg0, %c0_i32 : i32, i32
  }
}

module attributes {stable_mosaic.version = 11 : i64} {
  func.func @_bn_relu_kernel(%arg0: i32, %arg1: memref<128x4xf32, #tpu.memory_space<vmem>>, %arg2: memref<1x4xf32, #tpu.memory_space<vmem>>, %arg3: memref<1x4xf32, #tpu.memory_space<vmem>>, %arg4: memref<128x4xbf16, #tpu.memory_space<vmem>>) attributes {dimension_semantics = [#tpu.dimension_semantics<parallel>], iteration_bounds = array<i64: 1>, scalar_prefetch = 0 : i64, scratch_operands = 0 : i64, tpu.core_type = #tpu.core_type<tc>, window_params = [{transform_indices = @transform_0, window_bounds = array<i64: 128, 4>}, {pipeline_mode = #tpu.pipeline_mode<synchronous>, transform_indices = @transform_1, window_bounds = array<i64: 1, 4>}, {pipeline_mode = #tpu.pipeline_mode<synchronous>, transform_indices = @transform_2, window_bounds = array<i64: 1, 4>}, {transform_indices = @transform_3, window_bounds = array<i64: 128, 4>}]} {
    %c0 = arith.constant 0 : index
    %c0_0 = arith.constant 0 : index
    %0 = vector.load %arg1[%c0, %c0_0] : memref<128x4xf32, #tpu.memory_space<vmem>>, vector<128x4xf32>
    %c0_1 = arith.constant 0 : index
    %c0_2 = arith.constant 0 : index
    %1 = vector.load %arg2[%c0_1, %c0_2] : memref<1x4xf32, #tpu.memory_space<vmem>>, vector<1x4xf32>
    %2 = vector.broadcast %1 : vector<1x4xf32> to vector<128x4xf32>
    %3 = arith.mulf %0, %2 : vector<128x4xf32>
    %c0_3 = arith.constant 0 : index
    %c0_4 = arith.constant 0 : index
    %4 = vector.load %arg3[%c0_3, %c0_4] : memref<1x4xf32, #tpu.memory_space<vmem>>, vector<1x4xf32>
    %5 = vector.broadcast %4 : vector<1x4xf32> to vector<128x4xf32>
    %6 = arith.addf %3, %5 : vector<128x4xf32>
    %cst = arith.constant 0.000000e+00 : f32
    %7 = vector.broadcast %cst : f32 to vector<128x4xf32>
    %8 = arith.maximumf %6, %7 : vector<128x4xf32>
    %9 = arith.truncf %8 : vector<128x4xf32> to vector<128x4xbf16>
    %c0_5 = arith.constant 0 : index
    %c0_6 = arith.constant 0 : index
    %10 = vector.load %arg4[%c0_5, %c0_6] : memref<128x4xbf16, #tpu.memory_space<vmem>>, vector<128x4xbf16>
    tpu.vector_store %arg4[%c0_5, %c0_6], %9 {strides = array<i32>} : memref<128x4xbf16, #tpu.memory_space<vmem>>, vector<128x4xbf16>,
    return
  }
  func.func @transform_0(%arg0: i32) -> (i32, i32) {
    %c0_i32 = arith.constant 0 : i32
    %c0_i32_0 = arith.constant 0 : i32
    return %arg0, %c0_i32 : i32, i32
  }
  func.func @transform_1(%arg0: i32) -> (i32, i32) {
    %c0_i32 = arith.constant 0 : i32
    %c0_i32_0 = arith.constant 0 : i32
    %c0_i32_1 = arith.constant 0 : i32
    return %c0_i32, %c0_i32_0 : i32, i32
  }
  func.func @transform_2(%arg0: i32) -> (i32, i32) {
    %c0_i32 = arith.constant 0 : i32
    %c0_i32_0 = arith.constant 0 : i32
    %c0_i32_1 = arith.constant 0 : i32
    return %c0_i32, %c0_i32_0 : i32, i32
  }
  func.func @transform_3(%arg0: i32) -> (i32, i32) {
    %c0_i32 = arith.constant 0 : i32
    %c0_i32_0 = arith.constant 0 : i32
    return %arg0, %c0_i32 : i32, i32
  }
}

module attributes {stable_mosaic.version = 11 : i64} {
  func.func @_matmul_stats_kernel(%arg0: i32, %arg1: i32, %arg2: memref<128x36xbf16, #tpu.memory_space<vmem>>, %arg3: memref<36x4xbf16, #tpu.memory_space<vmem>>, %arg4: memref<128x4xf32, #tpu.memory_space<vmem>>, %arg5: memref<1x1x4xf32, #tpu.memory_space<vmem>>, %arg6: memref<1x1x4xf32, #tpu.memory_space<vmem>>, %arg7: memref<128x4xf32, #tpu.memory_space<vmem>>) attributes {dimension_semantics = [#tpu.dimension_semantics<parallel>, #tpu.dimension_semantics<arbitrary>], iteration_bounds = array<i64: 1, 1>, scalar_prefetch = 0 : i64, scratch_operands = 1 : i64, tpu.core_type = #tpu.core_type<tc>, window_params = [{transform_indices = @transform_0, window_bounds = array<i64: 128, 36>}, {transform_indices = @transform_1, window_bounds = array<i64: 36, 4>}, {transform_indices = @transform_2, window_bounds = array<i64: 128, 4>}, {transform_indices = @transform_3, window_bounds = array<i64: 1, 1, 4>}, {transform_indices = @transform_4, window_bounds = array<i64: 1, 1, 4>}]} {
    %c0_i32 = arith.constant 0 : i32
    %0 = arith.cmpi eq, %arg1, %c0_i32 : i32
    %1 = arith.extui %0 : i1 to i32
    %c0_i32_0 = arith.constant 0 : i32
    %2 = arith.cmpi ne, %1, %c0_i32_0 : i32
    scf.if %2 {
      %cst_10 = arith.constant 0.000000e+00 : f32
      %12 = vector.broadcast %cst_10 : f32 to vector<128x4xf32>
      %c0_11 = arith.constant 0 : index
      %c0_12 = arith.constant 0 : index
      %13 = vector.load %arg7[%c0_11, %c0_12] : memref<128x4xf32, #tpu.memory_space<vmem>>, vector<128x4xf32>
      tpu.vector_store %arg7[%c0_11, %c0_12], %12 {strides = array<i32>} : memref<128x4xf32, #tpu.memory_space<vmem>>, vector<128x4xf32>,
    } else {
    }
    %c0 = arith.constant 0 : index
    %c0_1 = arith.constant 0 : index
    %3 = vector.load %arg7[%c0, %c0_1] : memref<128x4xf32, #tpu.memory_space<vmem>>, vector<128x4xf32>
    %c0_2 = arith.constant 0 : index
    %c0_3 = arith.constant 0 : index
    %4 = vector.load %arg2[%c0_2, %c0_3] : memref<128x36xbf16, #tpu.memory_space<vmem>>, vector<128x36xbf16>
    %c0_4 = arith.constant 0 : index
    %c0_5 = arith.constant 0 : index
    %5 = vector.load %arg3[%c0_4, %c0_5] : memref<36x4xbf16, #tpu.memory_space<vmem>>, vector<36x4xbf16>
    %cst = arith.constant dense<0.000000e+00> : vector<128x4xf32>
    %6 = tpu.matmul %4, %5, %cst {dimension_numbers = #tpu.dot_dimension_numbers<[1], [0], [0], [1], [0, 0, 1, 1], [], []>} : vector<128x36xbf16>, vector<36x4xbf16>, vector<128x4xf32> -> vector<128x4xf32>
    %7 = arith.addf %3, %6 : vector<128x4xf32>
    %c0_6 = arith.constant 0 : index
    %c0_7 = arith.constant 0 : index
    %8 = vector.load %arg7[%c0_6, %c0_7] : memref<128x4xf32, #tpu.memory_space<vmem>>, vector<128x4xf32>
    tpu.vector_store %arg7[%c0_6, %c0_7], %7 {strides = array<i32>} : memref<128x4xf32, #tpu.memory_space<vmem>>, vector<128x4xf32>,
    %c0_i32_8 = arith.constant 0 : i32
    %9 = arith.cmpi eq, %arg1, %c0_i32_8 : i32
    %10 = arith.extui %9 : i1 to i32
    %c0_i32_9 = arith.constant 0 : i32
    %11 = arith.cmpi ne, %10, %c0_i32_9 : i32
    scf.if %11 {
      %c0_10 = arith.constant 0 : index
      %c0_11 = arith.constant 0 : index
      %12 = vector.load %arg7[%c0_10, %c0_11] : memref<128x4xf32, #tpu.memory_space<vmem>>, vector<128x4xf32>
      %c0_12 = arith.constant 0 : index
      %c0_13 = arith.constant 0 : index
      %13 = vector.load %arg4[%c0_12, %c0_13] : memref<128x4xf32, #tpu.memory_space<vmem>>, vector<128x4xf32>
      tpu.vector_store %arg4[%c0_12, %c0_13], %12 {strides = array<i32>} : memref<128x4xf32, #tpu.memory_space<vmem>>, vector<128x4xf32>,
      %cst_14 = arith.constant dense<0.000000e+00> : vector<4xf32>
      %14 = vector.multi_reduction <add>, %12, %cst_14 [0] : vector<128x4xf32> to vector<4xf32>
      %15 = vector.shape_cast %14 : vector<4xf32> to vector<1x4xf32>
      %16 = vector.shape_cast %15 : vector<1x4xf32> to vector<1x1x4xf32>
      %c0_15 = arith.constant 0 : index
      %c0_16 = arith.constant 0 : index
      %c0_17 = arith.constant 0 : index
      %17 = vector.load %arg5[%c0_15, %c0_16, %c0_17] : memref<1x1x4xf32, #tpu.memory_space<vmem>>, vector<1x1x4xf32>
      tpu.vector_store %arg5[%c0_15, %c0_16, %c0_17], %16 {strides = array<i32>} : memref<1x1x4xf32, #tpu.memory_space<vmem>>, vector<1x1x4xf32>,
      %18 = arith.mulf %12, %12 : vector<128x4xf32>
      %cst_18 = arith.constant dense<0.000000e+00> : vector<4xf32>
      %19 = vector.multi_reduction <add>, %18, %cst_18 [0] : vector<128x4xf32> to vector<4xf32>
      %20 = vector.shape_cast %19 : vector<4xf32> to vector<1x4xf32>
      %21 = vector.shape_cast %20 : vector<1x4xf32> to vector<1x1x4xf32>
      %c0_19 = arith.constant 0 : index
      %c0_20 = arith.constant 0 : index
      %c0_21 = arith.constant 0 : index
      %22 = vector.load %arg6[%c0_19, %c0_20, %c0_21] : memref<1x1x4xf32, #tpu.memory_space<vmem>>, vector<1x1x4xf32>
      tpu.vector_store %arg6[%c0_19, %c0_20, %c0_21], %21 {strides = array<i32>} : memref<1x1x4xf32, #tpu.memory_space<vmem>>, vector<1x1x4xf32>,
    } else {
    }
    return
  }
  func.func @transform_0(%arg0: i32, %arg1: i32) -> (i32, i32) {
    %c0_i32 = arith.constant 0 : i32
    return %arg0, %arg1 : i32, i32
  }
  func.func @transform_1(%arg0: i32, %arg1: i32) -> (i32, i32) {
    %c0_i32 = arith.constant 0 : i32
    %c0_i32_0 = arith.constant 0 : i32
    return %arg1, %c0_i32 : i32, i32
  }
  func.func @transform_2(%arg0: i32, %arg1: i32) -> (i32, i32) {
    %c0_i32 = arith.constant 0 : i32
    %c0_i32_0 = arith.constant 0 : i32
    return %arg0, %c0_i32 : i32, i32
  }
  func.func @transform_3(%arg0: i32, %arg1: i32) -> (i32, i32, i32) {
    %c0_i32 = arith.constant 0 : i32
    %c0_i32_0 = arith.constant 0 : i32
    %c0_i32_1 = arith.constant 0 : i32
    return %arg0, %c0_i32, %c0_i32_0 : i32, i32, i32
  }
  func.func @transform_4(%arg0: i32, %arg1: i32) -> (i32, i32, i32) {
    %c0_i32 = arith.constant 0 : i32
    %c0_i32_0 = arith.constant 0 : i32
    %c0_i32_1 = arith.constant 0 : i32
    return %arg0, %c0_i32, %c0_i32_0 : i32, i32, i32
  }
}

module attributes {stable_mosaic.version = 11 : i64} {
  func.func @_dual_matmul_stats_kernel(%arg0: i32, %arg1: memref<128x4xbf16, #tpu.memory_space<vmem>>, %arg2: memref<4x16xbf16, #tpu.memory_space<vmem>>, %arg3: memref<128x4xbf16, #tpu.memory_space<vmem>>, %arg4: memref<4x16xbf16, #tpu.memory_space<vmem>>, %arg5: memref<128x16xf32, #tpu.memory_space<vmem>>, %arg6: memref<128x16xf32, #tpu.memory_space<vmem>>, %arg7: memref<1x1x16xf32, #tpu.memory_space<vmem>>, %arg8: memref<1x1x16xf32, #tpu.memory_space<vmem>>, %arg9: memref<1x1x16xf32, #tpu.memory_space<vmem>>, %arg10: memref<1x1x16xf32, #tpu.memory_space<vmem>>) attributes {dimension_semantics = [#tpu.dimension_semantics<parallel>], iteration_bounds = array<i64: 1>, scalar_prefetch = 0 : i64, scratch_operands = 0 : i64, tpu.core_type = #tpu.core_type<tc>, window_params = [{transform_indices = @transform_0, window_bounds = array<i64: 128, 4>}, {pipeline_mode = #tpu.pipeline_mode<synchronous>, transform_indices = @transform_1, window_bounds = array<i64: 4, 16>}, {transform_indices = @transform_2, window_bounds = array<i64: 128, 4>}, {pipeline_mode = #tpu.pipeline_mode<synchronous>, transform_indices = @transform_3, window_bounds = array<i64: 4, 16>}, {transform_indices = @transform_4, window_bounds = array<i64: 128, 16>}, {transform_indices = @transform_5, window_bounds = array<i64: 128, 16>}, {transform_indices = @transform_6, window_bounds = array<i64: 1, 1, 16>}, {transform_indices = @transform_7, window_bounds = array<i64: 1, 1, 16>}, {transform_indices = @transform_8, window_bounds = array<i64: 1, 1, 16>}, {transform_indices = @transform_9, window_bounds = array<i64: 1, 1, 16>}]} {
    %c0 = arith.constant 0 : index
    %c0_0 = arith.constant 0 : index
    %0 = vector.load %arg1[%c0, %c0_0] : memref<128x4xbf16, #tpu.memory_space<vmem>>, vector<128x4xbf16>
    %c0_1 = arith.constant 0 : index
    %c0_2 = arith.constant 0 : index
    %1 = vector.load %arg2[%c0_1, %c0_2] : memref<4x16xbf16, #tpu.memory_space<vmem>>, vector<4x16xbf16>
    %cst = arith.constant dense<0.000000e+00> : vector<128x16xf32>
    %2 = tpu.matmul %0, %1, %cst {dimension_numbers = #tpu.dot_dimension_numbers<[1], [0], [0], [1], [0, 0, 1, 1], [], []>} : vector<128x4xbf16>, vector<4x16xbf16>, vector<128x16xf32> -> vector<128x16xf32>
    %c0_3 = arith.constant 0 : index
    %c0_4 = arith.constant 0 : index
    %3 = vector.load %arg3[%c0_3, %c0_4] : memref<128x4xbf16, #tpu.memory_space<vmem>>, vector<128x4xbf16>
    %c0_5 = arith.constant 0 : index
    %c0_6 = arith.constant 0 : index
    %4 = vector.load %arg4[%c0_5, %c0_6] : memref<4x16xbf16, #tpu.memory_space<vmem>>, vector<4x16xbf16>
    %cst_7 = arith.constant dense<0.000000e+00> : vector<128x16xf32>
    %5 = tpu.matmul %3, %4, %cst_7 {dimension_numbers = #tpu.dot_dimension_numbers<[1], [0], [0], [1], [0, 0, 1, 1], [], []>} : vector<128x4xbf16>, vector<4x16xbf16>, vector<128x16xf32> -> vector<128x16xf32>
    %c0_8 = arith.constant 0 : index
    %c0_9 = arith.constant 0 : index
    %6 = vector.load %arg5[%c0_8, %c0_9] : memref<128x16xf32, #tpu.memory_space<vmem>>, vector<128x16xf32>
    tpu.vector_store %arg5[%c0_8, %c0_9], %2 {strides = array<i32>} : memref<128x16xf32, #tpu.memory_space<vmem>>, vector<128x16xf32>,
    %c0_10 = arith.constant 0 : index
    %c0_11 = arith.constant 0 : index
    %7 = vector.load %arg6[%c0_10, %c0_11] : memref<128x16xf32, #tpu.memory_space<vmem>>, vector<128x16xf32>
    tpu.vector_store %arg6[%c0_10, %c0_11], %5 {strides = array<i32>} : memref<128x16xf32, #tpu.memory_space<vmem>>, vector<128x16xf32>,
    %cst_12 = arith.constant dense<0.000000e+00> : vector<16xf32>
    %8 = vector.multi_reduction <add>, %2, %cst_12 [0] : vector<128x16xf32> to vector<16xf32>
    %9 = vector.shape_cast %8 : vector<16xf32> to vector<1x16xf32>
    %10 = vector.shape_cast %9 : vector<1x16xf32> to vector<1x1x16xf32>
    %c0_13 = arith.constant 0 : index
    %c0_14 = arith.constant 0 : index
    %c0_15 = arith.constant 0 : index
    %11 = vector.load %arg7[%c0_13, %c0_14, %c0_15] : memref<1x1x16xf32, #tpu.memory_space<vmem>>, vector<1x1x16xf32>
    tpu.vector_store %arg7[%c0_13, %c0_14, %c0_15], %10 {strides = array<i32>} : memref<1x1x16xf32, #tpu.memory_space<vmem>>, vector<1x1x16xf32>,
    %12 = arith.mulf %2, %2 : vector<128x16xf32>
    %cst_16 = arith.constant dense<0.000000e+00> : vector<16xf32>
    %13 = vector.multi_reduction <add>, %12, %cst_16 [0] : vector<128x16xf32> to vector<16xf32>
    %14 = vector.shape_cast %13 : vector<16xf32> to vector<1x16xf32>
    %15 = vector.shape_cast %14 : vector<1x16xf32> to vector<1x1x16xf32>
    %c0_17 = arith.constant 0 : index
    %c0_18 = arith.constant 0 : index
    %c0_19 = arith.constant 0 : index
    %16 = vector.load %arg8[%c0_17, %c0_18, %c0_19] : memref<1x1x16xf32, #tpu.memory_space<vmem>>, vector<1x1x16xf32>
    tpu.vector_store %arg8[%c0_17, %c0_18, %c0_19], %15 {strides = array<i32>} : memref<1x1x16xf32, #tpu.memory_space<vmem>>, vector<1x1x16xf32>,
    %cst_20 = arith.constant dense<0.000000e+00> : vector<16xf32>
    %17 = vector.multi_reduction <add>, %5, %cst_20 [0] : vector<128x16xf32> to vector<16xf32>
    %18 = vector.shape_cast %17 : vector<16xf32> to vector<1x16xf32>
    %19 = vector.shape_cast %18 : vector<1x16xf32> to vector<1x1x16xf32>
    %c0_21 = arith.constant 0 : index
    %c0_22 = arith.constant 0 : index
    %c0_23 = arith.constant 0 : index
    %20 = vector.load %arg9[%c0_21, %c0_22, %c0_23] : memref<1x1x16xf32, #tpu.memory_space<vmem>>, vector<1x1x16xf32>
    tpu.vector_store %arg9[%c0_21, %c0_22, %c0_23], %19 {strides = array<i32>} : memref<1x1x16xf32, #tpu.memory_space<vmem>>, vector<1x1x16xf32>,
    %21 = arith.mulf %5, %5 : vector<128x16xf32>
    %cst_24 = arith.constant dense<0.000000e+00> : vector<16xf32>
    %22 = vector.multi_reduction <add>, %21, %cst_24 [0] : vector<128x16xf32> to vector<16xf32>
    %23 = vector.shape_cast %22 : vector<16xf32> to vector<1x16xf32>
    %24 = vector.shape_cast %23 : vector<1x16xf32> to vector<1x1x16xf32>
    %c0_25 = arith.constant 0 : index
    %c0_26 = arith.constant 0 : index
    %c0_27 = arith.constant 0 : index
    %25 = vector.load %arg10[%c0_25, %c0_26, %c0_27] : memref<1x1x16xf32, #tpu.memory_space<vmem>>, vector<1x1x16xf32>
    tpu.vector_store %arg10[%c0_25, %c0_26, %c0_27], %24 {strides = array<i32>} : memref<1x1x16xf32, #tpu.memory_space<vmem>>, vector<1x1x16xf32>,
    return
  }
  func.func @transform_0(%arg0: i32) -> (i32, i32) {
    %c0_i32 = arith.constant 0 : i32
    %c0_i32_0 = arith.constant 0 : i32
    return %arg0, %c0_i32 : i32, i32
  }
  func.func @transform_1(%arg0: i32) -> (i32, i32) {
    %c0_i32 = arith.constant 0 : i32
    %c0_i32_0 = arith.constant 0 : i32
    %c0_i32_1 = arith.constant 0 : i32
    return %c0_i32, %c0_i32_0 : i32, i32
  }
  func.func @transform_2(%arg0: i32) -> (i32, i32) {
    %c0_i32 = arith.constant 0 : i32
    %c0_i32_0 = arith.constant 0 : i32
    return %arg0, %c0_i32 : i32, i32
  }
  func.func @transform_3(%arg0: i32) -> (i32, i32) {
    %c0_i32 = arith.constant 0 : i32
    %c0_i32_0 = arith.constant 0 : i32
    %c0_i32_1 = arith.constant 0 : i32
    return %c0_i32, %c0_i32_0 : i32, i32
  }
  func.func @transform_4(%arg0: i32) -> (i32, i32) {
    %c0_i32 = arith.constant 0 : i32
    %c0_i32_0 = arith.constant 0 : i32
    return %arg0, %c0_i32 : i32, i32
  }
  func.func @transform_5(%arg0: i32) -> (i32, i32) {
    %c0_i32 = arith.constant 0 : i32
    %c0_i32_0 = arith.constant 0 : i32
    return %arg0, %c0_i32 : i32, i32
  }
  func.func @transform_6(%arg0: i32) -> (i32, i32, i32) {
    %c0_i32 = arith.constant 0 : i32
    %c0_i32_0 = arith.constant 0 : i32
    %c0_i32_1 = arith.constant 0 : i32
    return %arg0, %c0_i32, %c0_i32_0 : i32, i32, i32
  }
  func.func @transform_7(%arg0: i32) -> (i32, i32, i32) {
    %c0_i32 = arith.constant 0 : i32
    %c0_i32_0 = arith.constant 0 : i32
    %c0_i32_1 = arith.constant 0 : i32
    return %arg0, %c0_i32, %c0_i32_0 : i32, i32, i32
  }
  func.func @transform_8(%arg0: i32) -> (i32, i32, i32) {
    %c0_i32 = arith.constant 0 : i32
    %c0_i32_0 = arith.constant 0 : i32
    %c0_i32_1 = arith.constant 0 : i32
    return %arg0, %c0_i32, %c0_i32_0 : i32, i32, i32
  }
  func.func @transform_9(%arg0: i32) -> (i32, i32, i32) {
    %c0_i32 = arith.constant 0 : i32
    %c0_i32_0 = arith.constant 0 : i32
    %c0_i32_1 = arith.constant 0 : i32
    return %arg0, %c0_i32, %c0_i32_0 : i32, i32, i32
  }
}

module attributes {stable_mosaic.version = 11 : i64} {
  func.func @_dual_bn_add_relu_kernel(%arg0: i32, %arg1: memref<128x16xf32, #tpu.memory_space<vmem>>, %arg2: memref<128x16xf32, #tpu.memory_space<vmem>>, %arg3: memref<1x16xf32, #tpu.memory_space<vmem>>, %arg4: memref<1x16xf32, #tpu.memory_space<vmem>>, %arg5: memref<1x16xf32, #tpu.memory_space<vmem>>, %arg6: memref<1x16xf32, #tpu.memory_space<vmem>>, %arg7: memref<128x16xf32, #tpu.memory_space<vmem>>) attributes {dimension_semantics = [#tpu.dimension_semantics<parallel>], iteration_bounds = array<i64: 1>, scalar_prefetch = 0 : i64, scratch_operands = 0 : i64, tpu.core_type = #tpu.core_type<tc>, window_params = [{transform_indices = @transform_0, window_bounds = array<i64: 128, 16>}, {transform_indices = @transform_1, window_bounds = array<i64: 128, 16>}, {pipeline_mode = #tpu.pipeline_mode<synchronous>, transform_indices = @transform_2, window_bounds = array<i64: 1, 16>}, {pipeline_mode = #tpu.pipeline_mode<synchronous>, transform_indices = @transform_3, window_bounds = array<i64: 1, 16>}, {pipeline_mode = #tpu.pipeline_mode<synchronous>, transform_indices = @transform_4, window_bounds = array<i64: 1, 16>}, {pipeline_mode = #tpu.pipeline_mode<synchronous>, transform_indices = @transform_5, window_bounds = array<i64: 1, 16>}, {transform_indices = @transform_6, window_bounds = array<i64: 128, 16>}]} {
    %c0 = arith.constant 0 : index
    %c0_0 = arith.constant 0 : index
    %0 = vector.load %arg1[%c0, %c0_0] : memref<128x16xf32, #tpu.memory_space<vmem>>, vector<128x16xf32>
    %c0_1 = arith.constant 0 : index
    %c0_2 = arith.constant 0 : index
    %1 = vector.load %arg3[%c0_1, %c0_2] : memref<1x16xf32, #tpu.memory_space<vmem>>, vector<1x16xf32>
    %2 = vector.broadcast %1 : vector<1x16xf32> to vector<128x16xf32>
    %3 = arith.mulf %0, %2 : vector<128x16xf32>
    %c0_3 = arith.constant 0 : index
    %c0_4 = arith.constant 0 : index
    %4 = vector.load %arg4[%c0_3, %c0_4] : memref<1x16xf32, #tpu.memory_space<vmem>>, vector<1x16xf32>
    %5 = vector.broadcast %4 : vector<1x16xf32> to vector<128x16xf32>
    %6 = arith.addf %3, %5 : vector<128x16xf32>
    %c0_5 = arith.constant 0 : index
    %c0_6 = arith.constant 0 : index
    %7 = vector.load %arg2[%c0_5, %c0_6] : memref<128x16xf32, #tpu.memory_space<vmem>>, vector<128x16xf32>
    %c0_7 = arith.constant 0 : index
    %c0_8 = arith.constant 0 : index
    %8 = vector.load %arg5[%c0_7, %c0_8] : memref<1x16xf32, #tpu.memory_space<vmem>>, vector<1x16xf32>
    %9 = vector.broadcast %8 : vector<1x16xf32> to vector<128x16xf32>
    %10 = arith.mulf %7, %9 : vector<128x16xf32>
    %11 = arith.addf %6, %10 : vector<128x16xf32>
    %c0_9 = arith.constant 0 : index
    %c0_10 = arith.constant 0 : index
    %12 = vector.load %arg6[%c0_9, %c0_10] : memref<1x16xf32, #tpu.memory_space<vmem>>, vector<1x16xf32>
    %13 = vector.broadcast %12 : vector<1x16xf32> to vector<128x16xf32>
    %14 = arith.addf %11, %13 : vector<128x16xf32>
    %cst = arith.constant 0.000000e+00 : f32
    %15 = vector.broadcast %cst : f32 to vector<128x16xf32>
    %16 = arith.maximumf %14, %15 : vector<128x16xf32>
    %c0_11 = arith.constant 0 : index
    %c0_12 = arith.constant 0 : index
    %17 = vector.load %arg7[%c0_11, %c0_12] : memref<128x16xf32, #tpu.memory_space<vmem>>, vector<128x16xf32>
    tpu.vector_store %arg7[%c0_11, %c0_12], %16 {strides = array<i32>} : memref<128x16xf32, #tpu.memory_space<vmem>>, vector<128x16xf32>,
    return
  }
  func.func @transform_0(%arg0: i32) -> (i32, i32) {
    %c0_i32 = arith.constant 0 : i32
    %c0_i32_0 = arith.constant 0 : i32
    return %arg0, %c0_i32 : i32, i32
  }
  func.func @transform_1(%arg0: i32) -> (i32, i32) {
    %c0_i32 = arith.constant 0 : i32
    %c0_i32_0 = arith.constant 0 : i32
    return %arg0, %c0_i32 : i32, i32
  }
  func.func @transform_2(%arg0: i32) -> (i32, i32) {
    %c0_i32 = arith.constant 0 : i32
    %c0_i32_0 = arith.constant 0 : i32
    %c0_i32_1 = arith.constant 0 : i32
    return %c0_i32, %c0_i32_0 : i32, i32
  }
  func.func @transform_3(%arg0: i32) -> (i32, i32) {
    %c0_i32 = arith.constant 0 : i32
    %c0_i32_0 = arith.constant 0 : i32
    %c0_i32_1 = arith.constant 0 : i32
    return %c0_i32, %c0_i32_0 : i32, i32
  }
  func.func @transform_4(%arg0: i32) -> (i32, i32) {
    %c0_i32 = arith.constant 0 : i32
    %c0_i32_0 = arith.constant 0 : i32
    %c0_i32_1 = arith.constant 0 : i32
    return %c0_i32, %c0_i32_0 : i32, i32
  }
  func.func @transform_5(%arg0: i32) -> (i32, i32) {
    %c0_i32 = arith.constant 0 : i32
    %c0_i32_0 = arith.constant 0 : i32
    %c0_i32_1 = arith.constant 0 : i32
    return %c0_i32, %c0_i32_0 : i32, i32
  }
  func.func @transform_6(%arg0: i32) -> (i32, i32) {
    %c0_i32 = arith.constant 0 : i32
    %c0_i32_0 = arith.constant 0 : i32
    return %arg0, %c0_i32 : i32, i32
  }
}

</mosaic_0001>

<bundles_post_ra>
// kernel: bottleneck_forward.7
= control target key start
LH: loop header
LB: loop body
LE: loop exit
PB: predicated region body
PF: predicated region fallthrough
CT: control target
= control target key end

     0   :  { %vm342_vm0 = vcmask 27648   ;;  %s1019_s0 = inlined_call_operand.vmem [shape: f32[512,4], index: 0, kind: input, shape index: {}]   ;;  %s1020_s1 = inlined_call_operand.vmem [shape: f32[1,4], index: 1, kind: input, shape index: {}]   ;;  %s1021_s2 = inlined_call_operand.vmem [shape: f32[1,4], index: 2, kind: input, shape index: {}]   ;;  %s1022_s3 = inlined_call_operand.vmem [shape: bf16[512,4], index: 3, kind: output, shape index: {}]  }
   0x1   :  { %v14_v0 = vld [vmem:[%s1019_s0] sm:$0xff]  ;;  %v15_v3 = vld [vmem:[%s1019_s0 + $0x8] sm:$0xff]  ;;  %v16_v6 = vld [vmem:[%s1019_s0 + $0x10] sm:$0xff] }
   0x2   :  { %v439_v1 = vld [vmem:[%s1020_s1] ss:$0 sm:$0xff]  ;;  %v17_v7 = vld [vmem:[%s1019_s0 + $0x18] sm:$0xff]  ;;  %v19_v12 = vld [vmem:[%s1019_s0 + $0x28] sm:$0xff] }
   0x3   :  { %v444_v2 = vld [vmem:[%s1021_s2] ss:$0 sm:$0xff]  ;;  %v82_v4 = vmul.f32 %v439_v1, %v14_v0  ;;  %v83_v5 = vmul.f32 %v439_v1, %v15_v3  ;;  %v84_v9 = vmul.f32 %v439_v1, %v16_v6  ;;  %v85_v10 = vmul.f32 %v439_v1, %v17_v7  ;;  %v20_v13 = vld [vmem:[%s1019_s0 + $0x30] sm:$0xff]  ;;  %v21_v14 = vld [vmem:[%s1019_s0 + $0x38] sm:$0xff] }
   0x4   :  { %v18_v8 = vld [vmem:[%s1019_s0 + $0x20] sm:$0xff]  ;;  %v87_v17 = vmul.f32 %v439_v1, %v19_v12  ;;  %v88_v18 = vmul.f32 %v439_v1, %v20_v13  ;;  %v89_v22 = vmul.f32 %v439_v1, %v21_v14  ;;  %v23_v32 = vld [vmem:[%s1019_s0 + $0x48] sm:$0xff]  ;;  %v24_v37 = vld [vmem:[%s1019_s0 + $0x50] sm:$0xff] }
   0x5   :  { %v86_v11 = vmul.f32 %v439_v1, %v18_v8  ;;  %v150_v15 = vadd.f32 %v444_v2, %v82_v4  ;;  %v151_v16 = vadd.f32 %v444_v2, %v83_v5  ;;  %v152_v19 = vadd.f32 %v444_v2, %v84_v9  ;;  %v22_v31 = vld [vmem:[%s1019_s0 + $0x40] sm:$0xff]  ;;  %v25_v38 = vld [vmem:[%s1019_s0 + $0x58] sm:$0xff]  ;;  %v27_v44 = vld [vmem:[%s1019_s0 + $0x68] sm:$0xff] }
   0x6   :  { %v153_v20 = vadd.f32 %v444_v2, %v85_v10  ;;  %v155_v25 = vadd.f32 %v444_v2, %v87_v17  ;;  %v156_v26 = vadd.f32 %v444_v2, %v88_v18  ;;  %v157_v30 = vadd.f32 %v444_v2, %v89_v22  ;;  %v26_v39 = vld [vmem:[%s1019_s0 + $0x60] sm:$0xff]  ;;  %v28_v45 = vld [vmem:[%s1019_s0 + $0x70] sm:$0xff]  ;;  %v29_v50 = vld [vmem:[%s1019_s0 + $0x78] sm:$0xff] }
   0x7   :  { %v154_v21 = vadd.f32 %v444_v2, %v86_v11  ;;  %v214_v23 = vmax.f32 %v150_v15, 0.0  ;;  %v215_v24 = vmax.f32 %v151_v16, 0.0  ;;  %v216_v27 = vmax.f32 %v152_v19, 0.0  ;;  %v30_v5 = vld [vmem:[%s1019_s0 + $0x80] sm:$0xff]  ;;  %v31_v6 = vld [vmem:[%s1019_s0 + $0x88] sm:$0xff]  ;;  %v32_v11 = vld [vmem:[%s1019_s0 + $0x90] sm:$0xff] }
   0x8   :  { %v217_v28 = vmax.f32 %v153_v20, 0.0  ;;  %v219_v35 = vmax.f32 %v155_v25, 0.0  ;;  %v220_v36 = vmax.f32 %v156_v26, 0.0  ;;  %v221_v43 = vmax.f32 %v157_v30, 0.0  ;;  %v33_v16 = vld [vmem:[%s1019_s0 + $0x98] sm:$0xff]  ;;  %v34_v17 = vld [vmem:[%s1019_s0 + $0xa0] sm:$0xff] }
   0x9   :  { %v218_v29 = vmax.f32 %v154_v21, 0.0  ;;  %v278_v33 = vpack.c.bf16 %v214_v23, %v214_v23  ;;  %v279_v34 = vpack.c.bf16 %v215_v24, %v215_v24  ;;  %v280_v40 = vpack.c.bf16 %v216_v27, %v216_v27  ;;  %v35_v22 = vld [vmem:[%s1019_s0 + $0xa8] sm:$0xff]  ;;  %v36_v23 = vld [vmem:[%s1019_s0 + $0xb0] sm:$0xff] }
   0xa   :  { %v281_v41 = vpack.c.bf16 %v217_v28, %v217_v28  ;;  %v283_v46 = vpack.c.bf16 %v219_v35, %v219_v35  ;;  %v284_v47 = vpack.c.bf16 %v220_v36, %v220_v36  ;;  %v90_v48 = vmul.f32 %v439_v1, %v22_v31  ;;  %v37_v28 = vld [vmem:[%s1019_s0 + $0xb8] sm:$0xff] }
   0xb   :  { %v282_v42 = vpack.c.bf16 %v218_v29, %v218_v29  ;;  %343 = vst.msk [vmem:[%s1022_s3] sm:$0xf] %vm342_vm0, %v278_v33  ;;  %v91_v49 = vmul.f32 %v439_v1, %v23_v32  ;;  %v285_v51 = vpack.c.bf16 %v221_v43, %v221_v43  ;;  %v92_v52 = vmul.f32 %v439_v1, %v24_v37 }
   0xc   :  { %344 = vst.msk [vmem:[%s1022_s3 + $0x4] sm:$0xf] %vm342_vm0, %v279_v34  ;;  %v93_v53 = vmul.f32 %v439_v1, %v25_v38  ;;  %v94_v54 = vmul.f32 %v439_v1, %v26_v39  ;;  %v158_v55 = vadd.f32 %v444_v2, %v90_v48  ;;  %v95_v57 = vmul.f32 %v439_v1, %v27_v44 }
   0xd   :  { %345 = vst.msk [vmem:[%s1022_s3 + $0x8] sm:$0xf] %vm342_vm0, %v280_v40  ;;  %v159_v56 = vadd.f32 %v444_v2, %v91_v49  ;;  %v96_v58 = vmul.f32 %v439_v1, %v28_v45  ;;  %v160_v59 = vadd.f32 %v444_v2, %v92_v52  ;;  %v97_v62 = vmul.f32 %v439_v1, %v29_v50  ;;  %v38_v45 = vld [vmem:[%s1019_s0 + $0xc0] sm:$0xff] }
   0xe   :  { %346 = vst.msk [vmem:[%s1022_s3 + $0xc] sm:$0xf] %vm342_vm0, %v281_v41  ;;  %v161_v60 = vadd.f32 %v444_v2, %v93_v53  ;;  %v162_v61 = vadd.f32 %v444_v2, %v94_v54  ;;  %v222_v63 = vmax.f32 %v158_v55, 0.0  ;;  %v163_v3 = vadd.f32 %v444_v2, %v95_v57  ;;  %v42_v57 = vld [vmem:[%s1019_s0 + $0xe0] sm:$0xff] }
   0xf   :  { %347 = vst.msk [vmem:[%s1022_s3 + $0x10] sm:$0xf] %vm342_vm0, %v282_v42  ;;  %v223_v0 = vmax.f32 %v159_v56, 0.0  ;;  %v164_v4 = vadd.f32 %v444_v2, %v96_v58  ;;  %v224_v7 = vmax.f32 %v160_v59, 0.0  ;;  %v165_v10 = vadd.f32 %v444_v2, %v97_v62  ;;  %v41_v56 = vld [vmem:[%s1019_s0 + $0xd8] sm:$0xff]  ;;  %v43_v62 = vld [vmem:[%s1019_s0 + $0xe8] sm:$0xff] }
  0x10   :  { %348 = vst.msk [vmem:[%s1022_s3 + $0x14] sm:$0xf] %vm342_vm0, %v283_v46  ;;  %v225_v8 = vmax.f32 %v161_v60, 0.0  ;;  %v226_v9 = vmax.f32 %v162_v61, 0.0  ;;  %v286_v12 = vpack.c.bf16 %v222_v63, %v222_v63  ;;  %v227_v14 = vmax.f32 %v163_v3, 0.0  ;;  %v39_v46 = vld [vmem:[%s1019_s0 + $0xc8] sm:$0xff] }
  0x11   :  { %349 = vst.msk [vmem:[%s1022_s3 + $0x18] sm:$0xf] %vm342_vm0, %v284_v47  ;;  %v287_v13 = vpack.c.bf16 %v223_v0, %v223_v0  ;;  %v228_v15 = vmax.f32 %v164_v4, 0.0  ;;  %v288_v18 = vpack.c.bf16 %v224_v7, %v224_v7  ;;  %v229_v21 = vmax.f32 %v165_v10, 0.0  ;;  %v44_v63 = vld [vmem:[%s1019_s0 + $0xf0] sm:$0xff] }
  0x12   :  { %350 = vst.msk [vmem:[%s1022_s3 + $0x1c] sm:$0xf] %vm342_vm0, %v285_v51  ;;  %v289_v19 = vpack.c.bf16 %v225_v8, %v225_v8  ;;  %v290_v20 = vpack.c.bf16 %v226_v9, %v226_v9  ;;  %v291_v24 = vpack.c.bf16 %v227_v14, %v227_v14  ;;  %v98_v26 = vmul.f32 %v439_v1, %v30_v5  ;;  %v40_v51 = vld [vmem:[%s1019_s0 + $0xd0] sm:$0xff] }
  0x13   :  { %351 = vst.msk [vmem:[%s1022_s3 + $0x20] sm:$0xf] %vm342_vm0, %v286_v12  ;;  %v292_v25 = vpack.c.bf16 %v228_v15, %v228_v15  ;;  %v99_v27 = vmul.f32 %v439_v1, %v31_v6  ;;  %v293_v29 = vpack.c.bf16 %v229_v21, %v229_v21  ;;  %v100_v30 = vmul.f32 %v439_v1, %v32_v11  ;;  %v45_v6 = vld [vmem:[%s1019_s0 + $0xf8] sm:$0xff] }
  0x14   :  { %352 = vst.msk [vmem:[%s1022_s3 + $0x24] sm:$0xf] %vm342_vm0, %v287_v13  ;;  %v101_v31 = vmul.f32 %v439_v1, %v33_v16  ;;  %v102_v32 = vmul.f32 %v439_v1, %v34_v17  ;;  %v166_v33 = vadd.f32 %v444_v2, %v98_v26  ;;  %v103_v35 = vmul.f32 %v439_v1, %v35_v22 }
  0x15   :  { %353 = vst.msk [vmem:[%s1022_s3 + $0x28] sm:$0xf] %vm342_vm0, %v288_v18  ;;  %v167_v34 = vadd.f32 %v444_v2, %v99_v27  ;;  %v104_v36 = vmul.f32 %v439_v1, %v36_v23  ;;  %v168_v37 = vadd.f32 %v444_v2, %v100_v30  ;;  %v105_v40 = vmul.f32 %v439_v1, %v37_v28  ;;  %v46_v23 = vld [vmem:[%s1019_s0 + $0x100] sm:$0xff] }
  0x16   :  { %354 = vst.msk [vmem:[%s1022_s3 + $0x2c] sm:$0xf] %vm342_vm0, %v289_v19  ;;  %v169_v38 = vadd.f32 %v444_v2, %v101_v31  ;;  %v170_v39 = vadd.f32 %v444_v2, %v102_v32  ;;  %v230_v41 = vmax.f32 %v166_v33, 0.0  ;;  %v171_v43 = vadd.f32 %v444_v2, %v103_v35  ;;  %v50_v35 = vld [vmem:[%s1019_s0 + $0x120] sm:$0xff] }
  0x17   :  { %355 = vst.msk [vmem:[%s1022_s3 + $0x30] sm:$0xf] %vm342_vm0, %v290_v20  ;;  %v231_v42 = vmax.f32 %v167_v34, 0.0  ;;  %v172_v44 = vadd.f32 %v444_v2, %v104_v36  ;;  %v232_v47 = vmax.f32 %v168_v37, 0.0  ;;  %v173_v50 = vadd.f32 %v444_v2, %v105_v40  ;;  %v49_v34 = vld [vmem:[%s1019_s0 + $0x118] sm:$0xff]  ;;  %v51_v40 = vld [vmem:[%s1019_s0 + $0x128] sm:$0xff] }
  0x18   :  { %356 = vst.msk [vmem:[%s1022_s3 + $0x34] sm:$0xf] %vm342_vm0, %v291_v24  ;;  %v233_v48 = vmax.f32 %v169_v38, 0.0  ;;  %v234_v49 = vmax.f32 %v170_v39, 0.0  ;;  %v294_v52 = vpack.c.bf16 %v230_v41, %v230_v41  ;;  %v235_v54 = vmax.f32 %v171_v43, 0.0  ;;  %v47_v24 = vld [vmem:[%s1019_s0 + $0x108] sm:$0xff] }
  0x19   :  { %357 = vst.msk [vmem:[%s1022_s3 + $0x38] sm:$0xf] %vm342_vm0, %v292_v25  ;;  %v295_v53 = vpack.c.bf16 %v231_v42, %v231_v42  ;;  %v236_v55 = vmax.f32 %v172_v44, 0.0  ;;  %v296_v58 = vpack.c.bf16 %v232_v47, %v232_v47  ;;  %v237_v61 = vmax.f32 %v173_v50, 0.0  ;;  %v52_v41 = vld [vmem:[%s1019_s0 + $0x130] sm:$0xff] }
  0x1a   :  { %358 = vst.msk [vmem:[%s1022_s3 + $0x3c] sm:$0xf] %vm342_vm0, %v293_v29  ;;  %v297_v59 = vpack.c.bf16 %v233_v48, %v233_v48  ;;  %v298_v60 = vpack.c.bf16 %v234_v49, %v234_v49  ;;  %v299_v0 = vpack.c.bf16 %v235_v54, %v235_v54  ;;  %v106_v4 = vmul.f32 %v439_v1, %v38_v45  ;;  %v48_v29 = vld [vmem:[%s1019_s0 + $0x110] sm:$0xff] }
  0x1b   :  { %359 = vst.msk [vmem:[%s1022_s3 + $0x40] sm:$0xf] %vm342_vm0, %v294_v52  ;;  %v300_v3 = vpack.c.bf16 %v236_v55, %v236_v55  ;;  %v107_v5 = vmul.f32 %v439_v1, %v39_v46  ;;  %v301_v7 = vpack.c.bf16 %v237_v61, %v237_v61  ;;  %v108_v8 = vmul.f32 %v439_v1, %v40_v51  ;;  %v53_v46 = vld [vmem:[%s1019_s0 + $0x138] sm:$0xff] }
  0x1c   :  { %360 = vst.msk [vmem:[%s1022_s3 + $0x44] sm:$0xf] %vm342_vm0, %v295_v53  ;;  %v109_v9 = vmul.f32 %v439_v1, %v41_v56  ;;  %v110_v10 = vmul.f32 %v439_v1, %v42_v57  ;;  %v174_v11 = vadd.f32 %v444_v2, %v106_v4  ;;  %v111_v13 = vmul.f32 %v439_v1, %v43_v62 }
  0x1d   :  { %361 = vst.msk [vmem:[%s1022_s3 + $0x48] sm:$0xf] %vm342_vm0, %v296_v58  ;;  %v175_v12 = vadd.f32 %v444_v2, %v107_v5  ;;  %v112_v14 = vmul.f32 %v439_v1, %v44_v63  ;;  %v176_v15 = vadd.f32 %v444_v2, %v108_v8  ;;  %v113_v18 = vmul.f32 %v439_v1, %v45_v6  ;;  %v54_v63 = vld [vmem:[%s1019_s0 + $0x140] sm:$0xff] }
  0x1e   :  { %362 = vst.msk [vmem:[%s1022_s3 + $0x4c] sm:$0xf] %vm342_vm0, %v297_v59  ;;  %v177_v16 = vadd.f32 %v444_v2, %v109_v9  ;;  %v178_v17 = vadd.f32 %v444_v2, %v110_v10  ;;  %v238_v19 = vmax.f32 %v174_v11, 0.0  ;;  %v179_v21 = vadd.f32 %v444_v2, %v111_v13  ;;  %v58_v13 = vld [vmem:[%s1019_s0 + $0x160] sm:$0xff] }
  0x1f   :  { %363 = vst.msk [vmem:[%s1022_s3 + $0x50] sm:$0xf] %vm342_vm0, %v298_v60  ;;  %v239_v20 = vmax.f32 %v175_v12, 0.0  ;;  %v180_v22 = vadd.f32 %v444_v2, %v112_v14  ;;  %v240_v25 = vmax.f32 %v176_v15, 0.0  ;;  %v181_v28 = vadd.f32 %v444_v2, %v113_v18  ;;  %v57_v12 = vld [vmem:[%s1019_s0 + $0x158] sm:$0xff]  ;;  %v59_v18 = vld [vmem:[%s1019_s0 + $0x168] sm:$0xff] }
  0x20   :  { %364 = vst.msk [vmem:[%s1022_s3 + $0x54] sm:$0xf] %vm342_vm0, %v299_v0  ;;  %v241_v26 = vmax.f32 %v177_v16, 0.0  ;;  %v242_v27 = vmax.f32 %v178_v17, 0.0  ;;  %v302_v30 = vpack.c.bf16 %v238_v19, %v238_v19  ;;  %v243_v32 = vmax.f32 %v179_v21, 0.0  ;;  %v55_v0 = vld [vmem:[%s1019_s0 + $0x148] sm:$0xff] }
  0x21   :  { %365 = vst.msk [vmem:[%s1022_s3 + $0x58] sm:$0xf] %vm342_vm0, %v300_v3  ;;  %v303_v31 = vpack.c.bf16 %v239_v20, %v239_v20  ;;  %v244_v33 = vmax.f32 %v180_v22, 0.0  ;;  %v304_v36 = vpack.c.bf16 %v240_v25, %v240_v25  ;;  %v245_v39 = vmax.f32 %v181_v28, 0.0  ;;  %v60_v19 = vld [vmem:[%s1019_s0 + $0x170] sm:$0xff] }
  0x22   :  { %366 = vst.msk [vmem:[%s1022_s3 + $0x5c] sm:$0xf] %vm342_vm0, %v301_v7  ;;  %v305_v37 = vpack.c.bf16 %v241_v26, %v241_v26  ;;  %v306_v38 = vpack.c.bf16 %v242_v27, %v242_v27  ;;  %v307_v42 = vpack.c.bf16 %v243_v32, %v243_v32  ;;  %v114_v44 = vmul.f32 %v439_v1, %v46_v23  ;;  %v56_v7 = vld [vmem:[%s1019_s0 + $0x150] sm:$0xff] }
  0x23   :  { %367 = vst.msk [vmem:[%s1022_s3 + $0x60] sm:$0xf] %vm342_vm0, %v302_v30  ;;  %v308_v43 = vpack.c.bf16 %v244_v33, %v244_v33  ;;  %v115_v45 = vmul.f32 %v439_v1, %v47_v24  ;;  %v309_v47 = vpack.c.bf16 %v245_v39, %v245_v39  ;;  %v116_v48 = vmul.f32 %v439_v1, %v48_v29  ;;  %v61_v24 = vld [vmem:[%s1019_s0 + $0x178] sm:$0xff] }
  0x24   :  { %368 = vst.msk [vmem:[%s1022_s3 + $0x64] sm:$0xf] %vm342_vm0, %v303_v31  ;;  %v117_v49 = vmul.f32 %v439_v1, %v49_v34  ;;  %v118_v50 = vmul.f32 %v439_v1, %v50_v35  ;;  %v182_v51 = vadd.f32 %v444_v2, %v114_v44  ;;  %v119_v53 = vmul.f32 %v439_v1, %v51_v40 }
  0x25   :  { %369 = vst.msk [vmem:[%s1022_s3 + $0x68] sm:$0xf] %vm342_vm0, %v304_v36  ;;  %v183_v52 = vadd.f32 %v444_v2, %v115_v45  ;;  %v120_v54 = vmul.f32 %v439_v1, %v52_v41  ;;  %v184_v55 = vadd.f32 %v444_v2, %v116_v48  ;;  %v121_v58 = vmul.f32 %v439_v1, %v53_v46  ;;  %v62_v41 = vld [vmem:[%s1019_s0 + $0x180] sm:$0xff] }
  0x26   :  { %370 = vst.msk [vmem:[%s1022_s3 + $0x6c] sm:$0xf] %vm342_vm0, %v305_v37  ;;  %v185_v56 = vadd.f32 %v444_v2, %v117_v49  ;;  %v186_v57 = vadd.f32 %v444_v2, %v118_v50  ;;  %v246_v59 = vmax.f32 %v182_v51, 0.0  ;;  %v187_v61 = vadd.f32 %v444_v2, %v119_v53  ;;  %v66_v53 = vld [vmem:[%s1019_s0 + $0x1a0] sm:$0xff] }
  0x27   :  { %371 = vst.msk [vmem:[%s1022_s3 + $0x70] sm:$0xf] %vm342_vm0, %v306_v38  ;;  %v247_v60 = vmax.f32 %v183_v52, 0.0  ;;  %v188_v62 = vadd.f32 %v444_v2, %v120_v54  ;;  %v248_v3 = vmax.f32 %v184_v55, 0.0  ;;  %v189_v6 = vadd.f32 %v444_v2, %v121_v58  ;;  %v65_v52 = vld [vmem:[%s1019_s0 + $0x198] sm:$0xff]  ;;  %v67_v58 = vld [vmem:[%s1019_s0 + $0x1a8] sm:$0xff] }
  0x28   :  { %372 = vst.msk [vmem:[%s1022_s3 + $0x74] sm:$0xf] %vm342_vm0, %v307_v42  ;;  %v249_v4 = vmax.f32 %v185_v56, 0.0  ;;  %v250_v5 = vmax.f32 %v186_v57, 0.0  ;;  %v310_v8 = vpack.c.bf16 %v246_v59, %v246_v59  ;;  %v251_v10 = vmax.f32 %v187_v61, 0.0  ;;  %v63_v42 = vld [vmem:[%s1019_s0 + $0x188] sm:$0xff] }
  0x29   :  { %373 = vst.msk [vmem:[%s1022_s3 + $0x78] sm:$0xf] %vm342_vm0, %v308_v43  ;;  %v311_v9 = vpack.c.bf16 %v247_v60, %v247_v60  ;;  %v252_v11 = vmax.f32 %v188_v62, 0.0  ;;  %v312_v14 = vpack.c.bf16 %v248_v3, %v248_v3  ;;  %v253_v17 = vmax.f32 %v189_v6, 0.0  ;;  %v68_v59 = vld [vmem:[%s1019_s0 + $0x1b0] sm:$0xff] }
  0x2a   :  { %374 = vst.msk [vmem:[%s1022_s3 + $0x7c] sm:$0xf] %vm342_vm0, %v309_v47  ;;  %v313_v15 = vpack.c.bf16 %v249_v4, %v249_v4  ;;  %v314_v16 = vpack.c.bf16 %v250_v5, %v250_v5  ;;  %v315_v20 = vpack.c.bf16 %v251_v10, %v251_v10  ;;  %v122_v22 = vmul.f32 %v439_v1, %v54_v63  ;;  %v64_v47 = vld [vmem:[%s1019_s0 + $0x190] sm:$0xff] }
  0x2b   :  { %375 = vst.msk [vmem:[%s1022_s3 + $0x80] sm:$0xf] %vm342_vm0, %v310_v8  ;;  %v316_v21 = vpack.c.bf16 %v252_v11, %v252_v11  ;;  %v123_v23 = vmul.f32 %v439_v1, %v55_v0  ;;  %v317_v25 = vpack.c.bf16 %v253_v17, %v253_v17  ;;  %v124_v26 = vmul.f32 %v439_v1, %v56_v7  ;;  %v69_v0 = vld [vmem:[%s1019_s0 + $0x1b8] sm:$0xff] }
  0x2c   :  { %376 = vst.msk [vmem:[%s1022_s3 + $0x84] sm:$0xf] %vm342_vm0, %v311_v9  ;;  %v125_v27 = vmul.f32 %v439_v1, %v57_v12  ;;  %v126_v28 = vmul.f32 %v439_v1, %v58_v13  ;;  %v190_v29 = vadd.f32 %v444_v2, %v122_v22  ;;  %v127_v31 = vmul.f32 %v439_v1, %v59_v18 }
  0x2d   :  { %377 = vst.msk [vmem:[%s1022_s3 + $0x88] sm:$0xf] %vm342_vm0, %v312_v14  ;;  %v191_v30 = vadd.f32 %v444_v2, %v123_v23  ;;  %v128_v32 = vmul.f32 %v439_v1, %v60_v19  ;;  %v192_v33 = vadd.f32 %v444_v2, %v124_v26  ;;  %v129_v36 = vmul.f32 %v439_v1, %v61_v24  ;;  %v70_v19 = vld [vmem:[%s1019_s0 + $0x1c0] sm:$0xff] }
  0x2e   :  { %378 = vst.msk [vmem:[%s1022_s3 + $0x8c] sm:$0xf] %vm342_vm0, %v313_v15  ;;  %v193_v34 = vadd.f32 %v444_v2, %v125_v27  ;;  %v194_v35 = vadd.f32 %v444_v2, %v126_v28  ;;  %v254_v37 = vmax.f32 %v190_v29, 0.0  ;;  %v195_v39 = vadd.f32 %v444_v2, %v127_v31  ;;  %v74_v31 = vld [vmem:[%s1019_s0 + $0x1e0] sm:$0xff] }
  0x2f   :  { %379 = vst.msk [vmem:[%s1022_s3 + $0x90] sm:$0xf] %vm342_vm0, %v314_v16  ;;  %v255_v38 = vmax.f32 %v191_v30, 0.0  ;;  %v196_v40 = vadd.f32 %v444_v2, %v128_v32  ;;  %v256_v43 = vmax.f32 %v192_v33, 0.0  ;;  %v197_v46 = vadd.f32 %v444_v2, %v129_v36  ;;  %v73_v30 = vld [vmem:[%s1019_s0 + $0x1d8] sm:$0xff]  ;;  %v75_v36 = vld [vmem:[%s1019_s0 + $0x1e8] sm:$0xff] }
  0x30   :  { %380 = vst.msk [vmem:[%s1022_s3 + $0x94] sm:$0xf] %vm342_vm0, %v315_v20  ;;  %v257_v44 = vmax.f32 %v193_v34, 0.0  ;;  %v258_v45 = vmax.f32 %v194_v35, 0.0  ;;  %v318_v48 = vpack.c.bf16 %v254_v37, %v254_v37  ;;  %v259_v50 = vmax.f32 %v195_v39, 0.0  ;;  %v71_v20 = vld [vmem:[%s1019_s0 + $0x1c8] sm:$0xff] }
  0x31   :  { %381 = vst.msk [vmem:[%s1022_s3 + $0x98] sm:$0xf] %vm342_vm0, %v316_v21  ;;  %v319_v49 = vpack.c.bf16 %v255_v38, %v255_v38  ;;  %v260_v51 = vmax.f32 %v196_v40, 0.0  ;;  %v320_v54 = vpack.c.bf16 %v256_v43, %v256_v43  ;;  %v261_v57 = vmax.f32 %v197_v46, 0.0  ;;  %v76_v37 = vld [vmem:[%s1019_s0 + $0x1f0] sm:$0xff] }
  0x32   :  { %382 = vst.msk [vmem:[%s1022_s3 + $0x9c] sm:$0xf] %vm342_vm0, %v317_v25  ;;  %v321_v55 = vpack.c.bf16 %v257_v44, %v257_v44  ;;  %v322_v56 = vpack.c.bf16 %v258_v45, %v258_v45  ;;  %v323_v60 = vpack.c.bf16 %v259_v50, %v259_v50  ;;  %v130_v62 = vmul.f32 %v439_v1, %v62_v41  ;;  %v72_v25 = vld [vmem:[%s1019_s0 + $0x1d0] sm:$0xff] }
  0x33   :  { %383 = vst.msk [vmem:[%s1022_s3 + $0xa0] sm:$0xf] %vm342_vm0, %v318_v48  ;;  %v324_v61 = vpack.c.bf16 %v260_v51, %v260_v51  ;;  %v131_v63 = vmul.f32 %v439_v1, %v63_v42  ;;  %v325_v3 = vpack.c.bf16 %v261_v57, %v261_v57  ;;  %v132_v4 = vmul.f32 %v439_v1, %v64_v47  ;;  %v77_v42 = vld [vmem:[%s1019_s0 + $0x1f8] sm:$0xff] }
  0x34   :  { %384 = vst.msk [vmem:[%s1022_s3 + $0xa4] sm:$0xf] %vm342_vm0, %v319_v49  ;;  %v133_v5 = vmul.f32 %v439_v1, %v65_v52  ;;  %v134_v6 = vmul.f32 %v439_v1, %v66_v53  ;;  %v198_v7 = vadd.f32 %v444_v2, %v130_v62  ;;  %v135_v9 = vmul.f32 %v439_v1, %v67_v58 }
  0x35   :  { %385 = vst.msk [vmem:[%s1022_s3 + $0xa8] sm:$0xf] %vm342_vm0, %v320_v54  ;;  %v199_v8 = vadd.f32 %v444_v2, %v131_v63  ;;  %v136_v10 = vmul.f32 %v439_v1, %v68_v59  ;;  %v200_v11 = vadd.f32 %v444_v2, %v132_v4  ;;  %v137_v14 = vmul.f32 %v439_v1, %v69_v0 }
  0x36   :  { %386 = vst.msk [vmem:[%s1022_s3 + $0xac] sm:$0xf] %vm342_vm0, %v321_v55  ;;  %v201_v12 = vadd.f32 %v444_v2, %v133_v5  ;;  %v202_v13 = vadd.f32 %v444_v2, %v134_v6  ;;  %v262_v15 = vmax.f32 %v198_v7, 0.0  ;;  %v203_v17 = vadd.f32 %v444_v2, %v135_v9 }
  0x37   :  { %387 = vst.msk [vmem:[%s1022_s3 + $0xb0] sm:$0xf] %vm342_vm0, %v322_v56  ;;  %v263_v16 = vmax.f32 %v199_v8, 0.0  ;;  %v204_v18 = vadd.f32 %v444_v2, %v136_v10  ;;  %v264_v21 = vmax.f32 %v200_v11, 0.0  ;;  %v205_v24 = vadd.f32 %v444_v2, %v137_v14 }
  0x38   :  { %388 = vst.msk [vmem:[%s1022_s3 + $0xb4] sm:$0xf] %vm342_vm0, %v323_v60  ;;  %v265_v22 = vmax.f32 %v201_v12, 0.0  ;;  %v266_v23 = vmax.f32 %v202_v13, 0.0  ;;  %v326_v26 = vpack.c.bf16 %v262_v15, %v262_v15  ;;  %v267_v28 = vmax.f32 %v203_v17, 0.0 }
  0x39   :  { %389 = vst.msk [vmem:[%s1022_s3 + $0xb8] sm:$0xf] %vm342_vm0, %v324_v61  ;;  %v327_v27 = vpack.c.bf16 %v263_v16, %v263_v16  ;;  %v268_v29 = vmax.f32 %v204_v18, 0.0  ;;  %v328_v32 = vpack.c.bf16 %v264_v21, %v264_v21  ;;  %v269_v35 = vmax.f32 %v205_v24, 0.0 }
  0x3a   :  { %390 = vst.msk [vmem:[%s1022_s3 + $0xbc] sm:$0xf] %vm342_vm0, %v325_v3  ;;  %v329_v33 = vpack.c.bf16 %v265_v22, %v265_v22  ;;  %v330_v34 = vpack.c.bf16 %v266_v23, %v266_v23  ;;  %v331_v38 = vpack.c.bf16 %v267_v28, %v267_v28  ;;  %v138_v40 = vmul.f32 %v439_v1, %v70_v19 }
  0x3b   :  { %391 = vst.msk [vmem:[%s1022_s3 + $0xc0] sm:$0xf] %vm342_vm0, %v326_v26  ;;  %v332_v39 = vpack.c.bf16 %v268_v29, %v268_v29  ;;  %v139_v41 = vmul.f32 %v439_v1, %v71_v20  ;;  %v333_v43 = vpack.c.bf16 %v269_v35, %v269_v35  ;;  %v140_v44 = vmul.f32 %v439_v1, %v72_v25 }
  0x3c   :  { %392 = vst.msk [vmem:[%s1022_s3 + $0xc4] sm:$0xf] %vm342_vm0, %v327_v27  ;;  %v141_v45 = vmul.f32 %v439_v1, %v73_v30  ;;  %v142_v46 = vmul.f32 %v439_v1, %v74_v31  ;;  %v206_v47 = vadd.f32 %v444_v2, %v138_v40  ;;  %v143_v49 = vmul.f32 %v439_v1, %v75_v36 }
  0x3d   :  { %393 = vst.msk [vmem:[%s1022_s3 + $0xc8] sm:$0xf] %vm342_vm0, %v328_v32  ;;  %v207_v48 = vadd.f32 %v444_v2, %v139_v41  ;;  %v144_v50 = vmul.f32 %v439_v1, %v76_v37  ;;  %v208_v51 = vadd.f32 %v444_v2, %v140_v44  ;;  %v145_v54 = vmul.f32 %v439_v1, %v77_v42 }
  0x3e   :  { %394 = vst.msk [vmem:[%s1022_s3 + $0xcc] sm:$0xf] %vm342_vm0, %v329_v33  ;;  %v209_v52 = vadd.f32 %v444_v2, %v141_v45  ;;  %v210_v53 = vadd.f32 %v444_v2, %v142_v46  ;;  %v270_v55 = vmax.f32 %v206_v47, 0.0  ;;  %v211_v57 = vadd.f32 %v444_v2, %v143_v49 }
  0x3f   :  { %395 = vst.msk [vmem:[%s1022_s3 + $0xd0] sm:$0xf] %vm342_vm0, %v330_v34  ;;  %v271_v56 = vmax.f32 %v207_v48, 0.0  ;;  %v212_v58 = vadd.f32 %v444_v2, %v144_v50  ;;  %v272_v59 = vmax.f32 %v208_v51, 0.0  ;;  %v213_v1 = vadd.f32 %v444_v2, %v145_v54 }
  0x40   :  { %396 = vst.msk [vmem:[%s1022_s3 + $0xd4] sm:$0xf] %vm342_vm0, %v331_v38  ;;  %v273_v60 = vmax.f32 %v209_v52, 0.0  ;;  %v274_v61 = vmax.f32 %v210_v53, 0.0  ;;  %v334_v62 = vpack.c.bf16 %v270_v55, %v270_v55  ;;  %v275_v0 = vmax.f32 %v211_v57, 0.0 }
  0x41   :  { %397 = vst.msk [vmem:[%s1022_s3 + $0xd8] sm:$0xf] %vm342_vm0, %v332_v39  ;;  %v335_v63 = vpack.c.bf16 %v271_v56, %v271_v56  ;;  %v276_v3 = vmax.f32 %v212_v58, 0.0  ;;  %v336_v4 = vpack.c.bf16 %v272_v59, %v272_v59  ;;  %v277_v6 = vmax.f32 %v213_v1, 0.0 }
  0x42   :  { %398 = vst.msk [vmem:[%s1022_s3 + $0xdc] sm:$0xf] %vm342_vm0, %v333_v43  ;;  %v337_v5 = vpack.c.bf16 %v273_v60, %v273_v60  ;;  %v338_v2 = vpack.c.bf16 %v274_v61, %v274_v61  ;;  %v339_v7 = vpack.c.bf16 %v275_v0, %v275_v0 }
  0x43   :  { %399 = vst.msk [vmem:[%s1022_s3 + $0xe0] sm:$0xf] %vm342_vm0, %v334_v62  ;;  %v340_v8 = vpack.c.bf16 %v276_v3, %v276_v3  ;;  %v341_v9 = vpack.c.bf16 %v277_v6, %v277_v6 }
  0x44   :  { %400 = vst.msk [vmem:[%s1022_s3 + $0xe4] sm:$0xf] %vm342_vm0, %v335_v63 }
  0x45   :  { %401 = vst.msk [vmem:[%s1022_s3 + $0xe8] sm:$0xf] %vm342_vm0, %v336_v4 }
  0x46   :  { %402 = vst.msk [vmem:[%s1022_s3 + $0xec] sm:$0xf] %vm342_vm0, %v337_v5 }
  0x47   :  { %403 = vst.msk [vmem:[%s1022_s3 + $0xf0] sm:$0xf] %vm342_vm0, %v338_v2 }
  0x48   :  { %404 = vst.msk [vmem:[%s1022_s3 + $0xf4] sm:$0xf] %vm342_vm0, %v339_v7 }
  0x49   :  { %405 = vst.msk [vmem:[%s1022_s3 + $0xf8] sm:$0xf] %vm342_vm0, %v340_v8 }
  0x4a   :  { %406 = vst.msk [vmem:[%s1022_s3 + $0xfc] sm:$0xf] %vm342_vm0, %v341_v9 }

// kernel: bottleneck_forward.6
= control target key start
LH: loop header
LB: loop body
LE: loop exit
PB: predicated region body
PF: predicated region fallthrough
CT: control target
= control target key end

     0   :  { %vm470_vm0 = vcmask 1041408   ;;  %vm19_vm1 = vcmask 31744   ;;  %v1443_v22 = vmov 0.0   ;;  %vm1035_vm2 = vcmask 24576   ;;  %s2524_s1 = inlined_call_operand.vmem [shape: bf16[4,4], index: 1, kind: input, shape index: {}]   ;;  %s2525_s0 = inlined_call_operand.vmem [shape: bf16[512,4], index: 0, kind: input, shape index: {}]   ;;  %s2526_s2 = inlined_call_operand.vmem [shape: f32[512,4], index: 2, kind: output, shape index: {0}]   ;;  %s2527_s3 = inlined_call_operand.vmem [shape: f32[1,1,4], index: 3, kind: output, shape index: {1}]   ;;  %s2528_s4 = inlined_call_operand.vmem [shape: f32[1,1,4], index: 4, kind: output, shape index: {2}]  }
   0x1   :  { %v212_v0 = vld [vmem:[%s2524_s1] sm:$0x3]  ;;  %v1408_v4 = vld [vmem:[%s2525_s0 + $0x8] sm:$0xff]  ;;  %v1409_v7 = vld [vmem:[%s2525_s0 + $0x10] sm:$0xff]  ;;  %20 = vst.msk [vmem:[#allocation2] sm:$0xff] %vm19_vm1, %v1443_v22 }
   0x2   :  { %v472_v1 = vsel %vm470_vm0, %v212_v0, 0  ;;  %v1407_v2 = vld [vmem:[%s2525_s0] sm:$0xff]  ;;  %v1416_v5 = vld [vmem:[%s2525_s0 + $0x48] sm:$0xff]  ;;  %v1417_v8 = vld [vmem:[%s2525_s0 + $0x50] sm:$0xff]  ;;  %21 = vst.msk [vmem:[#allocation2 + $0x8] sm:$0xff] %vm19_vm1, %v1443_v22 }
   0x3   :  { %v1415_v3 = vld [vmem:[%s2525_s0 + $0x40] sm:$0xff]  ;;  %481 = vmatpush.bf16.msra.mxu0 %v472_v1  ;;  %1439 = vmatpush.bf16.msra.mxu1 %v472_v1  ;;  %v1424_v9 = vld [vmem:[%s2525_s0 + $0x88] sm:$0xff]  ;;  %v1410_v10 = vld [vmem:[%s2525_s0 + $0x18] sm:$0xff]  ;;  %22 = vst.msk [vmem:[#allocation2 + $0x10] sm:$0xff] %vm19_vm1, %v1443_v22 }
   0x4   :  { %1440 = vmatpush.bf16.msra.mxu2 %v472_v1  ;;  %1441 = vmatpush.bf16.msra.mxu3 %v472_v1  ;;  %v1423_v6 = vld [vmem:[%s2525_s0 + $0x80] sm:$0xff]  ;;  %v1418_v11 = vld [vmem:[%s2525_s0 + $0x58] sm:$0xff]  ;;  %v1425_v12 = vld [vmem:[%s2525_s0 + $0x90] sm:$0xff]  ;;  %23 = vst.msk [vmem:[#allocation2 + $0x18] sm:$0xff] %vm19_vm1, %v1443_v22 }
   0x5   :  { %v1431_v13 = vld [vmem:[%s2525_s0 + $0xc0] sm:$0xff]  ;;  %v1426_v16 = vld [vmem:[%s2525_s0 + $0x98] sm:$0xff]  ;;  %v1432_v17 = vld [vmem:[%s2525_s0 + $0xc8] sm:$0xff]  ;;  %24 = vst.msk [vmem:[#allocation2 + $0x20] sm:$0xff] %vm19_vm1, %v1443_v22 }
   0x6   :  { %1375 = vmatmul.msk.bf16.vlgmr.msra.gmra.mxu0 %vm19_vm1, %v1407_v2  ;;  %1383 = vmatmul.msk.bf16.vlgmr.msra.gmra.mxu1 %vm19_vm1, %v1415_v3  ;;  %v1411_v14 = vld [vmem:[%s2525_s0 + $0x20] sm:$0xff]  ;;  %v1412_v18 = vld [vmem:[%s2525_s0 + $0x28] sm:$0xff]  ;;  %v1433_v21 = vld [vmem:[%s2525_s0 + $0xd0] sm:$0xff]  ;;  %25 = vst.msk [vmem:[#allocation2 + $0x28] sm:$0xff] %vm19_vm1, %v1443_v22 }
   0x7   :  { %1391 = vmatmul.msk.bf16.vlgmr.msra.gmra.mxu2 %vm19_vm1, %v1423_v6  ;;  %1399 = vmatmul.msk.bf16.vlgmr.msra.gmra.mxu3 %vm19_vm1, %v1431_v13  ;;  %v1419_v15 = vld [vmem:[%s2525_s0 + $0x60] sm:$0xff]  ;;  %v1420_v19 = vld [vmem:[%s2525_s0 + $0x68] sm:$0xff]  ;;  %26 = vst.msk [vmem:[#allocation2 + $0x30] sm:$0xff] %vm19_vm1, %v1443_v22  ;;  %v1413_v23 = vld [vmem:[%s2525_s0 + $0x30] sm:$0xff] }
   0x8   :  { %v1427_v20 = vld [vmem:[%s2525_s0 + $0xa0] sm:$0xff]  ;;  %27 = vst.msk [vmem:[#allocation2 + $0x38] sm:$0xff] %vm19_vm1, %v1443_v22  ;;  %v1421_v24 = vld [vmem:[%s2525_s0 + $0x70] sm:$0xff]  ;;  %v1428_v25 = vld [vmem:[%s2525_s0 + $0xa8] sm:$0xff] }
   0x9   :  { %28 = vst.msk [vmem:[#allocation2 + $0x40] sm:$0xff] %vm19_vm1, %v1443_v22  ;;  %v1434_v26 = vld [vmem:[%s2525_s0 + $0xd8] sm:$0xff]  ;;  %v84_v29 = vld [vmem:[#allocation2] sm:$0xff]  ;;  %v1429_v30 = vld [vmem:[%s2525_s0 + $0xb0] sm:$0xff] }
   0xa   :  { %29 = vst.msk [vmem:[#allocation2 + $0x48] sm:$0xff] %vm19_vm1, %v1443_v22  ;;  %v1414_v27 = vld [vmem:[%s2525_s0 + $0x38] sm:$0xff]  ;;  %v1435_v31 = vld [vmem:[%s2525_s0 + $0xe0] sm:$0xff]  ;;  %v1436_v39 = vld [vmem:[%s2525_s0 + $0xe8] sm:$0xff] }
   0xb   :  { %30 = vst.msk [vmem:[#allocation2 + $0x50] sm:$0xff] %vm19_vm1, %v1443_v22  ;;  %v1422_v28 = vld [vmem:[%s2525_s0 + $0x78] sm:$0xff]  ;;  %v85_v40 = vld [vmem:[#allocation2 + $0x8] sm:$0xff]  ;;  %v86_v41 = vld [vmem:[#allocation2 + $0x10] sm:$0xff] }
   0xc   :  { %31 = vst.msk [vmem:[#allocation2 + $0x58] sm:$0xff] %vm19_vm1, %v1443_v22  ;;  %v1430_v38 = vld [vmem:[%s2525_s0 + $0xb8] sm:$0xff]  ;;  %v88_v63 = vld [vmem:[#allocation2 + $0x20] sm:$0xff]  ;;  %v1437_v0 = vld [vmem:[%s2525_s0 + $0xf0] sm:$0xff] }
   0xd   :  { %32 = vst.msk [vmem:[#allocation2 + $0x60] sm:$0xff] %vm19_vm1, %v1443_v22  ;;  %v87_v50 = vld [vmem:[#allocation2 + $0x18] sm:$0xff] }
   0xe   :  { %33 = vst.msk [vmem:[#allocation2 + $0x68] sm:$0xff] %vm19_vm1, %v1443_v22 }
   0xf   :  { %34 = vst.msk [vmem:[#allocation2 + $0x70] sm:$0xff] %vm19_vm1, %v1443_v22 }
  0x10   :  { %35 = vst.msk [vmem:[#allocation2 + $0x78] sm:$0xff] %vm19_vm1, %v1443_v22 }
  0x11   :  { %36 = vst.msk [vmem:[#allocation2 + $0x80] sm:$0xff] %vm19_vm1, %v1443_v22 }
  0x12   :  { %37 = vst.msk [vmem:[#allocation2 + $0x88] sm:$0xff] %vm19_vm1, %v1443_v22 }
  0x13   :  { %38 = vst.msk [vmem:[#allocation2 + $0x90] sm:$0xff] %vm19_vm1, %v1443_v22 }
  0x14   :  { %39 = vst.msk [vmem:[#allocation2 + $0x98] sm:$0xff] %vm19_vm1, %v1443_v22 }
  0x15   :  { %40 = vst.msk [vmem:[#allocation2 + $0xa0] sm:$0xff] %vm19_vm1, %v1443_v22 }
  0x16   :  { %1376 = vmatmul.msk.bf16.gmra.mxu0 %vm19_vm1, %v1408_v4  ;;  %1384 = vmatmul.msk.bf16.gmra.mxu1 %vm19_vm1, %v1416_v5  ;;  %41 = vst.msk [vmem:[#allocation2 + $0xa8] sm:$0xff] %vm19_vm1, %v1443_v22 }
  0x17   :  { %1392 = vmatmul.msk.bf16.gmra.mxu2 %vm19_vm1, %v1424_v9  ;;  %1400 = vmatmul.msk.bf16.gmra.mxu3 %vm19_vm1, %v1432_v17  ;;  %42 = vst.msk [vmem:[#allocation2 + $0xb0] sm:$0xff] %vm19_vm1, %v1443_v22 }
  0x18   :  { %43 = vst.msk [vmem:[#allocation2 + $0xb8] sm:$0xff] %vm19_vm1, %v1443_v22  ;;  %v100_v43 = vld [vmem:[#allocation2 + $0x80] sm:$0xff] }
  0x19   :  { %44 = vst.msk [vmem:[#allocation2 + $0xc0] sm:$0xff] %vm19_vm1, %v1443_v22  ;;  %v101_v45 = vld [vmem:[#allocation2 + $0x88] sm:$0xff] }
  0x1a   :  { %45 = vst.msk [vmem:[#allocation2 + $0xc8] sm:$0xff] %vm19_vm1, %v1443_v22  ;;  %v102_v51 = vld [vmem:[#allocation2 + $0x90] sm:$0xff] }
  0x1b   :  { %46 = vst.msk [vmem:[#allocation2 + $0xd0] sm:$0xff] %vm19_vm1, %v1443_v22  ;;  %v103_v58 = vld [vmem:[#allocation2 + $0x98] sm:$0xff] }
  0x1c   :  { %47 = vst.msk [vmem:[#allocation2 + $0xd8] sm:$0xff] %vm19_vm1, %v1443_v22 }
  0x1d   :  { %48 = vst.msk [vmem:[#allocation2 + $0xe0] sm:$0xff] %vm19_vm1, %v1443_v22 }
  0x1e   :  { %49 = vst.msk [vmem:[#allocation2 + $0xe8] sm:$0xff] %vm19_vm1, %v1443_v22 }
  0x1f   :  { %50 = vst.msk [vmem:[#allocation2 + $0xf0] sm:$0xff] %vm19_vm1, %v1443_v22 }
  0x20   :  { %51 = vst.msk [vmem:[#allocation2 + $0xf8] sm:$0xff] %vm19_vm1, %v1443_v22 }
  0x21   :  { %52 = vst.msk [vmem:[#allocation2 + $0x100] sm:$0xff] %vm19_vm1, %v1443_v22 }
  0x22   :  { %53 = vst.msk [vmem:[#allocation2 + $0x108] sm:$0xff] %vm19_vm1, %v1443_v22 }
  0x23   :  { %54 = vst.msk [vmem:[#allocation2 + $0x110] sm:$0xff] %vm19_vm1, %v1443_v22 }
  0x24   :  { %55 = vst.msk [vmem:[#allocation2 + $0x118] sm:$0xff] %vm19_vm1, %v1443_v22 }
  0x25   :  { %56 = vst.msk [vmem:[#allocation2 + $0x120] sm:$0xff] %vm19_vm1, %v1443_v22 }
  0x26   :  { %1377 = vmatmul.msk.bf16.gmra.mxu0 %vm19_vm1, %v1409_v7  ;;  %1385 = vmatmul.msk.bf16.gmra.mxu1 %vm19_vm1, %v1417_v8  ;;  %57 = vst.msk [vmem:[#allocation2 + $0x128] sm:$0xff] %vm19_vm1, %v1443_v22 }
  0x27   :  { %1393 = vmatmul.msk.bf16.gmra.mxu2 %vm19_vm1, %v1425_v12  ;;  %1401 = vmatmul.msk.bf16.gmra.mxu3 %vm19_vm1, %v1433_v21  ;;  %58 = vst.msk [vmem:[#allocation2 + $0x130] sm:$0xff] %vm19_vm1, %v1443_v22 }
  0x28   :  { %59 = vst.msk [vmem:[#allocation2 + $0x138] sm:$0xff] %vm19_vm1, %v1443_v22 }
  0x29   :  { %60 = vst.msk [vmem:[#allocation2 + $0x140] sm:$0xff] %vm19_vm1, %v1443_v22 }
  0x2a   :  { %61 = vst.msk [vmem:[#allocation2 + $0x148] sm:$0xff] %vm19_vm1, %v1443_v22 }
  0x2b   :  { %62 = vst.msk [vmem:[#allocation2 + $0x150] sm:$0xff] %vm19_vm1, %v1443_v22 }
  0x2c   :  { %63 = vst.msk [vmem:[#allocation2 + $0x158] sm:$0xff] %vm19_vm1, %v1443_v22 }
  0x2d   :  { %64 = vst.msk [vmem:[#allocation2 + $0x160] sm:$0xff] %vm19_vm1, %v1443_v22 }
  0x2e   :  { %65 = vst.msk [vmem:[#allocation2 + $0x168] sm:$0xff] %vm19_vm1, %v1443_v22 }
  0x2f   :  { %66 = vst.msk [vmem:[#allocation2 + $0x170] sm:$0xff] %vm19_vm1, %v1443_v22 }
  0x30   :  { %67 = vst.msk [vmem:[#allocation2 + $0x178] sm:$0xff] %vm19_vm1, %v1443_v22 }
  0x31   :  { %68 = vst.msk [vmem:[#allocation2 + $0x180] sm:$0xff] %vm19_vm1, %v1443_v22 }
  0x32   :  { %69 = vst.msk [vmem:[#allocation2 + $0x188] sm:$0xff] %vm19_vm1, %v1443_v22 }
  0x33   :  { %70 = vst.msk [vmem:[#allocation2 + $0x190] sm:$0xff] %vm19_vm1, %v1443_v22 }
  0x34   :  { %71 = vst.msk [vmem:[#allocation2 + $0x198] sm:$0xff] %vm19_vm1, %v1443_v22 }
  0x35   :  { %72 = vst.msk [vmem:[#allocation2 + $0x1a0] sm:$0xff] %vm19_vm1, %v1443_v22 }
  0x36   :  { %1378 = vmatmul.msk.bf16.gmra.mxu0 %vm19_vm1, %v1410_v10  ;;  %1386 = vmatmul.msk.bf16.gmra.mxu1 %vm19_vm1, %v1418_v11  ;;  %73 = vst.msk [vmem:[#allocation2 + $0x1a8] sm:$0xff] %vm19_vm1, %v1443_v22 }
  0x37   :  { %1394 = vmatmul.msk.bf16.gmra.mxu2 %vm19_vm1, %v1426_v16  ;;  %1402 = vmatmul.msk.bf16.gmra.mxu3 %vm19_vm1, %v1434_v26  ;;  %74 = vst.msk [vmem:[#allocation2 + $0x1b0] sm:$0xff] %vm19_vm1, %v1443_v22  ;;  %v116_v26 = vld [vmem:[#allocation2 + $0x100] sm:$0xff] }
  0x38   :  { %75 = vst.msk [vmem:[#allocation2 + $0x1b8] sm:$0xff] %vm19_vm1, %v1443_v22 }
  0x39   :  { %76 = vst.msk [vmem:[#allocation2 + $0x1c0] sm:$0xff] %vm19_vm1, %v1443_v22 }
  0x3a   :  { %77 = vst.msk [vmem:[#allocation2 + $0x1c8] sm:$0xff] %vm19_vm1, %v1443_v22 }
  0x3b   :  { %78 = vst.msk [vmem:[#allocation2 + $0x1d0] sm:$0xff] %vm19_vm1, %v1443_v22 }
  0x3c   :  { %79 = vst.msk [vmem:[#allocation2 + $0x1d8] sm:$0xff] %vm19_vm1, %v1443_v22 }
  0x3d   :  { %80 = vst.msk [vmem:[#allocation2 + $0x1e0] sm:$0xff] %vm19_vm1, %v1443_v22 }
  0x3e   :  { %81 = vst.msk [vmem:[#allocation2 + $0x1e8] sm:$0xff] %vm19_vm1, %v1443_v22 }
  0x3f   :  { %82 = vst.msk [vmem:[#allocation2 + $0x1f0] sm:$0xff] %vm19_vm1, %v1443_v22 }
  0x40   :  { %83 = vst.msk [vmem:[#allocation2 + $0x1f8] sm:$0xff] %vm19_vm1, %v1443_v22 }
  0x46   :  { %1379 = vmatmul.msk.bf16.gmra.mxu0 %vm19_vm1, %v1411_v14  ;;  %1387 = vmatmul.msk.bf16.gmra.mxu1 %vm19_vm1, %v1419_v15 }
  0x47   :  { %1395 = vmatmul.msk.bf16.gmra.mxu2 %vm19_vm1, %v1427_v20  ;;  %1403 = vmatmul.msk.bf16.gmra.mxu3 %vm19_vm1, %v1435_v31 }
  0x56   :  { %1380 = vmatmul.msk.bf16.gmra.mxu0 %vm19_vm1, %v1412_v18  ;;  %1388 = vmatmul.msk.bf16.gmra.mxu1 %vm19_vm1, %v1420_v19 }
  0x57   :  { %1396 = vmatmul.msk.bf16.gmra.mxu2 %vm19_vm1, %v1428_v25  ;;  %1404 = vmatmul.msk.bf16.gmra.mxu3 %vm19_vm1, %v1436_v39  ;;  %v104_v25 = vld [vmem:[#allocation2 + $0xa0] sm:$0xff] }
  0x66   :  { %1381 = vmatmul.msk.bf16.gmra.mxu0 %vm19_vm1, %v1413_v23  ;;  %1389 = vmatmul.msk.bf16.gmra.mxu1 %vm19_vm1, %v1421_v24  ;;  %v89_v24 = vld [vmem:[#allocation2 + $0x28] sm:$0xff] }
  0x67   :  { %1397 = vmatmul.msk.bf16.gmra.mxu2 %vm19_vm1, %v1429_v30  ;;  %1405 = vmatmul.msk.bf16.gmra.mxu3 %vm19_vm1, %v1437_v0 }
  0x76   :  { %1382 = vmatmul.msk.bf16.gmra.mxu0 %vm19_vm1, %v1414_v27  ;;  %1390 = vmatmul.msk.bf16.gmra.mxu1 %vm19_vm1, %v1422_v28 }
  0x77   :  { %1398 = vmatmul.msk.bf16.gmra.mxu2 %vm19_vm1, %v1430_v38 }
  0x83   :  { %v483_v32 = vpop.f32.mrf.mxu0  ;;  %v523_v34 = vpop.f32.mrf.mxu1 }
  0x84   :  { %v643_v33 = vadd.f32 %v483_v32, %v84_v29  ;;  %v659_v48 = vadd.f32 %v523_v34, %v100_v43  ;;  %v105_v32 = vld [vmem:[#allocation2 + $0xa8] sm:$0xff]  ;;  %v90_v43 = vld [vmem:[#allocation2 + $0x30] sm:$0xff] }
  0x85   :  { %v117_v34 = vld [vmem:[#allocation2 + $0x108] sm:$0xff] }
  0x86   :  { %707 = vst.msk [vmem:[#allocation2] sm:$0xff] %vm19_vm1, %v643_v33 }
  0x87   :  { %723 = vst.msk [vmem:[#allocation2 + $0x80] sm:$0xff] %vm19_vm1, %v659_v48 }
  0x8a   :  { %v563_v20 = vpop.f32.mrf.mxu2 }
  0x8b   :  { %v485_v35 = vpop.f32.mrf.mxu0  ;;  %v525_v37 = vpop.f32.mrf.mxu1  ;;  %v675_v28 = vadd.f32 %v563_v20, %v116_v26  ;;  %v108_v20 = vld [vmem:[#allocation2 + $0xc0] sm:$0xff] }
  0x8c   :  { %v644_v44 = vadd.f32 %v485_v35, %v85_v40  ;;  %v660_v49 = vadd.f32 %v525_v37, %v101_v45 }
  0x8d   :  { %v774_v36 = vld [vmem:[#allocation2] sm:$0xff]  ;;  %739 = vst.msk [vmem:[#allocation2 + $0x100] sm:$0xff] %vm19_vm1, %v675_v28 }
  0x8e   :  { %838 = vst.msk [vmem:[%s2526_s2] sm:$0xff] %vm19_vm1, %v774_v36  ;;  %v1037_v56 = vmul.f32 %v774_v36, %v774_v36  ;;  %v902_v59 = vsel %vm19_vm1, %v774_v36, 0.0  ;;  %v1745_v4 = vld [vmem:[#allocation2 + $0x80] sm:$0xff] }
  0x8f   :  { %708 = vst.msk [vmem:[#allocation2 + $0x8] sm:$0xff] %vm19_vm1, %v644_v44  ;;  %v1438_v44 = vld [vmem:[%s2525_s0 + $0xf8] sm:$0xff] }
  0x90   :  { %724 = vst.msk [vmem:[#allocation2 + $0x88] sm:$0xff] %vm19_vm1, %v660_v49  ;;  %v1101_v5 = vsel %vm19_vm1, %v1037_v56, 0.0  ;;  %1406 = vmatmul.msk.bf16.gmra.mxu3 %vm19_vm1, %v1438_v44  ;;  %v106_v56 = vld [vmem:[#allocation2 + $0xb0] sm:$0xff] }
  0x91   :  { %854 = vst.msk [vmem:[%s2526_s2 + $0x80] sm:$0xff] %vm19_vm1, %v1745_v4 }
  0x92   :  { %v565_v35 = vpop.f32.mrf.mxu2 }
  0x93   :  { %v488_v42 = vpop.f32.mrf.mxu0  ;;  %v528_v47 = vpop.f32.mrf.mxu1  ;;  %v676_v40 = vadd.f32 %v565_v35, %v117_v34  ;;  %v133_v35 = vld [vmem:[#allocation2 + $0x188] sm:$0xff] }
  0x94   :  { %v645_v46 = vadd.f32 %v488_v42, %v86_v41  ;;  %v661_v52 = vadd.f32 %v528_v47, %v102_v51  ;;  %v1811_v49 = vld [vmem:[#allocation2 + $0x100] sm:$0xff] }
  0x95   :  { %740 = vst.msk [vmem:[#allocation2 + $0x108] sm:$0xff] %vm19_vm1, %v676_v40 }
  0x96   :  { %709 = vst.msk [vmem:[#allocation2 + $0x10] sm:$0xff] %vm19_vm1, %v645_v46  ;;  %v775_v57 = vld [vmem:[#allocation2 + $0x8] sm:$0xff] }
  0x97   :  { %725 = vst.msk [vmem:[#allocation2 + $0x90] sm:$0xff] %vm19_vm1, %v661_v52  ;;  %v903_v60 = vsel %vm19_vm1, %v775_v57, 0.0  ;;  %v1038_v61 = vmul.f32 %v775_v57, %v775_v57  ;;  %v1754_v8 = vld [vmem:[#allocation2 + $0x88] sm:$0xff] }
  0x98   :  { %839 = vst.msk [vmem:[%s2526_s2 + $0x8] sm:$0xff] %vm19_vm1, %v775_v57  ;;  %v904_v1 = vadd.f32 %v903_v60, %v902_v59  ;;  %v118_v57 = vld [vmem:[#allocation2 + $0x110] sm:$0xff] }
  0x99   :  { %v1102_v6 = vsel %vm19_vm1, %v1038_v61, 0.0  ;;  %855 = vst.msk [vmem:[%s2526_s2 + $0x88] sm:$0xff] %vm19_vm1, %v1754_v8 }
  0x9a   :  { %v1103_v10 = vadd.f32 %v1102_v6, %v1101_v5  ;;  %870 = vst.msk [vmem:[%s2526_s2 + $0x100] sm:$0xff] %vm19_vm1, %v1811_v49  ;;  %v568_v52 = vpop.f32.mrf.mxu2  ;;  %v92_v6 = vld [vmem:[#allocation2 + $0x40] sm:$0xff] }
  0x9b   :  { %v490_v53 = vpop.f32.mrf.mxu0  ;;  %v530_v55 = vpop.f32.mrf.mxu1  ;;  %v677_v59 = vadd.f32 %v568_v52, %v118_v57 }
  0x9c   :  { %v646_v54 = vadd.f32 %v490_v53, %v87_v50  ;;  %v662_v9 = vadd.f32 %v530_v55, %v103_v58  ;;  %v91_v53 = vld [vmem:[#allocation2 + $0x38] sm:$0xff]  ;;  %v1833_v55 = vld [vmem:[#allocation2 + $0x108] sm:$0xff] }
  0x9d   :  { %v776_v62 = vld [vmem:[#allocation2 + $0x10] sm:$0xff]  ;;  %871 = vst.msk [vmem:[%s2526_s2 + $0x108] sm:$0xff] %vm19_vm1, %v1833_v55 }
  0x9e   :  { %710 = vst.msk [vmem:[#allocation2 + $0x18] sm:$0xff] %vm19_vm1, %v646_v54  ;;  %v905_v2 = vsel %vm19_vm1, %v776_v62, 0.0  ;;  %v1039_v3 = vmul.f32 %v776_v62, %v776_v62  ;;  %v1763_v14 = vld [vmem:[#allocation2 + $0x90] sm:$0xff] }
  0x9f   :  { %840 = vst.msk [vmem:[%s2526_s2 + $0x10] sm:$0xff] %vm19_vm1, %v776_v62  ;;  %v906_v11 = vadd.f32 %v905_v2, %v904_v1  ;;  %v119_v1 = vld [vmem:[#allocation2 + $0x118] sm:$0xff] }
  0xa0   :  { %v1104_v12 = vsel %vm19_vm1, %v1039_v3, 0.0  ;;  %856 = vst.msk [vmem:[%s2526_s2 + $0x90] sm:$0xff] %vm19_vm1, %v1763_v14 }
  0xa1   :  { %v1105_v16 = vadd.f32 %v1104_v12, %v1103_v10  ;;  %726 = vst.msk [vmem:[#allocation2 + $0x98] sm:$0xff] %vm19_vm1, %v662_v9 }
  0xa2   :  { %741 = vst.msk [vmem:[#allocation2 + $0x110] sm:$0xff] %vm19_vm1, %v677_v59  ;;  %v570_v2 = vpop.f32.mrf.mxu2  ;;  %v110_v59 = vld [vmem:[#allocation2 + $0xd0] sm:$0xff] }
  0xa3   :  { %v493_v7 = vpop.f32.mrf.mxu0  ;;  %v533_v19 = vpop.f32.mrf.mxu1  ;;  %v678_v5 = vadd.f32 %v570_v2, %v119_v1 }
  0xa4   :  { %v647_v13 = vadd.f32 %v493_v7, %v88_v63  ;;  %v663_v27 = vadd.f32 %v533_v19, %v104_v25  ;;  %v107_v63 = vld [vmem:[#allocation2 + $0xb8] sm:$0xff] }
  0xa5   :  { %v777_v15 = vld [vmem:[#allocation2 + $0x18] sm:$0xff]  ;;  %742 = vst.msk [vmem:[#allocation2 + $0x118] sm:$0xff] %vm19_vm1, %v678_v5 }
  0xa6   :  { %841 = vst.msk [vmem:[%s2526_s2 + $0x18] sm:$0xff] %vm19_vm1, %v777_v15  ;;  %v907_v17 = vsel %vm19_vm1, %v777_v15, 0.0  ;;  %v1040_v18 = vmul.f32 %v777_v15, %v777_v15 }
  0xa7   :  { %v908_v21 = vadd.f32 %v907_v17, %v906_v11  ;;  %711 = vst.msk [vmem:[#allocation2 + $0x20] sm:$0xff] %vm19_vm1, %v647_v13  ;;  %v93_v17 = vld [vmem:[#allocation2 + $0x48] sm:$0xff] }
  0xa8   :  { %v1106_v22 = vsel %vm19_vm1, %v1040_v18, 0.0  ;;  %727 = vst.msk [vmem:[#allocation2 + $0xa0] sm:$0xff] %vm19_vm1, %v663_v27  ;;  %v1786_v38 = vld [vmem:[#allocation2 + $0x98] sm:$0xff] }
  0xa9   :  { %v1107_v23 = vadd.f32 %v1106_v22, %v1105_v16  ;;  %857 = vst.msk [vmem:[%s2526_s2 + $0x98] sm:$0xff] %vm19_vm1, %v1786_v38  ;;  %v1859_v11 = vld [vmem:[#allocation2 + $0x110] sm:$0xff]  ;;  %v603_v16 = vpop.f32.mrf.mxu3 }
  0xaa   :  { %872 = vst.msk [vmem:[%s2526_s2 + $0x110] sm:$0xff] %vm19_vm1, %v1859_v11  ;;  %v573_v15 = vpop.f32.mrf.mxu2 }
  0xab   :  { %v495_v29 = vpop.f32.mrf.mxu0  ;;  %v535_v33 = vpop.f32.mrf.mxu1 }
  0xac   :  { %v648_v30 = vadd.f32 %v495_v29, %v89_v24  ;;  %v664_v39 = vadd.f32 %v535_v33, %v105_v32  ;;  %v1881_v19 = vld [vmem:[#allocation2 + $0x118] sm:$0xff]  ;;  %v132_v24 = vld [vmem:[#allocation2 + $0x180] sm:$0xff]  ;;  %v109_v29 = vld [vmem:[#allocation2 + $0xc8] sm:$0xff] }
  0xad   :  { %873 = vst.msk [vmem:[%s2526_s2 + $0x118] sm:$0xff] %vm19_vm1, %v1881_v19  ;;  %v691_v27 = vadd.f32 %v603_v16, %v132_v24 }
  0xae   :  { %v778_v31 = vld [vmem:[#allocation2 + $0x20] sm:$0xff]  ;;  %712 = vst.msk [vmem:[#allocation2 + $0x28] sm:$0xff] %vm19_vm1, %v648_v30 }
  0xaf   :  { %842 = vst.msk [vmem:[%s2526_s2 + $0x20] sm:$0xff] %vm19_vm1, %v778_v31  ;;  %v909_v36 = vsel %vm19_vm1, %v778_v31, 0.0  ;;  %v1041_v37 = vmul.f32 %v778_v31, %v778_v31  ;;  %v1803_v47 = vld [vmem:[#allocation2 + $0xa0] sm:$0xff]  ;;  %v121_v31 = vld [vmem:[#allocation2 + $0x128] sm:$0xff] }
  0xb0   :  { %v1788_v41 = vadd.f32 %v909_v36, %v908_v21  ;;  %728 = vst.msk [vmem:[#allocation2 + $0xa8] sm:$0xff] %vm19_vm1, %v664_v39  ;;  %v120_v21 = vld [vmem:[#allocation2 + $0x120] sm:$0xff]  ;;  %v94_v39 = vld [vmem:[#allocation2 + $0x50] sm:$0xff] }
  0xb1   :  { %v1108_v42 = vsel %vm19_vm1, %v1041_v37, 0.0  ;;  %858 = vst.msk [vmem:[%s2526_s2 + $0xa0] sm:$0xff] %vm19_vm1, %v1803_v47  ;;  %v605_v36 = vpop.f32.mrf.mxu3 }
  0xb2   :  { %v1800_v45 = vadd.f32 %v1108_v42, %v1107_v23  ;;  %v679_v23 = vadd.f32 %v573_v15, %v120_v21  ;;  %v575_v32 = vpop.f32.mrf.mxu2  ;;  %755 = vst.msk [vmem:[#allocation2 + $0x180] sm:$0xff] %vm19_vm1, %v691_v27  ;;  %v692_v37 = vadd.f32 %v605_v36, %v133_v35  ;;  %v97_v35 = vld [vmem:[#allocation2 + $0x68] sm:$0xff] }
  0xb3   :  { %v498_v46 = vpop.f32.mrf.mxu0  ;;  %v538_v51 = vpop.f32.mrf.mxu1  ;;  %v680_v34 = vadd.f32 %v575_v32, %v121_v31 }
  0xb4   :  { %v649_v48 = vadd.f32 %v498_v46, %v90_v43  ;;  %v665_v58 = vadd.f32 %v538_v51, %v106_v56  ;;  %743 = vst.msk [vmem:[#allocation2 + $0x120] sm:$0xff] %vm19_vm1, %v679_v23  ;;  %v95_v56 = vld [vmem:[#allocation2 + $0x58] sm:$0xff]  ;;  %v96_v23 = vld [vmem:[#allocation2 + $0x60] sm:$0xff] }
  0xb5   :  { %v1813_v50 = vld [vmem:[#allocation2 + $0x28] sm:$0xff]  ;;  %744 = vst.msk [vmem:[#allocation2 + $0x128] sm:$0xff] %vm19_vm1, %v680_v34 }
  0xb6   :  { %843 = vst.msk [vmem:[%s2526_s2 + $0x28] sm:$0xff] %vm19_vm1, %v1813_v50 }
  0xb7   :  { %713 = vst.msk [vmem:[#allocation2 + $0x30] sm:$0xff] %vm19_vm1, %v649_v48  ;;  %v1826_v54 = vld [vmem:[#allocation2 + $0xa8] sm:$0xff] }
  0xb8   :  { %859 = vst.msk [vmem:[%s2526_s2 + $0xa8] sm:$0xff] %vm19_vm1, %v1826_v54 }
  0xb9   :  { %729 = vst.msk [vmem:[#allocation2 + $0xb0] sm:$0xff] %vm19_vm1, %v665_v58  ;;  %v1924_v52 = vld [vmem:[#allocation2 + $0x180] sm:$0xff] }
  0xba   :  { %756 = vst.msk [vmem:[#allocation2 + $0x188] sm:$0xff] %vm19_vm1, %v692_v37  ;;  %v578_v51 = vpop.f32.mrf.mxu2 }
  0xbb   :  { %v500_v60 = vpop.f32.mrf.mxu0  ;;  %v540_v0 = vpop.f32.mrf.mxu1  ;;  %v1909_v44 = vld [vmem:[#allocation2 + $0x120] sm:$0xff]  ;;  %886 = vst.msk [vmem:[%s2526_s2 + $0x180] sm:$0xff] %vm19_vm1, %v1924_v52 }
  0xbc   :  { %v650_v61 = vadd.f32 %v500_v60, %v91_v53  ;;  %v666_v3 = vadd.f32 %v540_v0, %v107_v63  ;;  %874 = vst.msk [vmem:[%s2526_s2 + $0x120] sm:$0xff] %vm19_vm1, %v1909_v44  ;;  %v608_v53 = vpop.f32.mrf.mxu3  ;;  %v1938_v58 = vld [vmem:[#allocation2 + $0x128] sm:$0xff]  ;;  %v122_v60 = vld [vmem:[#allocation2 + $0x130] sm:$0xff] }
  0xbd   :  { %875 = vst.msk [vmem:[%s2526_s2 + $0x128] sm:$0xff] %vm19_vm1, %v1938_v58  ;;  %v134_v0 = vld [vmem:[#allocation2 + $0x190] sm:$0xff]  ;;  %v681_v2 = vadd.f32 %v578_v51, %v122_v60 }
  0xbe   :  { %v1842_v62 = vld [vmem:[#allocation2 + $0x30] sm:$0xff]  ;;  %714 = vst.msk [vmem:[#allocation2 + $0x38] sm:$0xff] %vm19_vm1, %v650_v61  ;;  %v693_v5 = vadd.f32 %v608_v53, %v134_v0  ;;  %v112_v53 = vld [vmem:[#allocation2 + $0xe0] sm:$0xff] }
  0xbf   :  { %844 = vst.msk [vmem:[%s2526_s2 + $0x30] sm:$0xff] %vm19_vm1, %v1842_v62 }
  0xc0   :  { %730 = vst.msk [vmem:[#allocation2 + $0xb8] sm:$0xff] %vm19_vm1, %v666_v3  ;;  %v1852_v9 = vld [vmem:[#allocation2 + $0xb0] sm:$0xff] }
  0xc1   :  { %860 = vst.msk [vmem:[%s2526_s2 + $0xb0] sm:$0xff] %vm19_vm1, %v1852_v9  ;;  %v1945_v61 = vld [vmem:[#allocation2 + $0x188] sm:$0xff] }
  0xc2   :  { %887 = vst.msk [vmem:[%s2526_s2 + $0x188] sm:$0xff] %vm19_vm1, %v1945_v61  ;;  %v580_v15 = vpop.f32.mrf.mxu2 }
  0xc3   :  { %v503_v7 = vpop.f32.mrf.mxu0  ;;  %v543_v13 = vpop.f32.mrf.mxu1  ;;  %745 = vst.msk [vmem:[#allocation2 + $0x130] sm:$0xff] %vm19_vm1, %v681_v2  ;;  %v136_v2 = vld [vmem:[#allocation2 + $0x1a0] sm:$0xff] }
  0xc4   :  { %v651_v10 = vadd.f32 %v503_v7, %v92_v6  ;;  %v667_v22 = vadd.f32 %v543_v13, %v108_v20  ;;  %v111_v7 = vld [vmem:[#allocation2 + $0xd8] sm:$0xff]  ;;  %v610_v21 = vpop.f32.mrf.mxu3  ;;  %757 = vst.msk [vmem:[#allocation2 + $0x190] sm:$0xff] %vm19_vm1, %v693_v5  ;;  %v125_v5 = vld [vmem:[#allocation2 + $0x148] sm:$0xff] }
  0xc5   :  { %v1861_v12 = vld [vmem:[#allocation2 + $0x38] sm:$0xff] }
  0xc6   :  { %845 = vst.msk [vmem:[%s2526_s2 + $0x38] sm:$0xff] %vm19_vm1, %v1861_v12  ;;  %v123_v13 = vld [vmem:[#allocation2 + $0x138] sm:$0xff] }
  0xc7   :  { %715 = vst.msk [vmem:[#allocation2 + $0x40] sm:$0xff] %vm19_vm1, %v651_v10  ;;  %v1874_v18 = vld [vmem:[#allocation2 + $0xb8] sm:$0xff] }
  0xc8   :  { %861 = vst.msk [vmem:[%s2526_s2 + $0xb8] sm:$0xff] %vm19_vm1, %v1874_v18  ;;  %v135_v20 = vld [vmem:[#allocation2 + $0x198] sm:$0xff] }
  0xc9   :  { %731 = vst.msk [vmem:[#allocation2 + $0xc0] sm:$0xff] %vm19_vm1, %v667_v22  ;;  %v694_v22 = vadd.f32 %v610_v21, %v135_v20  ;;  %v137_v20 = vld [vmem:[#allocation2 + $0x1a8] sm:$0xff]  ;;  %v913_v21 = vsel %vm19_vm1, %v1842_v62, 0.0 }
  0xca   :  { %v1973_v27 = vld [vmem:[#allocation2 + $0x130] sm:$0xff]  ;;  %v583_v31 = vpop.f32.mrf.mxu2 }
  0xcb   :  { %v505_v25 = vpop.f32.mrf.mxu0  ;;  %v545_v30 = vpop.f32.mrf.mxu1  ;;  %758 = vst.msk [vmem:[#allocation2 + $0x198] sm:$0xff] %vm19_vm1, %v694_v22  ;;  %v1988_v32 = vld [vmem:[#allocation2 + $0x190] sm:$0xff] }
  0xcc   :  { %v652_v26 = vadd.f32 %v505_v25, %v93_v17  ;;  %v668_v33 = vadd.f32 %v545_v30, %v109_v29  ;;  %v682_v17 = vadd.f32 %v580_v15, %v123_v13  ;;  %876 = vst.msk [vmem:[%s2526_s2 + $0x130] sm:$0xff] %vm19_vm1, %v1973_v27  ;;  %v1044_v13 = vmul.f32 %v1861_v12, %v1861_v12 }
  0xcd   :  { %888 = vst.msk [vmem:[%s2526_s2 + $0x190] sm:$0xff] %vm19_vm1, %v1988_v32 }
  0xce   :  { %v1890_v28 = vld [vmem:[#allocation2 + $0x40] sm:$0xff]  ;;  %716 = vst.msk [vmem:[#allocation2 + $0x48] sm:$0xff] %vm19_vm1, %v652_v26 }
  0xcf   :  { %846 = vst.msk [vmem:[%s2526_s2 + $0x40] sm:$0xff] %vm19_vm1, %v1890_v28 }
  0xd0   :  { %732 = vst.msk [vmem:[#allocation2 + $0xc8] sm:$0xff] %vm19_vm1, %v668_v33  ;;  %v1901_v42 = vld [vmem:[#allocation2 + $0xc0] sm:$0xff]  ;;  %v613_v33 = vpop.f32.mrf.mxu3 }
  0xd1   :  { %862 = vst.msk [vmem:[%s2526_s2 + $0xc0] sm:$0xff] %vm19_vm1, %v1901_v42  ;;  %v695_v15 = vadd.f32 %v613_v33, %v136_v2  ;;  %v1114_v33 = vsel %vm19_vm1, %v1044_v13, 0.0 }
  0xd2   :  { %746 = vst.msk [vmem:[#allocation2 + $0x138] sm:$0xff] %vm19_vm1, %v682_v17  ;;  %v2009_v37 = vld [vmem:[#allocation2 + $0x198] sm:$0xff]  ;;  %v585_v60 = vpop.f32.mrf.mxu2 }
  0xd3   :  { %v508_v40 = vpop.f32.mrf.mxu0  ;;  %v548_v48 = vpop.f32.mrf.mxu1  ;;  %889 = vst.msk [vmem:[%s2526_s2 + $0x198] sm:$0xff] %vm19_vm1, %v2009_v37  ;;  %v684_v17 = vadd.f32 %v585_v60, %v125_v5 }
  0xd4   :  { %v653_v43 = vadd.f32 %v508_v40, %v94_v39  ;;  %v669_v63 = vadd.f32 %v548_v48, %v110_v59  ;;  %v1042_v40 = vmul.f32 %v1813_v50, %v1813_v50  ;;  %v1043_v48 = vmul.f32 %v1842_v62, %v1842_v62  ;;  %759 = vst.msk [vmem:[#allocation2 + $0x1a0] sm:$0xff] %vm19_vm1, %v695_v15 }
  0xd5   :  { %v1911_v46 = vld [vmem:[#allocation2 + $0x48] sm:$0xff]  ;;  %748 = vst.msk [vmem:[#allocation2 + $0x148] sm:$0xff] %vm19_vm1, %v684_v17 }
  0xd6   :  { %847 = vst.msk [vmem:[%s2526_s2 + $0x48] sm:$0xff] %vm19_vm1, %v1911_v46  ;;  %v1112_v22 = vsel %vm19_vm1, %v1043_v48, 0.0  ;;  %v1046_v62 = vmul.f32 %v1911_v46, %v1911_v46 }
  0xd7   :  { %717 = vst.msk [vmem:[#allocation2 + $0x50] sm:$0xff] %vm19_vm1, %v653_v43  ;;  %v1931_v57 = vld [vmem:[#allocation2 + $0xc8] sm:$0xff] }
  0xd8   :  { %863 = vst.msk [vmem:[%s2526_s2 + $0xc8] sm:$0xff] %vm19_vm1, %v1931_v57 }
  0xd9   :  { %733 = vst.msk [vmem:[#allocation2 + $0xd0] sm:$0xff] %vm19_vm1, %v669_v63  ;;  %v2002_v36 = vld [vmem:[#allocation2 + $0x138] sm:$0xff]  ;;  %v911_v63 = vsel %vm19_vm1, %v1813_v50, 0.0  ;;  %v98_v50 = vld [vmem:[#allocation2 + $0x70] sm:$0xff] }
  0xda   :  { %877 = vst.msk [vmem:[%s2526_s2 + $0x138] sm:$0xff] %vm19_vm1, %v2002_v36 }
  0xdb   :  { %v510_v1 = vpop.f32.mrf.mxu0  ;;  %v550_v10 = vpop.f32.mrf.mxu1  ;;  %v2083_v15 = vld [vmem:[#allocation2 + $0x1a0] sm:$0xff] }
  0xdc   :  { %v654_v3 = vadd.f32 %v510_v1, %v95_v56  ;;  %v670_v16 = vadd.f32 %v550_v10, %v111_v7  ;;  %v124_v56 = vld [vmem:[#allocation2 + $0x140] sm:$0xff]  ;;  %v615_v7 = vpop.f32.mrf.mxu3  ;;  %v1110_v10 = vsel %vm19_vm1, %v1042_v40, 0.0  ;;  %890 = vst.msk [vmem:[%s2526_s2 + $0x1a0] sm:$0xff] %vm19_vm1, %v2083_v15 }
  0xdd   :  { %v683_v1 = vadd.f32 %v583_v31, %v124_v56  ;;  %v588_v56 = vpop.f32.mrf.mxu2 }
  0xde   :  { %v1954_v6 = vld [vmem:[#allocation2 + $0x50] sm:$0xff]  ;;  %718 = vst.msk [vmem:[#allocation2 + $0x58] sm:$0xff] %vm19_vm1, %v654_v3  ;;  %v113_v3 = vld [vmem:[#allocation2 + $0xe8] sm:$0xff] }
  0xdf   :  { %848 = vst.msk [vmem:[%s2526_s2 + $0x50] sm:$0xff] %vm19_vm1, %v1954_v6  ;;  %v1047_v48 = vmul.f32 %v1954_v6, %v1954_v6 }
  0xe0   :  { %734 = vst.msk [vmem:[#allocation2 + $0xd8] sm:$0xff] %vm19_vm1, %v670_v16  ;;  %v1965_v25 = vld [vmem:[#allocation2 + $0xd0] sm:$0xff] }
  0xe1   :  { %864 = vst.msk [vmem:[%s2526_s2 + $0xd0] sm:$0xff] %vm19_vm1, %v1965_v25  ;;  %v1120_v13 = vsel %vm19_vm1, %v1047_v48, 0.0 }
  0xe2   :  { %747 = vst.msk [vmem:[#allocation2 + $0x140] sm:$0xff] %vm19_vm1, %v683_v1 }
  0xe3   :  { %v513_v24 = vpop.f32.mrf.mxu0  ;;  %v553_v30 = vpop.f32.mrf.mxu1 }
  0xe4   :  { %v655_v26 = vadd.f32 %v513_v24, %v96_v23  ;;  %v671_v0 = vadd.f32 %v553_v30, %v112_v53  ;;  %v1045_v23 = vmul.f32 %v1890_v28, %v1890_v28  ;;  %v912_v24 = vadd.f32 %v911_v63, %v1788_v41  ;;  %v618_v63 = vpop.f32.mrf.mxu3 }
  0xe5   :  { %v1975_v29 = vld [vmem:[#allocation2 + $0x58] sm:$0xff]  ;;  %v915_v30 = vsel %vm19_vm1, %v1861_v12, 0.0 }
  0xe6   :  { %849 = vst.msk [vmem:[%s2526_s2 + $0x58] sm:$0xff] %vm19_vm1, %v1975_v29  ;;  %v914_v40 = vadd.f32 %v913_v21, %v912_v24  ;;  %v1116_v12 = vsel %vm19_vm1, %v1045_v23, 0.0  ;;  %v1048_v1 = vmul.f32 %v1975_v29, %v1975_v29  ;;  %v2102_v24 = vld [vmem:[#allocation2 + $0x148] sm:$0xff] }
  0xe7   :  { %719 = vst.msk [vmem:[#allocation2 + $0x60] sm:$0xff] %vm19_vm1, %v655_v26  ;;  %v1995_v34 = vld [vmem:[#allocation2 + $0xd8] sm:$0xff]  ;;  %v1111_v26 = vadd.f32 %v1110_v10, %v1800_v45  ;;  %v917_v45 = vsel %vm19_vm1, %v1890_v28, 0.0  ;;  %v919_v28 = vsel %vm19_vm1, %v1911_v46, 0.0  ;;  %v921_v46 = vsel %vm19_vm1, %v1954_v6, 0.0 }
  0xe8   :  { %865 = vst.msk [vmem:[%s2526_s2 + $0xd8] sm:$0xff] %vm19_vm1, %v1995_v34  ;;  %v1122_v21 = vsel %vm19_vm1, %v1048_v1, 0.0 }
  0xe9   :  { %735 = vst.msk [vmem:[#allocation2 + $0xe0] sm:$0xff] %vm19_vm1, %v671_v0  ;;  %v1118_v0 = vsel %vm19_vm1, %v1046_v62, 0.0  ;;  %v2073_v10 = vld [vmem:[#allocation2 + $0x140] sm:$0xff]  ;;  %v114_v62 = vld [vmem:[#allocation2 + $0xf0] sm:$0xff] }
  0xea   :  { %878 = vst.msk [vmem:[%s2526_s2 + $0x140] sm:$0xff] %vm19_vm1, %v2073_v10 }
  0xeb   :  { %v515_v39 = vpop.f32.mrf.mxu0  ;;  %v555_v59 = vpop.f32.mrf.mxu1  ;;  %879 = vst.msk [vmem:[%s2526_s2 + $0x148] sm:$0xff] %vm19_vm1, %v2102_v24 }
  0xec   :  { %v656_v43 = vadd.f32 %v515_v39, %v97_v35  ;;  %v672_v16 = vadd.f32 %v555_v59, %v113_v3  ;;  %v696_v39 = vadd.f32 %v615_v7, %v137_v20  ;;  %v916_v59 = vadd.f32 %v915_v30, %v914_v40  ;;  %v99_v7 = vld [vmem:[#allocation2 + $0x78] sm:$0xff]  ;;  %v590_v40 = vpop.f32.mrf.mxu2 }
  0xed   :  { %v923_v20 = vsel %vm19_vm1, %v1975_v29, 0.0 }
  0xee   :  { %v2020_v51 = vld [vmem:[#allocation2 + $0x60] sm:$0xff]  ;;  %720 = vst.msk [vmem:[#allocation2 + $0x68] sm:$0xff] %vm19_vm1, %v656_v43  ;;  %v1113_v43 = vadd.f32 %v1112_v22, %v1111_v26  ;;  %v918_v3 = vadd.f32 %v917_v45, %v916_v59  ;;  %v138_v59 = vld [vmem:[#allocation2 + $0x1b0] sm:$0xff] }
  0xef   :  { %850 = vst.msk [vmem:[%s2526_s2 + $0x60] sm:$0xff] %vm19_vm1, %v2020_v51  ;;  %v1049_v22 = vmul.f32 %v2020_v51, %v2020_v51  ;;  %v925_v29 = vsel %vm19_vm1, %v2020_v51, 0.0  ;;  %v115_v51 = vld [vmem:[#allocation2 + $0xf8] sm:$0xff] }
  0xf0   :  { %736 = vst.msk [vmem:[#allocation2 + $0xe8] sm:$0xff] %vm19_vm1, %v672_v16  ;;  %v1115_v60 = vadd.f32 %v1114_v33, %v1113_v43  ;;  %v2065_v2 = vld [vmem:[#allocation2 + $0xe0] sm:$0xff]  ;;  %v920_v16 = vadd.f32 %v919_v28, %v918_v3 }
  0xf1   :  { %760 = vst.msk [vmem:[#allocation2 + $0x1a8] sm:$0xff] %vm19_vm1, %v696_v39  ;;  %v1124_v28 = vsel %vm19_vm1, %v1049_v22, 0.0 }
  0xf2   :  { %v1117_v5 = vadd.f32 %v1116_v12, %v1115_v60  ;;  %866 = vst.msk [vmem:[%s2526_s2 + $0xe0] sm:$0xff] %vm19_vm1, %v2065_v2  ;;  %v922_v26 = vadd.f32 %v921_v46, %v920_v16  ;;  %v620_v60 = vpop.f32.mrf.mxu3 }
  0xf3   :  { %v518_v31 = vpop.f32.mrf.mxu0  ;;  %v558_v53 = vpop.f32.mrf.mxu1 }
  0xf4   :  { %v657_v35 = vadd.f32 %v518_v31, %v98_v50  ;;  %v1119_v50 = vadd.f32 %v1118_v0, %v1117_v5  ;;  %v924_v43 = vadd.f32 %v923_v20, %v922_v26  ;;  %v673_v48 = vadd.f32 %v558_v53, %v114_v62  ;;  %v127_v5 = vld [vmem:[#allocation2 + $0x158] sm:$0xff] }
  0xf5   :  { %v787_v41 = vld [vmem:[#allocation2 + $0x68] sm:$0xff]  ;;  %v697_v53 = vadd.f32 %v618_v63, %v138_v59  ;;  %v686_v16 = vadd.f32 %v590_v40, %v127_v5  ;;  %v1053_v26 = vmul.f32 %v1745_v4, %v1745_v4  ;;  %v1054_v40 = vmul.f32 %v1754_v8, %v1754_v8 }
  0xf6   :  { %851 = vst.msk [vmem:[%s2526_s2 + $0x68] sm:$0xff] %vm19_vm1, %v787_v41  ;;  %v1121_v30 = vadd.f32 %v1120_v13, %v1119_v50  ;;  %v1050_v31 = vmul.f32 %v787_v41, %v787_v41  ;;  %v927_v0 = vsel %vm19_vm1, %v787_v41, 0.0  ;;  %v926_v46 = vadd.f32 %v925_v29, %v924_v43 }
  0xf7   :  { %721 = vst.msk [vmem:[#allocation2 + $0x70] sm:$0xff] %vm19_vm1, %v657_v35  ;;  %v2090_v6 = vld [vmem:[#allocation2 + $0xe8] sm:$0xff]  ;;  %v126_v35 = vld [vmem:[#allocation2 + $0x150] sm:$0xff] }
  0xf8   :  { %867 = vst.msk [vmem:[%s2526_s2 + $0xe8] sm:$0xff] %vm19_vm1, %v2090_v6  ;;  %v1123_v45 = vadd.f32 %v1122_v21, %v1121_v30  ;;  %v2116_v12 = vld [vmem:[#allocation2 + $0x1a8] sm:$0xff]  ;;  %v685_v3 = vadd.f32 %v588_v56, %v126_v35  ;;  %v1126_v50 = vsel %vm19_vm1, %v1050_v31, 0.0  ;;  %v928_v20 = vadd.f32 %v927_v0, %v926_v46  ;;  %v593_v31 = vpop.f32.mrf.mxu2 }
  0xf9   :  { %891 = vst.msk [vmem:[%s2526_s2 + $0x1a8] sm:$0xff] %vm19_vm1, %v2116_v12  ;;  %v937_v46 = vsel %vm19_vm1, %v1763_v14, 0.0 }
  0xfa   :  { %737 = vst.msk [vmem:[#allocation2 + $0xf0] sm:$0xff] %vm19_vm1, %v673_v48  ;;  %v623_v35 = vpop.f32.mrf.mxu3 }
  0xfb   :  { %v520_v17 = vpop.f32.mrf.mxu0  ;;  %v560_v39 = vpop.f32.mrf.mxu1  ;;  %749 = vst.msk [vmem:[#allocation2 + $0x150] sm:$0xff] %vm19_vm1, %v685_v3 }
  0xfc   :  { %v658_v23 = vadd.f32 %v520_v17, %v99_v7  ;;  %v139_v7 = vld [vmem:[#allocation2 + $0x1b8] sm:$0xff]  ;;  %v674_v13 = vadd.f32 %v560_v39, %v115_v51  ;;  %v1125_v17 = vadd.f32 %v1124_v28, %v1123_v45  ;;  %761 = vst.msk [vmem:[#allocation2 + $0x1b0] sm:$0xff] %vm19_vm1, %v697_v53  ;;  %v933_v39 = vsel %vm19_vm1, %v1745_v4, 0.0 }
  0xfd   :  { %v698_v21 = vadd.f32 %v620_v60, %v139_v7  ;;  %750 = vst.msk [vmem:[#allocation2 + $0x158] sm:$0xff] %vm19_vm1, %v686_v16  ;;  %v1132_v60 = vsel %vm19_vm1, %v1053_v26, 0.0  ;;  %v935_v4 = vsel %vm19_vm1, %v1754_v8, 0.0  ;;  %v1055_v28 = vmul.f32 %v1763_v14, %v1763_v14 }
  0xfe   :  { %v788_v33 = vld [vmem:[#allocation2 + $0x70] sm:$0xff]  ;;  %722 = vst.msk [vmem:[#allocation2 + $0x78] sm:$0xff] %vm19_vm1, %v658_v23  ;;  %v1127_v22 = vadd.f32 %v1126_v50, %v1125_v17  ;;  %v1134_v7 = vsel %vm19_vm1, %v1054_v40, 0.0  ;;  %v939_v14 = vsel %vm19_vm1, %v1786_v38, 0.0 }
  0xff   :  { %852 = vst.msk [vmem:[%s2526_s2 + $0x70] sm:$0xff] %vm19_vm1, %v788_v33  ;;  %v1051_v1 = vmul.f32 %v788_v33, %v788_v33  ;;  %v929_v41 = vsel %vm19_vm1, %v788_v33, 0.0  ;;  %v1136_v50 = vsel %vm19_vm1, %v1055_v28, 0.0 }
 0x100   :  { %738 = vst.msk [vmem:[#allocation2 + $0xf8] sm:$0xff] %vm19_vm1, %v674_v13  ;;  %v930_v23 = vadd.f32 %v929_v41, %v928_v20  ;;  %v1057_v41 = vmul.f32 %v1803_v47, %v1803_v47  ;;  %v128_v20 = vld [vmem:[#allocation2 + $0x160] sm:$0xff] }
 0x101   :  { %v1128_v56 = vsel %vm19_vm1, %v1051_v1, 0.0  ;;  %762 = vst.msk [vmem:[#allocation2 + $0x1b8] sm:$0xff] %vm19_vm1, %v698_v21  ;;  %v2146_v45 = vld [vmem:[#allocation2 + $0xf0] sm:$0xff]  ;;  %v1056_v1 = vmul.f32 %v1786_v38, %v1786_v38  ;;  %v140_v21 = vld [vmem:[#allocation2 + $0x1c0] sm:$0xff]  ;;  %v129_v38 = vld [vmem:[#allocation2 + $0x168] sm:$0xff] }
 0x102   :  { %v1129_v33 = vadd.f32 %v1128_v56, %v1127_v22  ;;  %868 = vst.msk [vmem:[%s2526_s2 + $0xf0] sm:$0xff] %vm19_vm1, %v2146_v45  ;;  %v2153_v51 = vld [vmem:[#allocation2 + $0x150] sm:$0xff]  ;;  %v595_v56 = vpop.f32.mrf.mxu2 }
 0x103   :  { %880 = vst.msk [vmem:[%s2526_s2 + $0x150] sm:$0xff] %vm19_vm1, %v2153_v51  ;;  %v2165_v0 = vld [vmem:[#allocation2 + $0x1b0] sm:$0xff]  ;;  %v1138_v22 = vsel %vm19_vm1, %v1056_v1, 0.0  ;;  %v688_v40 = vadd.f32 %v595_v56, %v129_v38  ;;  %v1064_v38 = vmul.f32 %v1995_v34, %v1995_v34 }
 0x104   :  { %892 = vst.msk [vmem:[%s2526_s2 + $0x1b0] sm:$0xff] %vm19_vm1, %v2165_v0  ;;  %v2184_v53 = vld [vmem:[#allocation2 + $0x158] sm:$0xff] }
 0x105   :  { %v789_v63 = vld [vmem:[#allocation2 + $0x78] sm:$0xff]  ;;  %881 = vst.msk [vmem:[%s2526_s2 + $0x158] sm:$0xff] %vm19_vm1, %v2184_v53 }
 0x106   :  { %853 = vst.msk [vmem:[%s2526_s2 + $0x78] sm:$0xff] %vm19_vm1, %v789_v63  ;;  %v931_v30 = vsel %vm19_vm1, %v789_v63, 0.0  ;;  %v1052_v29 = vmul.f32 %v789_v63, %v789_v63 }
 0x107   :  { %v932_v62 = vadd.f32 %v931_v30, %v930_v23  ;;  %v2174_v8 = vld [vmem:[#allocation2 + $0xf8] sm:$0xff]  ;;  %v941_v23 = vsel %vm19_vm1, %v1803_v47, 0.0  ;;  %v141_v30 = vld [vmem:[#allocation2 + $0x1c8] sm:$0xff]  ;;  %752 = vst.msk [vmem:[#allocation2 + $0x168] sm:$0xff] %vm19_vm1, %v688_v40 }
 0x108   :  { %v1130_v43 = vsel %vm19_vm1, %v1052_v29, 0.0  ;;  %869 = vst.msk [vmem:[%s2526_s2 + $0xf8] sm:$0xff] %vm19_vm1, %v2174_v8  ;;  %v2196_v17 = vld [vmem:[#allocation2 + $0x1b8] sm:$0xff]  ;;  %v625_v29 = vpop.f32.mrf.mxu3 }
 0x109   :  { %v934_v48 = vadd.f32 %v933_v39, %v932_v62  ;;  %v1131_v59 = vadd.f32 %v1130_v43, %v1129_v33  ;;  %893 = vst.msk [vmem:[%s2526_s2 + $0x1b8] sm:$0xff] %vm19_vm1, %v2196_v17  ;;  %v1058_v33 = vmul.f32 %v1826_v54, %v1826_v54  ;;  %v687_v62 = vadd.f32 %v593_v31, %v128_v20 }
 0x10a   :  { %v699_v39 = vadd.f32 %v623_v35, %v140_v21  ;;  %v700_v47 = vadd.f32 %v625_v29, %v141_v30  ;;  %v945_v35 = vsel %vm19_vm1, %v1852_v9, 0.0  ;;  %v949_v20 = vsel %vm19_vm1, %v1901_v42, 0.0 }
 0x10b   :  { %v936_v3 = vadd.f32 %v935_v4, %v934_v48  ;;  %v1133_v5 = vadd.f32 %v1132_v60, %v1131_v59  ;;  %v1140_v59 = vsel %vm19_vm1, %v1057_v41, 0.0  ;;  %v943_v60 = vsel %vm19_vm1, %v1826_v54, 0.0  ;;  %751 = vst.msk [vmem:[#allocation2 + $0x160] sm:$0xff] %vm19_vm1, %v687_v62 }
 0x10c   :  { %v1059_v4 = vmul.f32 %v1852_v9, %v1852_v9  ;;  %763 = vst.msk [vmem:[#allocation2 + $0x1c0] sm:$0xff] %vm19_vm1, %v699_v39  ;;  %v1142_v31 = vsel %vm19_vm1, %v1058_v33, 0.0  ;;  %v1062_v21 = vmul.f32 %v1931_v57, %v1931_v57  ;;  %v953_v62 = vsel %vm19_vm1, %v1965_v25, 0.0 }
 0x10d   :  { %v938_v13 = vadd.f32 %v937_v46, %v936_v3  ;;  %v1135_v16 = vadd.f32 %v1134_v7, %v1133_v5  ;;  %v1060_v3 = vmul.f32 %v1874_v18, %v1874_v18  ;;  %764 = vst.msk [vmem:[#allocation2 + $0x1c8] sm:$0xff] %vm19_vm1, %v700_v47  ;;  %v947_v46 = vsel %vm19_vm1, %v1874_v18, 0.0 }
 0x10e   :  { %v1144_v7 = vsel %vm19_vm1, %v1059_v4, 0.0  ;;  %v1150_v33 = vsel %vm19_vm1, %v1062_v21, 0.0  ;;  %v1154_v47 = vsel %vm19_vm1, %v1064_v38, 0.0  ;;  %v142_v4 = vld [vmem:[#allocation2 + $0x1d0] sm:$0xff] }
 0x10f   :  { %v940_v63 = vadd.f32 %v939_v14, %v938_v13  ;;  %v1137_v26 = vadd.f32 %v1136_v50, %v1135_v16  ;;  %v1061_v13 = vmul.f32 %v1901_v42, %v1901_v42  ;;  %v598_v16 = vpop.f32.mrf.mxu2  ;;  %v1146_v41 = vsel %vm19_vm1, %v1060_v3, 0.0 }
 0x110   :  { %v628_v14 = vpop.f32.mrf.mxu3 }
 0x111   :  { %v942_v43 = vadd.f32 %v941_v23, %v940_v63  ;;  %v1139_v48 = vadd.f32 %v1138_v22, %v1137_v26  ;;  %v1148_v18 = vsel %vm19_vm1, %v1061_v13, 0.0  ;;  %v951_v63 = vsel %vm19_vm1, %v1931_v57, 0.0  ;;  %v2253_v57 = vld [vmem:[#allocation2 + $0x168] sm:$0xff] }
 0x112   :  { %v2232_v23 = vld [vmem:[#allocation2 + $0x160] sm:$0xff]  ;;  %v1063_v26 = vmul.f32 %v1965_v25, %v1965_v25  ;;  %883 = vst.msk [vmem:[%s2526_s2 + $0x168] sm:$0xff] %vm19_vm1, %v2253_v57  ;;  %v955_v25 = vsel %vm19_vm1, %v1995_v34, 0.0  ;;  %v1066_v34 = vmul.f32 %v2090_v6, %v2090_v6 }
 0x113   :  { %v944_v28 = vadd.f32 %v943_v60, %v942_v43  ;;  %v1141_v1 = vadd.f32 %v1140_v59, %v1139_v48  ;;  %882 = vst.msk [vmem:[%s2526_s2 + $0x160] sm:$0xff] %vm19_vm1, %v2232_v23  ;;  %v2246_v42 = vld [vmem:[#allocation2 + $0x1c0] sm:$0xff]  ;;  %v1065_v59 = vmul.f32 %v2065_v2, %v2065_v2  ;;  %v130_v60 = vld [vmem:[#allocation2 + $0x170] sm:$0xff] }
 0x114   :  { %894 = vst.msk [vmem:[%s2526_s2 + $0x1c0] sm:$0xff] %vm19_vm1, %v2246_v42  ;;  %v2263_v39 = vld [vmem:[#allocation2 + $0x1c8] sm:$0xff]  ;;  %v1152_v48 = vsel %vm19_vm1, %v1063_v26, 0.0  ;;  %v689_v3 = vadd.f32 %v598_v16, %v130_v60  ;;  %v959_v16 = vsel %vm19_vm1, %v2090_v6, 0.0  ;;  %v1069_v26 = vmul.f32 %v1811_v49, %v1811_v49 }
 0x115   :  { %v1143_v54 = vadd.f32 %v1142_v31, %v1141_v1  ;;  %v946_v5 = vadd.f32 %v945_v35, %v944_v28  ;;  %895 = vst.msk [vmem:[%s2526_s2 + $0x1c8] sm:$0xff] %vm19_vm1, %v2263_v39  ;;  %v131_v28 = vld [vmem:[#allocation2 + $0x178] sm:$0xff]  ;;  %v1071_v60 = vmul.f32 %v1859_v11, %v1859_v11 }
 0x116   :  { %753 = vst.msk [vmem:[#allocation2 + $0x170] sm:$0xff] %vm19_vm1, %v689_v3  ;;  %v1072_v3 = vmul.f32 %v1881_v19, %v1881_v19 }
 0x117   :  { %v948_v50 = vadd.f32 %v947_v46, %v946_v5  ;;  %v1145_v9 = vadd.f32 %v1144_v7, %v1143_v54  ;;  %v600_v1 = vpop.f32.mrf.mxu2  ;;  %v701_v54 = vadd.f32 %v628_v14, %v142_v4  ;;  %v143_v5 = vld [vmem:[#allocation2 + $0x1d8] sm:$0xff]  ;;  %v957_v46 = vsel %vm19_vm1, %v2065_v2, 0.0 }
 0x118   :  { %v630_v7 = vpop.f32.mrf.mxu3  ;;  %v690_v13 = vadd.f32 %v600_v1, %v131_v28  ;;  %v1067_v14 = vmul.f32 %v2146_v45, %v2146_v45 }
 0x119   :  { %v950_v56 = vadd.f32 %v949_v20, %v948_v50  ;;  %v1147_v22 = vadd.f32 %v1146_v41, %v1145_v9  ;;  %v702_v50 = vadd.f32 %v630_v7, %v143_v5  ;;  %v1156_v20 = vsel %vm19_vm1, %v1065_v59, 0.0  ;;  %765 = vst.msk [vmem:[#allocation2 + $0x1d0] sm:$0xff] %vm19_vm1, %v701_v54 }
 0x11a   :  { %754 = vst.msk [vmem:[#allocation2 + $0x178] sm:$0xff] %vm19_vm1, %v690_v13  ;;  %v1160_v38 = vsel %vm19_vm1, %v1067_v14, 0.0  ;;  %v1164_v59 = vsel %vm19_vm1, %v1069_v26, 0.0  ;;  %v1168_v7 = vsel %vm19_vm1, %v1071_v60, 0.0  ;;  %v145_v13 = vld [vmem:[#allocation2 + $0x1e8] sm:$0xff]  ;;  %v973_v14 = vsel %vm19_vm1, %v1909_v44, 0.0 }
 0x11b   :  { %v952_v30 = vadd.f32 %v951_v63, %v950_v56  ;;  %v1149_v29 = vadd.f32 %v1148_v18, %v1147_v22  ;;  %v1158_v56 = vsel %vm19_vm1, %v1066_v34, 0.0  ;;  %v961_v22 = vsel %vm19_vm1, %v2146_v45, 0.0  ;;  %766 = vst.msk [vmem:[#allocation2 + $0x1d8] sm:$0xff] %vm19_vm1, %v702_v50 }
 0x11c   :  { %v1068_v18 = vmul.f32 %v2174_v8, %v2174_v8  ;;  %v965_v45 = vsel %vm19_vm1, %v1811_v49, 0.0  ;;  %v967_v49 = vsel %vm19_vm1, %v1833_v55, 0.0  ;;  %v1073_v34 = vmul.f32 %v1909_v44, %v1909_v44 }
 0x11d   :  { %v954_v40 = vadd.f32 %v953_v62, %v952_v30  ;;  %v1151_v43 = vadd.f32 %v1150_v33, %v1149_v29  ;;  %v963_v30 = vsel %vm19_vm1, %v2174_v8, 0.0 }
 0x11f   :  { %v956_v31 = vadd.f32 %v955_v25, %v954_v40  ;;  %v1153_v35 = vadd.f32 %v1152_v48, %v1151_v43  ;;  %v1070_v40 = vmul.f32 %v1833_v55, %v1833_v55  ;;  %v1162_v43 = vsel %vm19_vm1, %v1068_v18, 0.0  ;;  %v2304_v48 = vld [vmem:[#allocation2 + $0x170] sm:$0xff] }
 0x120   :  { %v633_v62 = vpop.f32.mrf.mxu3  ;;  %884 = vst.msk [vmem:[%s2526_s2 + $0x170] sm:$0xff] %vm19_vm1, %v2304_v48  ;;  %v2311_v8 = vld [vmem:[#allocation2 + $0x1d0] sm:$0xff]  ;;  %v975_v18 = vsel %vm19_vm1, %v1938_v58, 0.0 }
 0x121   :  { %v958_v9 = vadd.f32 %v957_v46, %v956_v31  ;;  %v1155_v41 = vadd.f32 %v1154_v47, %v1153_v35  ;;  %896 = vst.msk [vmem:[%s2526_s2 + $0x1d0] sm:$0xff] %vm19_vm1, %v2311_v8  ;;  %v2323_v4 = vld [vmem:[#allocation2 + $0x178] sm:$0xff]  ;;  %v1166_v31 = vsel %vm19_vm1, %v1070_v40, 0.0  ;;  %v969_v35 = vsel %vm19_vm1, %v1859_v11, 0.0  ;;  %v144_v11 = vld [vmem:[#allocation2 + $0x1e0] sm:$0xff] }
 0x122   :  { %885 = vst.msk [vmem:[%s2526_s2 + $0x178] sm:$0xff] %vm19_vm1, %v2323_v4  ;;  %v2330_v55 = vld [vmem:[#allocation2 + $0x1d8] sm:$0xff]  ;;  %v971_v46 = vsel %vm19_vm1, %v1881_v19, 0.0 }
 0x123   :  { %v1157_v2 = vadd.f32 %v1156_v20, %v1155_v41  ;;  %v960_v21 = vadd.f32 %v959_v16, %v958_v9  ;;  %897 = vst.msk [vmem:[%s2526_s2 + $0x1d8] sm:$0xff] %vm19_vm1, %v2330_v55  ;;  %v703_v41 = vadd.f32 %v633_v62, %v144_v11  ;;  %v1170_v16 = vsel %vm19_vm1, %v1072_v3, 0.0 }
 0x124   :  { %v987_v11 = vsel %vm19_vm1, %v2184_v53, 0.0 }
 0x125   :  { %v1159_v6 = vadd.f32 %v1158_v56, %v1157_v2  ;;  %v962_v63 = vadd.f32 %v961_v22, %v960_v21  ;;  %v1074_v2 = vmul.f32 %v1938_v58, %v1938_v58  ;;  %767 = vst.msk [vmem:[#allocation2 + $0x1e0] sm:$0xff] %vm19_vm1, %v703_v41  ;;  %v1172_v22 = vsel %vm19_vm1, %v1073_v34, 0.0 }
 0x126   :  { %v979_v58 = vsel %vm19_vm1, %v2002_v36, 0.0 }
 0x127   :  { %v1161_v29 = vadd.f32 %v1160_v38, %v1159_v6  ;;  %v964_v33 = vadd.f32 %v963_v30, %v962_v63  ;;  %v1075_v6 = vmul.f32 %v1973_v27, %v1973_v27  ;;  %v1174_v26 = vsel %vm19_vm1, %v1074_v2, 0.0 }
 0x128   :  { %v635_v20 = vpop.f32.mrf.mxu3  ;;  %v977_v38 = vsel %vm19_vm1, %v1973_v27, 0.0  ;;  %v1076_v30 = vmul.f32 %v2002_v36, %v2002_v36  ;;  %v981_v27 = vsel %vm19_vm1, %v2073_v10, 0.0  ;;  %v989_v2 = vsel %vm19_vm1, %v2232_v23, 0.0 }
 0x129   :  { %v966_v25 = vadd.f32 %v965_v45, %v964_v33  ;;  %v1163_v47 = vadd.f32 %v1162_v43, %v1161_v29  ;;  %v704_v21 = vadd.f32 %v635_v20, %v145_v13  ;;  %v1176_v62 = vsel %vm19_vm1, %v1075_v6, 0.0 }
 0x12a   :  { %v1077_v45 = vmul.f32 %v2073_v10, %v2073_v10  ;;  %v983_v10 = vsel %vm19_vm1, %v2102_v24, 0.0  ;;  %v1081_v13 = vmul.f32 %v2232_v23, %v2232_v23  ;;  %v1083_v6 = vmul.f32 %v2304_v48, %v2304_v48 }
 0x12b   :  { %v968_v28 = vadd.f32 %v967_v49, %v966_v25  ;;  %v1165_v1 = vadd.f32 %v1164_v59, %v1163_v47  ;;  %768 = vst.msk [vmem:[#allocation2 + $0x1e8] sm:$0xff] %vm19_vm1, %v704_v21  ;;  %v1178_v47 = vsel %vm19_vm1, %v1076_v30, 0.0  ;;  %v1078_v59 = vmul.f32 %v2102_v24, %v2102_v24 }
 0x12c   :  { %v2374_v49 = vld [vmem:[#allocation2 + $0x1e0] sm:$0xff]  ;;  %v1082_v21 = vmul.f32 %v2253_v57, %v2253_v57 }
 0x12d   :  { %v970_v54 = vadd.f32 %v969_v35, %v968_v28  ;;  %v1167_v5 = vadd.f32 %v1166_v31, %v1165_v1  ;;  %898 = vst.msk [vmem:[%s2526_s2 + $0x1e0] sm:$0xff] %vm19_vm1, %v2374_v49  ;;  %v1180_v1 = vsel %vm19_vm1, %v1077_v45, 0.0  ;;  %v1079_v31 = vmul.f32 %v2153_v51, %v2153_v51 }
 0x12f   :  { %v972_v50 = vadd.f32 %v971_v46, %v970_v54  ;;  %v1169_v9 = vadd.f32 %v1168_v7, %v1167_v5  ;;  %v1182_v54 = vsel %vm19_vm1, %v1078_v59, 0.0  ;;  %v985_v5 = vsel %vm19_vm1, %v2153_v51, 0.0 }
 0x130   :  { %v638_v25 = vpop.f32.mrf.mxu3  ;;  %v1080_v7 = vmul.f32 %v2184_v53, %v2184_v53  ;;  %v1184_v34 = vsel %vm19_vm1, %v1079_v31, 0.0  ;;  %v1001_v31 = vsel %vm19_vm1, %v1988_v32, 0.0 }
 0x131   :  { %v974_v56 = vadd.f32 %v973_v14, %v972_v50  ;;  %v1171_v19 = vadd.f32 %v1170_v16, %v1169_v9  ;;  %v146_v50 = vld [vmem:[#allocation2 + $0x1f0] sm:$0xff]  ;;  %v147_v9 = vld [vmem:[#allocation2 + $0x1f8] sm:$0xff] }
 0x132   :  { %v2381_v36 = vld [vmem:[#allocation2 + $0x1e8] sm:$0xff]  ;;  %v705_v16 = vadd.f32 %v638_v25, %v146_v50  ;;  %v1186_v51 = vsel %vm19_vm1, %v1080_v7, 0.0  ;;  %v1089_v7 = vmul.f32 %v2083_v15, %v2083_v15 }
 0x133   :  { %v1173_v63 = vadd.f32 %v1172_v22, %v1171_v19  ;;  %v976_v44 = vadd.f32 %v975_v18, %v974_v56  ;;  %899 = vst.msk [vmem:[%s2526_s2 + $0x1e8] sm:$0xff] %vm19_vm1, %v2381_v36  ;;  %v1188_v22 = vsel %vm19_vm1, %v1081_v13, 0.0  ;;  %v991_v18 = vsel %vm19_vm1, %v2253_v57, 0.0 }
 0x134   :  { %769 = vst.msk [vmem:[#allocation2 + $0x1f0] sm:$0xff] %vm19_vm1, %v705_v16  ;;  %v1085_v57 = vmul.f32 %v1924_v52, %v1924_v52 }
 0x135   :  { %v978_v29 = vadd.f32 %v977_v38, %v976_v44  ;;  %v1175_v33 = vadd.f32 %v1174_v26, %v1173_v63  ;;  %v1190_v44 = vsel %vm19_vm1, %v1082_v21, 0.0  ;;  %v993_v26 = vsel %vm19_vm1, %v2304_v48, 0.0 }
 0x136   :  { %v1084_v38 = vmul.f32 %v2323_v4, %v2323_v4  ;;  %v1086_v48 = vmul.f32 %v1945_v61, %v1945_v61  ;;  %v1196_v59 = vsel %vm19_vm1, %v1085_v57, 0.0  ;;  %v1096_v57 = vmul.f32 %v2330_v55, %v2330_v55 }
 0x137   :  { %v980_v40 = vadd.f32 %v979_v58, %v978_v29  ;;  %v1177_v43 = vadd.f32 %v1176_v62, %v1175_v33  ;;  %v1192_v33 = vsel %vm19_vm1, %v1083_v6, 0.0  ;;  %v995_v62 = vsel %vm19_vm1, %v2323_v4, 0.0 }
 0x138   :  { %v640_v14 = vpop.f32.mrf.mxu3  ;;  %v1094_v6 = vmul.f32 %v2263_v39, %v2263_v39 }
 0x139   :  { %v982_v60 = vadd.f32 %v981_v27, %v980_v40  ;;  %v1179_v28 = vadd.f32 %v1178_v47, %v1177_v43  ;;  %v706_v56 = vadd.f32 %v640_v14, %v147_v9  ;;  %v997_v40 = vsel %vm19_vm1, %v1924_v52, 0.0 }
 0x13a   :  { %v1194_v43 = vsel %vm19_vm1, %v1084_v38, 0.0  ;;  %v999_v52 = vsel %vm19_vm1, %v1945_v61, 0.0  ;;  %v1204_v9 = vsel %vm19_vm1, %v1089_v7, 0.0 }
 0x13b   :  { %v984_v35 = vadd.f32 %v983_v10, %v982_v60  ;;  %v1181_v3 = vadd.f32 %v1180_v1, %v1179_v28  ;;  %770 = vst.msk [vmem:[#allocation2 + $0x1f8] sm:$0xff] %vm19_vm1, %v706_v56  ;;  %v2430_v25 = vld [vmem:[#allocation2 + $0x1f0] sm:$0xff]  ;;  %v1087_v60 = vmul.f32 %v1988_v32, %v1988_v32  ;;  %v1198_v10 = vsel %vm19_vm1, %v1086_v48, 0.0 }
 0x13c   :  { %900 = vst.msk [vmem:[%s2526_s2 + $0x1f0] sm:$0xff] %vm19_vm1, %v2430_v25  ;;  %v1005_v32 = vsel %vm19_vm1, %v2083_v15, 0.0  ;;  %v1009_v15 = vsel %vm19_vm1, %v2165_v0, 0.0 }
 0x13d   :  { %v986_v24 = vadd.f32 %v985_v5, %v984_v35  ;;  %v1183_v46 = vadd.f32 %v1182_v54, %v1181_v3  ;;  %v1088_v35 = vmul.f32 %v2009_v37, %v2009_v37  ;;  %v1200_v54 = vsel %vm19_vm1, %v1087_v60, 0.0 }
 0x13e   :  { %v1003_v5 = vsel %vm19_vm1, %v2009_v37, 0.0  ;;  %v1007_v37 = vsel %vm19_vm1, %v2116_v12, 0.0  ;;  %v1099_v60 = vmul.f32 %v2430_v25, %v2430_v25 }
 0x13f   :  { %v988_v41 = vadd.f32 %v987_v11, %v986_v24  ;;  %v1185_v20 = vadd.f32 %v1184_v34, %v1183_v46  ;;  %v1202_v34 = vsel %vm19_vm1, %v1088_v35, 0.0  ;;  %v1090_v11 = vmul.f32 %v2116_v12, %v2116_v12 }
 0x140   :  { %v1011_v12 = vsel %vm19_vm1, %v2196_v17, 0.0 }
 0x141   :  { %v1187_v19 = vadd.f32 %v1186_v51, %v1185_v20  ;;  %v990_v53 = vadd.f32 %v989_v2, %v988_v41  ;;  %v1091_v41 = vmul.f32 %v2165_v0, %v2165_v0  ;;  %v1206_v14 = vsel %vm19_vm1, %v1090_v11, 0.0 }
 0x142   :  { %v2437_v4 = vld [vmem:[#allocation2 + $0x1f8] sm:$0xff]  ;;  %v1092_v51 = vmul.f32 %v2196_v17, %v2196_v17  ;;  %v1013_v0 = vsel %vm19_vm1, %v2246_v42, 0.0  ;;  %v1015_v17 = vsel %vm19_vm1, %v2263_v39, 0.0  ;;  %v1019_v39 = vsel %vm19_vm1, %v2330_v55, 0.0 }
 0x143   :  { %v1189_v63 = vadd.f32 %v1188_v22, %v1187_v19  ;;  %v992_v23 = vadd.f32 %v991_v18, %v990_v53  ;;  %901 = vst.msk [vmem:[%s2526_s2 + $0x1f8] sm:$0xff] %vm19_vm1, %v2437_v4  ;;  %v1208_v56 = vsel %vm19_vm1, %v1091_v41, 0.0  ;;  %v1093_v19 = vmul.f32 %v2246_v42, %v2246_v42 }
 0x144   :  { %v1210_v18 = vsel %vm19_vm1, %v1092_v51, 0.0  ;;  %v1017_v42 = vsel %vm19_vm1, %v2311_v8, 0.0  ;;  %v1023_v55 = vsel %vm19_vm1, %v2381_v36, 0.0 }
 0x145   :  { %v1191_v30 = vadd.f32 %v1190_v44, %v1189_v63  ;;  %v994_v29 = vadd.f32 %v993_v26, %v992_v23  ;;  %v1212_v44 = vsel %vm19_vm1, %v1093_v19, 0.0  ;;  %v1095_v26 = vmul.f32 %v2311_v8, %v2311_v8 }
 0x146   :  { %v1021_v8 = vsel %vm19_vm1, %v2374_v49, 0.0 }
 0x147   :  { %v1193_v58 = vadd.f32 %v1192_v33, %v1191_v30  ;;  %v996_v45 = vadd.f32 %v995_v62, %v994_v29  ;;  %v1214_v29 = vsel %vm19_vm1, %v1094_v6, 0.0 }
 0x149   :  { %v998_v47 = vadd.f32 %v997_v40, %v996_v45  ;;  %v1195_v27 = vadd.f32 %v1194_v43, %v1193_v58  ;;  %v1216_v58 = vsel %vm19_vm1, %v1095_v26, 0.0  ;;  %v1097_v45 = vmul.f32 %v2374_v49, %v2374_v49 }
 0x14a   :  { %v1218_v43 = vsel %vm19_vm1, %v1096_v57, 0.0  ;;  %v1025_v49 = vsel %vm19_vm1, %v2430_v25, 0.0 }
 0x14b   :  { %v1000_v28 = vadd.f32 %v999_v52, %v998_v47  ;;  %v1197_v1 = vadd.f32 %v1196_v59, %v1195_v27  ;;  %v1098_v47 = vmul.f32 %v2381_v36, %v2381_v36  ;;  %v1220_v52 = vsel %vm19_vm1, %v1097_v45, 0.0 }
 0x14c   :  { %v1027_v36 = vsel %vm19_vm1, %v2437_v4, 0.0 }
 0x14d   :  { %v1002_v61 = vadd.f32 %v1001_v31, %v1000_v28  ;;  %v1199_v3 = vadd.f32 %v1198_v10, %v1197_v1  ;;  %v1222_v10 = vsel %vm19_vm1, %v1098_v47, 0.0  ;;  %v1100_v31 = vmul.f32 %v2437_v4, %v2437_v4 }
 0x14f   :  { %v1004_v24 = vadd.f32 %v1003_v5, %v1002_v61  ;;  %v1201_v46 = vadd.f32 %v1200_v54, %v1199_v3  ;;  %v1224_v3 = vsel %vm19_vm1, %v1099_v60, 0.0  ;;  %v1226_v7 = vsel %vm19_vm1, %v1100_v31, 0.0 }
 0x151   :  { %v1006_v13 = vadd.f32 %v1005_v32, %v1004_v24  ;;  %v1203_v50 = vadd.f32 %v1202_v34, %v1201_v46 }
 0x153   :  { %v1205_v20 = vadd.f32 %v1204_v9, %v1203_v50  ;;  %v1008_v16 = vadd.f32 %v1007_v37, %v1006_v13 }
 0x155   :  { %v1010_v2 = vadd.f32 %v1009_v15, %v1008_v16  ;;  %v1207_v21 = vadd.f32 %v1206_v14, %v1205_v20 }
 0x157   :  { %v1012_v53 = vadd.f32 %v1011_v12, %v1010_v2  ;;  %v1209_v22 = vadd.f32 %v1208_v56, %v1207_v21 }
 0x159   :  { %v1014_v63 = vadd.f32 %v1013_v0, %v1012_v53  ;;  %v1211_v23 = vadd.f32 %v1210_v18, %v1209_v22 }
 0x15b   :  { %v1016_v38 = vadd.f32 %v1015_v17, %v1014_v63  ;;  %v1213_v30 = vadd.f32 %v1212_v44, %v1211_v23 }
 0x15d   :  { %v1018_v33 = vadd.f32 %v1017_v42, %v1016_v38  ;;  %v1215_v62 = vadd.f32 %v1214_v29, %v1213_v30 }
 0x15f   :  { %v1020_v40 = vadd.f32 %v1019_v39, %v1018_v33  ;;  %v1217_v48 = vadd.f32 %v1216_v58, %v1215_v62 }
 0x161   :  { %v1219_v27 = vadd.f32 %v1218_v43, %v1217_v48  ;;  %v1022_v59 = vadd.f32 %v1021_v8, %v1020_v40 }
 0x163   :  { %v1221_v28 = vadd.f32 %v1220_v52, %v1219_v27  ;;  %v1024_v1 = vadd.f32 %v1023_v55, %v1022_v59 }
 0x165   :  { %v1223_v35 = vadd.f32 %v1222_v10, %v1221_v28  ;;  %v1026_v61 = vadd.f32 %v1025_v49, %v1024_v1 }
 0x167   :  { %v1225_v54 = vadd.f32 %v1224_v3, %v1223_v35  ;;  %v1028_v5 = vadd.f32 %v1027_v36, %v1026_v61 }
 0x169   :  { %v1029_v24 = vrot.slane %v1028_v5, 4  ;;  %v1227_v46 = vadd.f32 %v1226_v7, %v1225_v54 }
 0x16b   :  { %v1030_v34 = vadd.f32 %v1029_v24, %v1028_v5  ;;  %v1228_v32 = vrot.slane %v1227_v46, 4 }
 0x16d   :  { %v1031_v11 = vrot.slane %v1030_v34, 2  ;;  %v1229_v25 = vadd.f32 %v1228_v32, %v1227_v46 }
 0x16f   :  { %v1032_v13 = vadd.f32 %v1031_v11, %v1030_v34  ;;  %v1230_v50 = vrot.slane %v1229_v25, 2 }
 0x171   :  { %v1033_v9 = vrot.slane %v1032_v13, 1  ;;  %v1231_v37 = vadd.f32 %v1230_v50, %v1229_v25 }
 0x173   :  { %v1034_v41 = vadd.f32 %v1033_v9, %v1032_v13  ;;  %v1232_v20 = vrot.slane %v1231_v37, 1 }
 0x175   :  { %1036 = vst.msk [vmem:[%s2527_s3] sm:$0x1] %vm1035_vm2, %v1034_v41  ;;  %v1233_v4 = vadd.f32 %v1232_v20, %v1231_v37 }
 0x177   :  { %1234 = vst.msk [vmem:[%s2528_s4] sm:$0x1] %vm1035_vm2, %v1233_v4 }

// kernel: bottleneck_forward.9
= control target key start
LH: loop header
LB: loop body
LE: loop exit
PB: predicated region body
PF: predicated region fallthrough
CT: control target
= control target key end

     0   :  { %vm102_vm0 = vcmask 27648   ;;  %s299_s0 = inlined_call_operand.vmem [shape: f32[128,4], index: 0, kind: input, shape index: {}]   ;;  %s300_s1 = inlined_call_operand.vmem [shape: f32[1,4], index: 1, kind: input, shape index: {}]   ;;  %s301_s2 = inlined_call_operand.vmem [shape: f32[1,4], index: 2, kind: input, shape index: {}]   ;;  %s302_s3 = inlined_call_operand.vmem [shape: bf16[128,4], index: 3, kind: output, shape index: {}]  }
   0x1   :  { %v14_v0 = vld [vmem:[%s299_s0] sm:$0xff]  ;;  %v15_v3 = vld [vmem:[%s299_s0 + $0x8] sm:$0xff]  ;;  %v16_v6 = vld [vmem:[%s299_s0 + $0x10] sm:$0xff] }
   0x2   :  { %v151_v1 = vld [vmem:[%s300_s1] ss:$0 sm:$0xff]  ;;  %v17_v7 = vld [vmem:[%s299_s0 + $0x18] sm:$0xff]  ;;  %v19_v12 = vld [vmem:[%s299_s0 + $0x28] sm:$0xff] }
   0x3   :  { %v156_v2 = vld [vmem:[%s301_s2] ss:$0 sm:$0xff]  ;;  %v34_v4 = vmul.f32 %v151_v1, %v14_v0  ;;  %v35_v5 = vmul.f32 %v151_v1, %v15_v3  ;;  %v36_v9 = vmul.f32 %v151_v1, %v16_v6  ;;  %v37_v10 = vmul.f32 %v151_v1, %v17_v7  ;;  %v20_v13 = vld [vmem:[%s299_s0 + $0x30] sm:$0xff]  ;;  %v21_v14 = vld [vmem:[%s299_s0 + $0x38] sm:$0xff] }
   0x4   :  { %v18_v8 = vld [vmem:[%s299_s0 + $0x20] sm:$0xff]  ;;  %v39_v17 = vmul.f32 %v151_v1, %v19_v12  ;;  %v40_v18 = vmul.f32 %v151_v1, %v20_v13  ;;  %v41_v22 = vmul.f32 %v151_v1, %v21_v14  ;;  %v23_v32 = vld [vmem:[%s299_s0 + $0x48] sm:$0xff]  ;;  %v24_v37 = vld [vmem:[%s299_s0 + $0x50] sm:$0xff] }
   0x5   :  { %v38_v11 = vmul.f32 %v151_v1, %v18_v8  ;;  %v54_v15 = vadd.f32 %v156_v2, %v34_v4  ;;  %v55_v16 = vadd.f32 %v156_v2, %v35_v5  ;;  %v56_v19 = vadd.f32 %v156_v2, %v36_v9  ;;  %v22_v31 = vld [vmem:[%s299_s0 + $0x40] sm:$0xff]  ;;  %v25_v38 = vld [vmem:[%s299_s0 + $0x58] sm:$0xff]  ;;  %v27_v44 = vld [vmem:[%s299_s0 + $0x68] sm:$0xff] }
   0x6   :  { %v57_v20 = vadd.f32 %v156_v2, %v37_v10  ;;  %v59_v25 = vadd.f32 %v156_v2, %v39_v17  ;;  %v60_v26 = vadd.f32 %v156_v2, %v40_v18  ;;  %v61_v30 = vadd.f32 %v156_v2, %v41_v22  ;;  %v26_v39 = vld [vmem:[%s299_s0 + $0x60] sm:$0xff]  ;;  %v28_v45 = vld [vmem:[%s299_s0 + $0x70] sm:$0xff]  ;;  %v29_v50 = vld [vmem:[%s299_s0 + $0x78] sm:$0xff] }
   0x7   :  { %v58_v21 = vadd.f32 %v156_v2, %v38_v11  ;;  %v70_v23 = vmax.f32 %v54_v15, 0.0  ;;  %v71_v24 = vmax.f32 %v55_v16, 0.0  ;;  %v72_v27 = vmax.f32 %v56_v19, 0.0 }
   0x8   :  { %v73_v28 = vmax.f32 %v57_v20, 0.0  ;;  %v75_v35 = vmax.f32 %v59_v25, 0.0  ;;  %v76_v36 = vmax.f32 %v60_v26, 0.0  ;;  %v77_v43 = vmax.f32 %v61_v30, 0.0 }
   0x9   :  { %v74_v29 = vmax.f32 %v58_v21, 0.0  ;;  %v86_v33 = vpack.c.bf16 %v70_v23, %v70_v23  ;;  %v87_v34 = vpack.c.bf16 %v71_v24, %v71_v24  ;;  %v88_v40 = vpack.c.bf16 %v72_v27, %v72_v27 }
   0xa   :  { %v89_v41 = vpack.c.bf16 %v73_v28, %v73_v28  ;;  %v91_v46 = vpack.c.bf16 %v75_v35, %v75_v35  ;;  %v92_v47 = vpack.c.bf16 %v76_v36, %v76_v36  ;;  %v42_v48 = vmul.f32 %v151_v1, %v22_v31 }
   0xb   :  { %v90_v42 = vpack.c.bf16 %v74_v29, %v74_v29  ;;  %103 = vst.msk [vmem:[%s302_s3] sm:$0xf] %vm102_vm0, %v86_v33  ;;  %v43_v49 = vmul.f32 %v151_v1, %v23_v32  ;;  %v93_v51 = vpack.c.bf16 %v77_v43, %v77_v43  ;;  %v44_v52 = vmul.f32 %v151_v1, %v24_v37 }
   0xc   :  { %104 = vst.msk [vmem:[%s302_s3 + $0x4] sm:$0xf] %vm102_vm0, %v87_v34  ;;  %v45_v53 = vmul.f32 %v151_v1, %v25_v38  ;;  %v46_v54 = vmul.f32 %v151_v1, %v26_v39  ;;  %v62_v55 = vadd.f32 %v156_v2, %v42_v48  ;;  %v47_v57 = vmul.f32 %v151_v1, %v27_v44 }
   0xd   :  { %105 = vst.msk [vmem:[%s302_s3 + $0x8] sm:$0xf] %vm102_vm0, %v88_v40  ;;  %v63_v56 = vadd.f32 %v156_v2, %v43_v49  ;;  %v48_v58 = vmul.f32 %v151_v1, %v28_v45  ;;  %v64_v59 = vadd.f32 %v156_v2, %v44_v52  ;;  %v49_v62 = vmul.f32 %v151_v1, %v29_v50 }
   0xe   :  { %106 = vst.msk [vmem:[%s302_s3 + $0xc] sm:$0xf] %vm102_vm0, %v89_v41  ;;  %v65_v60 = vadd.f32 %v156_v2, %v45_v53  ;;  %v66_v61 = vadd.f32 %v156_v2, %v46_v54  ;;  %v78_v63 = vmax.f32 %v62_v55, 0.0  ;;  %v67_v3 = vadd.f32 %v156_v2, %v47_v57 }
   0xf   :  { %107 = vst.msk [vmem:[%s302_s3 + $0x10] sm:$0xf] %vm102_vm0, %v90_v42  ;;  %v79_v0 = vmax.f32 %v63_v56, 0.0  ;;  %v68_v4 = vadd.f32 %v156_v2, %v48_v58  ;;  %v80_v5 = vmax.f32 %v64_v59, 0.0  ;;  %v69_v1 = vadd.f32 %v156_v2, %v49_v62 }
  0x10   :  { %108 = vst.msk [vmem:[%s302_s3 + $0x14] sm:$0xf] %vm102_vm0, %v91_v46  ;;  %v81_v6 = vmax.f32 %v65_v60, 0.0  ;;  %v82_v7 = vmax.f32 %v66_v61, 0.0  ;;  %v94_v8 = vpack.c.bf16 %v78_v63, %v78_v63  ;;  %v83_v10 = vmax.f32 %v67_v3, 0.0 }
  0x11   :  { %109 = vst.msk [vmem:[%s302_s3 + $0x18] sm:$0xf] %vm102_vm0, %v92_v47  ;;  %v95_v9 = vpack.c.bf16 %v79_v0, %v79_v0  ;;  %v84_v11 = vmax.f32 %v68_v4, 0.0  ;;  %v96_v12 = vpack.c.bf16 %v80_v5, %v80_v5  ;;  %v85_v14 = vmax.f32 %v69_v1, 0.0 }
  0x12   :  { %110 = vst.msk [vmem:[%s302_s3 + $0x1c] sm:$0xf] %vm102_vm0, %v93_v51  ;;  %v97_v13 = vpack.c.bf16 %v81_v6, %v81_v6  ;;  %v98_v2 = vpack.c.bf16 %v82_v7, %v82_v7  ;;  %v99_v15 = vpack.c.bf16 %v83_v10, %v83_v10 }
  0x13   :  { %111 = vst.msk [vmem:[%s302_s3 + $0x20] sm:$0xf] %vm102_vm0, %v94_v8  ;;  %v100_v16 = vpack.c.bf16 %v84_v11, %v84_v11  ;;  %v101_v17 = vpack.c.bf16 %v85_v14, %v85_v14 }
  0x14   :  { %112 = vst.msk [vmem:[%s302_s3 + $0x24] sm:$0xf] %vm102_vm0, %v95_v9 }
  0x15   :  { %113 = vst.msk [vmem:[%s302_s3 + $0x28] sm:$0xf] %vm102_vm0, %v96_v12 }
  0x16   :  { %114 = vst.msk [vmem:[%s302_s3 + $0x2c] sm:$0xf] %vm102_vm0, %v97_v13 }
  0x17   :  { %115 = vst.msk [vmem:[%s302_s3 + $0x30] sm:$0xf] %vm102_vm0, %v98_v2 }
  0x18   :  { %116 = vst.msk [vmem:[%s302_s3 + $0x34] sm:$0xf] %vm102_vm0, %v99_v15 }
  0x19   :  { %117 = vst.msk [vmem:[%s302_s3 + $0x38] sm:$0xf] %vm102_vm0, %v100_v16 }
  0x1a   :  { %118 = vst.msk [vmem:[%s302_s3 + $0x3c] sm:$0xf] %vm102_vm0, %v101_v17 }

// kernel: bottleneck_forward.8
= control target key start
LH: loop header
LB: loop body
LE: loop exit
PB: predicated region body
PF: predicated region fallthrough
CT: control target
= control target key end

     0   :  { %vm153_vm0 = vcmask 1041408   ;;  %vm19_vm1 = vcmask 31744   ;;  %v447_v3 = vmov 0.0   ;;  %vm128_vm2 = vcmask 293888   ;;  %s690_s1 = inlined_call_operand.vmem [shape: bf16[36,4], index: 1, kind: input, shape index: {}]   ;;  %s691_s0 = inlined_call_operand.vmem [shape: bf16[128,36], index: 0, kind: input, shape index: {}]   ;;  %s692_s2 = inlined_call_operand.vmem [shape: f32[128,4], index: 2, kind: output, shape index: {0}]   ;;  %s693_s3 = inlined_call_operand.vmem [shape: f32[1,1,4], index: 3, kind: output, shape index: {1}]   ;;  %s694_s4 = inlined_call_operand.vmem [shape: f32[1,1,4], index: 4, kind: output, shape index: {2}]  }
   0x1   :  { %v72_v0 = vld [vmem:[%s690_s1 + $0x10] sm:$0x3]  ;;  %20 = vst.msk [vmem:[#allocation2] sm:$0xff] %vm19_vm1, %v447_v3  ;;  %v436_v5 = vld [vmem:[%s690_s1 + $0x8] sm:$0xff]  ;;  %v435_v6 = vld [vmem:[%s690_s1] sm:$0xff]  ;;  %vm311_vm3 = vcmask 24576  }
   0x2   :  { %v122_v1 = vunpack.c.l.b16 %v72_v0  ;;  %21 = vst.msk [vmem:[#allocation2 + $0x8] sm:$0xff] %vm19_vm1, %v447_v3  ;;  %v427_v7 = vld [vmem:[%s691_s0] sm:$0xff]  ;;  %v429_v8 = vld [vmem:[%s691_s0 + $0x10] sm:$0xff]  ;;  %v428_v11 = vld [vmem:[%s691_s0 + $0x8] sm:$0xff] }
   0x3   :  { %22 = vst.msk [vmem:[#allocation2 + $0x10] sm:$0xff] %vm19_vm1, %v447_v3  ;;  %v431_v9 = vld [vmem:[%s691_s0 + $0x20] sm:$0xff]  ;;  %v433_v10 = vld [vmem:[%s691_s0 + $0x30] sm:$0xff]  ;;  %v430_v12 = vld [vmem:[%s691_s0 + $0x18] sm:$0xff] }
   0x4   :  { %v125_v2 = vpack.c.b16 %v122_v1, %v122_v1  ;;  %23 = vst.msk [vmem:[#allocation2 + $0x18] sm:$0xff] %vm19_vm1, %v447_v3  ;;  %v432_v13 = vld [vmem:[%s691_s0 + $0x28] sm:$0xff]  ;;  %v434_v14 = vld [vmem:[%s691_s0 + $0x38] sm:$0xff] }
   0x5   :  { %24 = vst.msk [vmem:[#allocation2 + $0x20] sm:$0xff] %vm19_vm1, %v447_v3 }
   0x6   :  { %v155_v4 = vsel %vm153_vm0, %v125_v2, 0  ;;  %25 = vst.msk [vmem:[#allocation2 + $0x28] sm:$0xff] %vm19_vm1, %v447_v3 }
   0x7   :  { %162 = vmatpush.bf16.msra.mxu0 %v155_v4  ;;  %437 = vmatpush.bf16.msra.mxu1 %v155_v4  ;;  %26 = vst.msk [vmem:[#allocation2 + $0x30] sm:$0xff] %vm19_vm1, %v447_v3 }
   0x8   :  { %438 = vmatpush.bf16.msra.mxu2 %v155_v4  ;;  %439 = vmatpush.bf16.msra.mxu3 %v155_v4  ;;  %27 = vst.msk [vmem:[#allocation2 + $0x38] sm:$0xff] %vm19_vm1, %v447_v3  ;;  %v36_v15 = vld [vmem:[#allocation2] sm:$0xff] }
   0x9   :  { %28 = vst.msk [vmem:[#allocation2 + $0x40] sm:$0xff] %vm19_vm1, %v447_v3  ;;  %v37_v22 = vld [vmem:[#allocation2 + $0x8] sm:$0xff] }
   0xa   :  { %29 = vst.msk [vmem:[#allocation2 + $0x48] sm:$0xff] %vm19_vm1, %v447_v3  ;;  %v38_v35 = vld [vmem:[#allocation2 + $0x10] sm:$0xff] }
   0xb   :  { %163 = vmatpush.bf16.msra.mxu0 %v436_v5  ;;  %440 = vmatpush.bf16.msra.mxu1 %v436_v5  ;;  %30 = vst.msk [vmem:[#allocation2 + $0x50] sm:$0xff] %vm19_vm1, %v447_v3  ;;  %v39_v52 = vld [vmem:[#allocation2 + $0x18] sm:$0xff] }
   0xc   :  { %441 = vmatpush.bf16.msra.mxu2 %v436_v5  ;;  %442 = vmatpush.bf16.msra.mxu3 %v436_v5  ;;  %31 = vst.msk [vmem:[#allocation2 + $0x58] sm:$0xff] %vm19_vm1, %v447_v3  ;;  %v40_v16 = vld [vmem:[#allocation2 + $0x20] sm:$0xff] }
   0xd   :  { %32 = vst.msk [vmem:[#allocation2 + $0x60] sm:$0xff] %vm19_vm1, %v447_v3  ;;  %v41_v23 = vld [vmem:[#allocation2 + $0x28] sm:$0xff] }
   0xe   :  { %33 = vst.msk [vmem:[#allocation2 + $0x68] sm:$0xff] %vm19_vm1, %v447_v3  ;;  %v42_v36 = vld [vmem:[#allocation2 + $0x30] sm:$0xff] }
   0xf   :  { %164 = vmatpush.bf16.msra.mxu0 %v435_v6  ;;  %443 = vmatpush.bf16.msra.mxu1 %v435_v6  ;;  %34 = vst.msk [vmem:[#allocation2 + $0x70] sm:$0xff] %vm19_vm1, %v447_v3  ;;  %v43_v53 = vld [vmem:[#allocation2 + $0x38] sm:$0xff] }
  0x10   :  { %444 = vmatpush.bf16.msra.mxu2 %v435_v6  ;;  %445 = vmatpush.bf16.msra.mxu3 %v435_v6  ;;  %35 = vst.msk [vmem:[#allocation2 + $0x78] sm:$0xff] %vm19_vm1, %v447_v3  ;;  %v44_v21 = vld [vmem:[#allocation2 + $0x40] sm:$0xff] }
  0x11   :  { %v45_v41 = vld [vmem:[#allocation2 + $0x48] sm:$0xff] }
  0x12   :  { %419 = vmatmul.msk.bf16.vlgmr.msra.gmra.mxu0 %vm128_vm2, %v427_v7  ;;  %421 = vmatmul.msk.bf16.vlgmr.msra.gmra.mxu1 %vm128_vm2, %v429_v8  ;;  %v46_v49 = vld [vmem:[#allocation2 + $0x50] sm:$0xff] }
  0x13   :  { %423 = vmatmul.msk.bf16.vlgmr.msra.gmra.mxu2 %vm128_vm2, %v431_v9  ;;  %425 = vmatmul.msk.bf16.vlgmr.msra.gmra.mxu3 %vm128_vm2, %v433_v10  ;;  %v47_v2 = vld [vmem:[#allocation2 + $0x58] sm:$0xff] }
  0x14   :  { %v48_v29 = vld [vmem:[#allocation2 + $0x60] sm:$0xff] }
  0x15   :  { %v49_v45 = vld [vmem:[#allocation2 + $0x68] sm:$0xff] }
  0x16   :  { %v50_v60 = vld [vmem:[#allocation2 + $0x70] sm:$0xff] }
  0x17   :  { %v51_v3 = vld [vmem:[#allocation2 + $0x78] sm:$0xff] }
  0x22   :  { %420 = vmatmul.msk.bf16.gmra.mxu0 %vm128_vm2, %v428_v11  ;;  %422 = vmatmul.msk.bf16.gmra.mxu1 %vm128_vm2, %v430_v12 }
  0x23   :  { %424 = vmatmul.msk.bf16.gmra.mxu2 %vm128_vm2, %v432_v13  ;;  %426 = vmatmul.msk.bf16.gmra.mxu3 %vm128_vm2, %v434_v14 }
  0x8f   :  { %v166_v17 = vpop.f32.mrf.mxu0  ;;  %v176_v18 = vpop.f32.mrf.mxu1 }
  0x90   :  { %v206_v19 = vadd.f32 %v166_v17, %v36_v15  ;;  %v210_v20 = vadd.f32 %v176_v18, %v40_v16 }
  0x92   :  { %223 = vst.msk [vmem:[#allocation2] sm:$0xff] %vm19_vm1, %v206_v19 }
  0x93   :  { %227 = vst.msk [vmem:[#allocation2 + $0x20] sm:$0xff] %vm19_vm1, %v210_v20 }
  0x96   :  { %v186_v24 = vpop.f32.mrf.mxu2  ;;  %v196_v25 = vpop.f32.mrf.mxu3 }
  0x97   :  { %v168_v26 = vpop.f32.mrf.mxu0  ;;  %v178_v27 = vpop.f32.mrf.mxu1  ;;  %v214_v28 = vadd.f32 %v186_v24, %v44_v21  ;;  %v218_v34 = vadd.f32 %v196_v25, %v48_v29 }
  0x98   :  { %v207_v30 = vadd.f32 %v168_v26, %v37_v22  ;;  %v211_v32 = vadd.f32 %v178_v27, %v41_v23 }
  0x99   :  { %v532_v31 = vld [vmem:[#allocation2] sm:$0xff]  ;;  %231 = vst.msk [vmem:[#allocation2 + $0x40] sm:$0xff] %vm19_vm1, %v214_v28 }
  0x9a   :  { %258 = vst.msk [vmem:[%s692_s2] sm:$0xff] %vm19_vm1, %v532_v31  ;;  %v540_v33 = vld [vmem:[#allocation2 + $0x20] sm:$0xff]  ;;  %v313_v5 = vmul.f32 %v532_v31, %v532_v31  ;;  %v274_v13 = vsel %vm19_vm1, %v532_v31, 0.0 }
  0x9b   :  { %262 = vst.msk [vmem:[%s692_s2 + $0x20] sm:$0xff] %vm19_vm1, %v540_v33  ;;  %v317_v23 = vmul.f32 %v540_v33, %v540_v33  ;;  %v281_v29 = vsel %vm19_vm1, %v540_v33, 0.0 }
  0x9c   :  { %224 = vst.msk [vmem:[#allocation2 + $0x8] sm:$0xff] %vm19_vm1, %v207_v30  ;;  %v329_v18 = vsel %vm19_vm1, %v313_v5, 0.0 }
  0x9d   :  { %228 = vst.msk [vmem:[#allocation2 + $0x28] sm:$0xff] %vm19_vm1, %v211_v32 }
  0x9e   :  { %v188_v37 = vpop.f32.mrf.mxu2  ;;  %235 = vst.msk [vmem:[#allocation2 + $0x60] sm:$0xff] %vm19_vm1, %v218_v34  ;;  %v198_v38 = vpop.f32.mrf.mxu3 }
  0x9f   :  { %v171_v39 = vpop.f32.mrf.mxu0  ;;  %v181_v40 = vpop.f32.mrf.mxu1  ;;  %v215_v46 = vadd.f32 %v188_v37, %v45_v41  ;;  %v219_v50 = vadd.f32 %v198_v38, %v49_v45 }
  0xa0   :  { %v550_v42 = vld [vmem:[#allocation2 + $0x40] sm:$0xff]  ;;  %v208_v43 = vadd.f32 %v171_v39, %v38_v35  ;;  %v212_v44 = vadd.f32 %v181_v40, %v42_v36  ;;  %v336_v36 = vsel %vm19_vm1, %v317_v23, 0.0 }
  0xa1   :  { %266 = vst.msk [vmem:[%s692_s2 + $0x40] sm:$0xff] %vm19_vm1, %v550_v42 }
  0xa2   :  { %225 = vst.msk [vmem:[#allocation2 + $0x10] sm:$0xff] %vm19_vm1, %v208_v43 }
  0xa3   :  { %v243_v47 = vld [vmem:[#allocation2 + $0x8] sm:$0xff]  ;;  %229 = vst.msk [vmem:[#allocation2 + $0x30] sm:$0xff] %vm19_vm1, %v212_v44 }
  0xa4   :  { %259 = vst.msk [vmem:[%s692_s2 + $0x8] sm:$0xff] %vm19_vm1, %v243_v47  ;;  %v563_v48 = vld [vmem:[#allocation2 + $0x28] sm:$0xff]  ;;  %v314_v1 = vmul.f32 %v243_v47, %v243_v47  ;;  %v275_v6 = vsel %vm19_vm1, %v243_v47, 0.0 }
  0xa5   :  { %263 = vst.msk [vmem:[%s692_s2 + $0x28] sm:$0xff] %vm19_vm1, %v563_v48  ;;  %v570_v51 = vld [vmem:[#allocation2 + $0x60] sm:$0xff]  ;;  %v276_v17 = vadd.f32 %v275_v6, %v274_v13  ;;  %v318_v30 = vmul.f32 %v563_v48, %v563_v48  ;;  %v283_v37 = vsel %vm19_vm1, %v563_v48, 0.0  ;;  %v321_v48 = vmul.f32 %v550_v42, %v550_v42 }
  0xa6   :  { %232 = vst.msk [vmem:[#allocation2 + $0x48] sm:$0xff] %vm19_vm1, %v215_v46  ;;  %v191_v54 = vpop.f32.mrf.mxu2  ;;  %v201_v55 = vpop.f32.mrf.mxu3  ;;  %v330_v14 = vsel %vm19_vm1, %v314_v1, 0.0  ;;  %v325_v5 = vmul.f32 %v570_v51, %v570_v51 }
  0xa7   :  { %270 = vst.msk [vmem:[%s692_s2 + $0x60] sm:$0xff] %vm19_vm1, %v570_v51  ;;  %v173_v56 = vpop.f32.mrf.mxu0  ;;  %v183_v57 = vpop.f32.mrf.mxu1  ;;  %v216_v58 = vadd.f32 %v191_v54, %v46_v49  ;;  %v220_v0 = vadd.f32 %v201_v55, %v50_v60  ;;  %v331_v20 = vadd.f32 %v330_v14, %v329_v18  ;;  %v338_v41 = vsel %vm19_vm1, %v318_v30, 0.0 }
  0xa8   :  { %v209_v59 = vadd.f32 %v173_v56, %v39_v52  ;;  %236 = vst.msk [vmem:[#allocation2 + $0x68] sm:$0xff] %vm19_vm1, %v219_v50  ;;  %v213_v62 = vadd.f32 %v183_v57, %v43_v53  ;;  %v289_v54 = vsel %vm19_vm1, %v550_v42, 0.0 }
  0xa9   :  { %v244_v61 = vld [vmem:[#allocation2 + $0x10] sm:$0xff]  ;;  %233 = vst.msk [vmem:[#allocation2 + $0x50] sm:$0xff] %vm19_vm1, %v216_v58 }
  0xaa   :  { %260 = vst.msk [vmem:[%s692_s2 + $0x10] sm:$0xff] %vm19_vm1, %v244_v61  ;;  %v248_v63 = vld [vmem:[#allocation2 + $0x30] sm:$0xff]  ;;  %v315_v7 = vmul.f32 %v244_v61, %v244_v61  ;;  %v277_v15 = vsel %vm19_vm1, %v244_v61, 0.0 }
  0xab   :  { %264 = vst.msk [vmem:[%s692_s2 + $0x30] sm:$0xff] %vm19_vm1, %v248_v63  ;;  %v278_v21 = vadd.f32 %v277_v15, %v276_v17  ;;  %v319_v38 = vmul.f32 %v248_v63, %v248_v63  ;;  %v285_v43 = vsel %vm19_vm1, %v248_v63, 0.0  ;;  %v352_v15 = vsel %vm19_vm1, %v325_v5, 0.0 }
  0xac   :  { %226 = vst.msk [vmem:[#allocation2 + $0x18] sm:$0xff] %vm19_vm1, %v209_v59  ;;  %v332_v19 = vsel %vm19_vm1, %v315_v7, 0.0  ;;  %v344_v59 = vsel %vm19_vm1, %v321_v48, 0.0 }
  0xad   :  { %v589_v4 = vld [vmem:[#allocation2 + $0x48] sm:$0xff]  ;;  %230 = vst.msk [vmem:[#allocation2 + $0x38] sm:$0xff] %vm19_vm1, %v213_v62  ;;  %v333_v27 = vadd.f32 %v332_v19, %v331_v20  ;;  %v340_v49 = vsel %vm19_vm1, %v319_v38, 0.0 }
  0xae   :  { %267 = vst.msk [vmem:[%s692_s2 + $0x48] sm:$0xff] %vm19_vm1, %v589_v4  ;;  %v193_v8 = vpop.f32.mrf.mxu2  ;;  %v203_v9 = vpop.f32.mrf.mxu3  ;;  %v322_v55 = vmul.f32 %v589_v4, %v589_v4  ;;  %v291_v60 = vsel %vm19_vm1, %v589_v4, 0.0  ;;  %v297_v4 = vsel %vm19_vm1, %v570_v51, 0.0 }
  0xaf   :  { %v600_v10 = vld [vmem:[#allocation2 + $0x68] sm:$0xff]  ;;  %v217_v11 = vadd.f32 %v193_v8, %v47_v2  ;;  %237 = vst.msk [vmem:[#allocation2 + $0x70] sm:$0xff] %vm19_vm1, %v220_v0  ;;  %v221_v12 = vadd.f32 %v203_v9, %v51_v3 }
  0xb0   :  { %v252_v16 = vld [vmem:[#allocation2 + $0x50] sm:$0xff]  ;;  %271 = vst.msk [vmem:[%s692_s2 + $0x68] sm:$0xff] %vm19_vm1, %v600_v10  ;;  %v346_v0 = vsel %vm19_vm1, %v322_v55, 0.0 }
  0xb1   :  { %268 = vst.msk [vmem:[%s692_s2 + $0x50] sm:$0xff] %vm19_vm1, %v252_v16  ;;  %v323_v61 = vmul.f32 %v252_v16, %v252_v16  ;;  %v293_v1 = vsel %vm19_vm1, %v252_v16, 0.0  ;;  %v299_v16 = vsel %vm19_vm1, %v600_v10, 0.0 }
  0xb2   :  { %234 = vst.msk [vmem:[#allocation2 + $0x58] sm:$0xff] %vm19_vm1, %v217_v11  ;;  %v326_v11 = vmul.f32 %v600_v10, %v600_v10 }
  0xb3   :  { %v245_v22 = vld [vmem:[#allocation2 + $0x18] sm:$0xff]  ;;  %238 = vst.msk [vmem:[#allocation2 + $0x78] sm:$0xff] %vm19_vm1, %v221_v12  ;;  %v348_v6 = vsel %vm19_vm1, %v323_v61, 0.0 }
  0xb4   :  { %261 = vst.msk [vmem:[%s692_s2 + $0x18] sm:$0xff] %vm19_vm1, %v245_v22  ;;  %v279_v24 = vsel %vm19_vm1, %v245_v22, 0.0  ;;  %v316_v25 = vmul.f32 %v245_v22, %v245_v22  ;;  %v249_v26 = vld [vmem:[#allocation2 + $0x38] sm:$0xff]  ;;  %v354_v20 = vsel %vm19_vm1, %v326_v11, 0.0 }
  0xb5   :  { %v280_v28 = vadd.f32 %v279_v24, %v278_v21  ;;  %265 = vst.msk [vmem:[%s692_s2 + $0x38] sm:$0xff] %vm19_vm1, %v249_v26  ;;  %v320_v44 = vmul.f32 %v249_v26, %v249_v26  ;;  %v287_v50 = vsel %vm19_vm1, %v249_v26, 0.0 }
  0xb6   :  { %v334_v31 = vsel %vm19_vm1, %v316_v25, 0.0  ;;  %v256_v32 = vld [vmem:[#allocation2 + $0x70] sm:$0xff] }
  0xb7   :  { %v282_v34 = vadd.f32 %v281_v29, %v280_v28  ;;  %v335_v35 = vadd.f32 %v334_v31, %v333_v27  ;;  %272 = vst.msk [vmem:[%s692_s2 + $0x70] sm:$0xff] %vm19_vm1, %v256_v32  ;;  %v342_v56 = vsel %vm19_vm1, %v320_v44, 0.0  ;;  %v327_v17 = vmul.f32 %v256_v32, %v256_v32 }
  0xb8   :  { %v301_v21 = vsel %vm19_vm1, %v256_v32, 0.0 }
  0xb9   :  { %v337_v33 = vadd.f32 %v336_v36, %v335_v35  ;;  %v284_v39 = vadd.f32 %v283_v37, %v282_v34  ;;  %v253_v40 = vld [vmem:[#allocation2 + $0x58] sm:$0xff]  ;;  %v356_v24 = vsel %vm19_vm1, %v327_v17, 0.0 }
  0xba   :  { %269 = vst.msk [vmem:[%s692_s2 + $0x58] sm:$0xff] %vm19_vm1, %v253_v40  ;;  %v257_v45 = vld [vmem:[#allocation2 + $0x78] sm:$0xff]  ;;  %v324_v42 = vmul.f32 %v253_v40, %v253_v40  ;;  %v295_v7 = vsel %vm19_vm1, %v253_v40, 0.0 }
  0xbb   :  { %v286_v46 = vadd.f32 %v285_v43, %v284_v39  ;;  %v339_v47 = vadd.f32 %v338_v41, %v337_v33  ;;  %273 = vst.msk [vmem:[%s692_s2 + $0x78] sm:$0xff] %vm19_vm1, %v257_v45  ;;  %v328_v51 = vmul.f32 %v257_v45, %v257_v45  ;;  %v303_v25 = vsel %vm19_vm1, %v257_v45, 0.0 }
  0xbc   :  { %v350_v12 = vsel %vm19_vm1, %v324_v42, 0.0 }
  0xbd   :  { %v288_v52 = vadd.f32 %v287_v50, %v286_v46  ;;  %v341_v53 = vadd.f32 %v340_v49, %v339_v47  ;;  %v358_v28 = vsel %vm19_vm1, %v328_v51, 0.0 }
  0xbf   :  { %v290_v57 = vadd.f32 %v289_v54, %v288_v52  ;;  %v343_v58 = vadd.f32 %v342_v56, %v341_v53 }
  0xc1   :  { %v345_v62 = vadd.f32 %v344_v59, %v343_v58  ;;  %v292_v63 = vadd.f32 %v291_v60, %v290_v57 }
  0xc3   :  { %v294_v2 = vadd.f32 %v293_v1, %v292_v63  ;;  %v347_v3 = vadd.f32 %v346_v0, %v345_v62 }
  0xc5   :  { %v349_v8 = vadd.f32 %v348_v6, %v347_v3  ;;  %v296_v9 = vadd.f32 %v295_v7, %v294_v2 }
  0xc7   :  { %v298_v13 = vadd.f32 %v297_v4, %v296_v9  ;;  %v351_v14 = vadd.f32 %v350_v12, %v349_v8 }
  0xc9   :  { %v353_v18 = vadd.f32 %v352_v15, %v351_v14  ;;  %v300_v19 = vadd.f32 %v299_v16, %v298_v13 }
  0xcb   :  { %v302_v22 = vadd.f32 %v301_v21, %v300_v19  ;;  %v355_v23 = vadd.f32 %v354_v20, %v353_v18 }
  0xcd   :  { %v357_v26 = vadd.f32 %v356_v24, %v355_v23  ;;  %v304_v27 = vadd.f32 %v303_v25, %v302_v22 }
  0xcf   :  { %v305_v29 = vrot.slane %v304_v27, 4  ;;  %v359_v10 = vadd.f32 %v358_v28, %v357_v26 }
  0xd1   :  { %v306_v30 = vadd.f32 %v305_v29, %v304_v27  ;;  %v360_v31 = vrot.slane %v359_v10, 4 }
  0xd3   :  { %v307_v34 = vrot.slane %v306_v30, 2  ;;  %v361_v35 = vadd.f32 %v360_v31, %v359_v10 }
  0xd5   :  { %v308_v36 = vadd.f32 %v307_v34, %v306_v30  ;;  %v362_v37 = vrot.slane %v361_v35, 2 }
  0xd7   :  { %v309_v32 = vrot.slane %v308_v36, 1  ;;  %v363_v38 = vadd.f32 %v362_v37, %v361_v35 }
  0xd9   :  { %v310_v33 = vadd.f32 %v309_v32, %v308_v36  ;;  %v364_v39 = vrot.slane %v363_v38, 1 }
  0xdb   :  { %312 = vst.msk [vmem:[%s693_s3] sm:$0x1] %vm311_vm3, %v310_v33  ;;  %v365_v40 = vadd.f32 %v364_v39, %v363_v38 }
  0xdd   :  { %366 = vst.msk [vmem:[%s694_s4] sm:$0x1] %vm311_vm3, %v365_v40 }

// kernel: bottleneck_forward.10
= control target key start
LH: loop header
LB: loop body
LE: loop exit
PB: predicated region body
PF: predicated region fallthrough
CT: control target
= control target key end

     0   :  { %vm106_vm0 = vcmask 1041408   ;;  %vm81_vm1 = vcmask 31744   ;;  %vm292_vm2 = vcmask 130048   ;;  %vm362_vm3 = vcmask 122880   ;;  %s1082_s1 = inlined_call_operand.vmem [shape: bf16[4,16], index: 1, kind: input, shape index: {}]   ;;  %s1083_s3 = inlined_call_operand.vmem [shape: bf16[4,16], index: 3, kind: input, shape index: {}]   ;;  %s1084_s0 = inlined_call_operand.vmem [shape: bf16[128,4], index: 0, kind: input, shape index: {}]   ;;  %s1085_s2 = inlined_call_operand.vmem [shape: bf16[128,4], index: 2, kind: input, shape index: {}]   ;;  %s1086_s4 = inlined_call_operand.vmem [shape: f32[128,16], index: 4, kind: output, shape index: {0}]   ;;  %s1087_s5 = inlined_call_operand.vmem [shape: f32[128,16], index: 5, kind: output, shape index: {1}]   ;;  %s1088_s6 = inlined_call_operand.vmem [shape: f32[1,1,16], index: 6, kind: output, shape index: {2}]   ;;  %s1089_s8 = inlined_call_operand.vmem [shape: f32[1,1,16], index: 8, kind: output, shape index: {4}]   ;;  %s1090_s7 = inlined_call_operand.vmem [shape: f32[1,1,16], index: 7, kind: output, shape index: {3}]   ;;  %s1091_s9 = inlined_call_operand.vmem [shape: f32[1,1,16], index: 9, kind: output, shape index: {5}]  }
   0x1   :  { %v40_v0 = vld [vmem:[%s1082_s1] sm:$0x3]  ;;  %v615_v8 = vld [vmem:[%s1084_s0 + $0x8] sm:$0xff]  ;;  %v616_v12 = vld [vmem:[%s1084_s0 + $0x10] sm:$0xff] }
   0x2   :  { %v175_v1 = vld [vmem:[%s1083_s3] sm:$0x3]  ;;  %v108_v2 = vsel %vm106_vm0, %v40_v0, 0  ;;  %v623_v9 = vld [vmem:[%s1085_s2 + $0x8] sm:$0xff]  ;;  %v624_v13 = vld [vmem:[%s1085_s2 + $0x10] sm:$0xff] }
   0x3   :  { %v241_v3 = vsel %vm106_vm0, %v175_v1, 0  ;;  %v614_v4 = vld [vmem:[%s1084_s0] sm:$0xff]  ;;  %117 = vmatpush.bf16.msra.mxu0 %v108_v2  ;;  %630 = vmatpush.bf16.msra.mxu2 %v108_v2  ;;  %v619_v10 = vld [vmem:[%s1084_s0 + $0x28] sm:$0xff]  ;;  %v620_v14 = vld [vmem:[%s1084_s0 + $0x30] sm:$0xff] }
   0x4   :  { %v622_v5 = vld [vmem:[%s1085_s2] sm:$0xff]  ;;  %250 = vmatpush.bf16.msra.mxu1 %v241_v3  ;;  %631 = vmatpush.bf16.msra.mxu3 %v241_v3  ;;  %v627_v11 = vld [vmem:[%s1085_s2 + $0x28] sm:$0xff]  ;;  %v628_v15 = vld [vmem:[%s1085_s2 + $0x30] sm:$0xff] }
   0x5   :  { %v618_v6 = vld [vmem:[%s1084_s0 + $0x20] sm:$0xff]  ;;  %v617_v16 = vld [vmem:[%s1084_s0 + $0x18] sm:$0xff] }
   0x6   :  { %v626_v7 = vld [vmem:[%s1085_s2 + $0x20] sm:$0xff]  ;;  %566 = vmatmul.msk.bf16.vlgmr.msra.gmra.mxu0 %vm81_vm1, %v614_v4  ;;  %570 = vmatmul.msk.bf16.vlgmr.msra.gmra.mxu2 %vm81_vm1, %v618_v6  ;;  %v625_v17 = vld [vmem:[%s1085_s2 + $0x18] sm:$0xff] }
   0x7   :  { %606 = vmatmul.msk.bf16.vlgmr.msra.gmra.mxu1 %vm81_vm1, %v622_v5  ;;  %610 = vmatmul.msk.bf16.vlgmr.msra.gmra.mxu3 %vm81_vm1, %v626_v7  ;;  %v621_v18 = vld [vmem:[%s1084_s0 + $0x38] sm:$0xff] }
   0x8   :  { %v629_v19 = vld [vmem:[%s1085_s2 + $0x38] sm:$0xff] }
  0x16   :  { %567 = vmatmul.msk.bf16.gmra.mxu0 %vm81_vm1, %v615_v8  ;;  %571 = vmatmul.msk.bf16.gmra.mxu2 %vm81_vm1, %v619_v10 }
  0x17   :  { %607 = vmatmul.msk.bf16.gmra.mxu1 %vm81_vm1, %v623_v9  ;;  %611 = vmatmul.msk.bf16.gmra.mxu3 %vm81_vm1, %v627_v11 }
  0x26   :  { %568 = vmatmul.msk.bf16.gmra.mxu0 %vm81_vm1, %v616_v12  ;;  %572 = vmatmul.msk.bf16.gmra.mxu2 %vm81_vm1, %v620_v14 }
  0x27   :  { %608 = vmatmul.msk.bf16.gmra.mxu1 %vm81_vm1, %v624_v13  ;;  %612 = vmatmul.msk.bf16.gmra.mxu3 %vm81_vm1, %v628_v15 }
  0x36   :  { %569 = vmatmul.msk.bf16.gmra.mxu0 %vm81_vm1, %v617_v16  ;;  %573 = vmatmul.msk.bf16.gmra.mxu2 %vm81_vm1, %v621_v18 }
  0x37   :  { %609 = vmatmul.msk.bf16.gmra.mxu1 %vm81_vm1, %v625_v17  ;;  %613 = vmatmul.msk.bf16.gmra.mxu3 %vm81_vm1, %v629_v19 }
  0x83   :  { %v119_v20 = vpop.f32.mrf.mxu0 }
  0x84   :  { %v252_v21 = vpop.f32.mrf.mxu1  ;;  %293 = vst.msk [vmem:[%s1086_s4] sm:$0xff] %vm292_vm2, %v119_v20  ;;  %v364_v38 = vmul.f32 %v119_v20, %v119_v20  ;;  %v325_v42 = vsel %vm292_vm2, %v119_v20, 0.0 }
  0x85   :  { %309 = vst.msk [vmem:[%s1087_s5] sm:$0xff] %vm292_vm2, %v252_v21  ;;  %v456_v39 = vmul.f32 %v252_v21, %v252_v21  ;;  %v418_v43 = vsel %vm292_vm2, %v252_v21, 0.0 }
  0x86   :  { %v380_v46 = vsel %vm292_vm2, %v364_v38, 0.0 }
  0x87   :  { %v472_v47 = vsel %vm292_vm2, %v456_v39, 0.0 }
  0x89   :  { %v139_v22 = vpop.f32.mrf.mxu2 }
  0x8a   :  { %v272_v23 = vpop.f32.mrf.mxu3  ;;  %301 = vst.msk [vmem:[%s1086_s4 + $0x40] sm:$0xff] %vm292_vm2, %v139_v22  ;;  %v372_v45 = vmul.f32 %v139_v22, %v139_v22  ;;  %v872_v59 = vsel %vm292_vm2, %v139_v22, 0.0 }
  0x8b   :  { %v121_v24 = vpop.f32.mrf.mxu0  ;;  %317 = vst.msk [vmem:[%s1087_s5 + $0x40] sm:$0xff] %vm292_vm2, %v272_v23  ;;  %v464_v49 = vmul.f32 %v272_v23, %v272_v23  ;;  %v875_v60 = vsel %vm292_vm2, %v272_v23, 0.0 }
  0x8c   :  { %v254_v25 = vpop.f32.mrf.mxu1  ;;  %294 = vst.msk [vmem:[%s1086_s4 + $0x8] sm:$0xff] %vm292_vm2, %v121_v24  ;;  %v365_v40 = vmul.f32 %v121_v24, %v121_v24  ;;  %v326_v44 = vsel %vm292_vm2, %v121_v24, 0.0  ;;  %v884_v62 = vsel %vm292_vm2, %v372_v45, 0.0 }
  0x8d   :  { %310 = vst.msk [vmem:[%s1087_s5 + $0x8] sm:$0xff] %vm292_vm2, %v254_v25  ;;  %v457_v41 = vmul.f32 %v254_v25, %v254_v25  ;;  %v419_v48 = vsel %vm292_vm2, %v254_v25, 0.0  ;;  %v327_v58 = vadd.f32 %v326_v44, %v325_v42  ;;  %v894_v4 = vsel %vm292_vm2, %v464_v49, 0.0 }
  0x8e   :  { %v381_v52 = vsel %vm292_vm2, %v365_v40, 0.0  ;;  %v420_v63 = vadd.f32 %v419_v48, %v418_v43 }
  0x8f   :  { %v473_v53 = vsel %vm292_vm2, %v457_v41, 0.0  ;;  %v382_v2 = vadd.f32 %v381_v52, %v380_v46 }
  0x90   :  { %v474_v3 = vadd.f32 %v473_v53, %v472_v47 }
  0x91   :  { %v776_v26 = vpop.f32.mrf.mxu2 }
  0x92   :  { %v778_v27 = vpop.f32.mrf.mxu3  ;;  %302 = vst.msk [vmem:[%s1086_s4 + $0x48] sm:$0xff] %vm292_vm2, %v776_v26  ;;  %v373_v61 = vmul.f32 %v776_v26, %v776_v26  ;;  %v910_v11 = vsel %vm292_vm2, %v776_v26, 0.0 }
  0x93   :  { %v124_v28 = vpop.f32.mrf.mxu0  ;;  %318 = vst.msk [vmem:[%s1087_s5 + $0x48] sm:$0xff] %vm292_vm2, %v778_v27  ;;  %v465_v1 = vmul.f32 %v778_v27, %v778_v27  ;;  %v917_v13 = vsel %vm292_vm2, %v778_v27, 0.0 }
  0x94   :  { %v257_v29 = vpop.f32.mrf.mxu1  ;;  %295 = vst.msk [vmem:[%s1086_s4 + $0x10] sm:$0xff] %vm292_vm2, %v124_v28  ;;  %v366_v54 = vmul.f32 %v124_v28, %v124_v28  ;;  %v328_v0 = vsel %vm292_vm2, %v124_v28, 0.0  ;;  %v913_v12 = vsel %vm292_vm2, %v373_v61, 0.0 }
  0x95   :  { %311 = vst.msk [vmem:[%s1087_s5 + $0x10] sm:$0xff] %vm292_vm2, %v257_v29  ;;  %v458_v55 = vmul.f32 %v257_v29, %v257_v29  ;;  %v421_v5 = vsel %vm292_vm2, %v257_v29, 0.0  ;;  %v329_v10 = vadd.f32 %v328_v0, %v327_v58  ;;  %v920_v15 = vsel %vm292_vm2, %v465_v1, 0.0 }
  0x96   :  { %v383_v6 = vsel %vm292_vm2, %v366_v54, 0.0  ;;  %v422_v14 = vadd.f32 %v421_v5, %v420_v63 }
  0x97   :  { %v475_v7 = vsel %vm292_vm2, %v458_v55, 0.0  ;;  %v384_v18 = vadd.f32 %v383_v6, %v382_v2 }
  0x98   :  { %v476_v19 = vadd.f32 %v475_v7, %v474_v3 }
  0x99   :  { %v798_v30 = vpop.f32.mrf.mxu2 }
  0x9a   :  { %v800_v31 = vpop.f32.mrf.mxu3  ;;  %303 = vst.msk [vmem:[%s1086_s4 + $0x50] sm:$0xff] %vm292_vm2, %v798_v30  ;;  %v937_v25 = vsel %vm292_vm2, %v798_v30, 0.0  ;;  %v941_v26 = vmul.f32 %v798_v30, %v798_v30 }
  0x9b   :  { %v802_v32 = vpop.f32.mrf.mxu0  ;;  %319 = vst.msk [vmem:[%s1087_s5 + $0x50] sm:$0xff] %vm292_vm2, %v800_v31  ;;  %v437_v61 = vsel %vm292_vm2, %v800_v31, 0.0  ;;  %v466_v63 = vmul.f32 %v800_v31, %v800_v31 }
  0x9c   :  { %v809_v33 = vpop.f32.mrf.mxu1  ;;  %296 = vst.msk [vmem:[%s1086_s4 + $0x18] sm:$0xff] %vm292_vm2, %v802_v32  ;;  %v367_v8 = vmul.f32 %v802_v32, %v802_v32  ;;  %v330_v20 = vsel %vm292_vm2, %v802_v32, 0.0 }
  0x9d   :  { %312 = vst.msk [vmem:[%s1087_s5 + $0x18] sm:$0xff] %vm292_vm2, %v809_v33  ;;  %v459_v9 = vmul.f32 %v809_v33, %v809_v33  ;;  %v423_v21 = vsel %vm292_vm2, %v809_v33, 0.0  ;;  %v331_v30 = vadd.f32 %v330_v20, %v329_v10 }
  0x9e   :  { %v385_v24 = vsel %vm292_vm2, %v367_v8, 0.0  ;;  %v424_v40 = vadd.f32 %v423_v21, %v422_v14 }
  0x9f   :  { %v477_v27 = vsel %vm292_vm2, %v459_v9, 0.0  ;;  %v386_v45 = vadd.f32 %v385_v24, %v384_v18 }
  0xa0   :  { %v478_v46 = vadd.f32 %v477_v27, %v476_v19 }
  0xa1   :  { %v826_v34 = vpop.f32.mrf.mxu2 }
  0xa2   :  { %v828_v35 = vpop.f32.mrf.mxu3  ;;  %304 = vst.msk [vmem:[%s1086_s4 + $0x58] sm:$0xff] %vm292_vm2, %v826_v34  ;;  %v375_v24 = vmul.f32 %v826_v34, %v826_v34 }
  0xa3   :  { %v830_v36 = vpop.f32.mrf.mxu0  ;;  %320 = vst.msk [vmem:[%s1087_s5 + $0x58] sm:$0xff] %vm292_vm2, %v828_v35  ;;  %v467_v27 = vmul.f32 %v828_v35, %v828_v35 }
  0xa4   :  { %v837_v37 = vpop.f32.mrf.mxu1  ;;  %297 = vst.msk [vmem:[%s1086_s4 + $0x20] sm:$0xff] %vm292_vm2, %v830_v36  ;;  %v368_v16 = vmul.f32 %v830_v36, %v830_v36  ;;  %v332_v32 = vsel %vm292_vm2, %v830_v36, 0.0 }
  0xa5   :  { %313 = vst.msk [vmem:[%s1087_s5 + $0x20] sm:$0xff] %vm292_vm2, %v837_v37  ;;  %v460_v17 = vmul.f32 %v837_v37, %v837_v37  ;;  %v425_v33 = vsel %vm292_vm2, %v837_v37, 0.0  ;;  %v333_v47 = vadd.f32 %v332_v32, %v331_v30  ;;  %v399_v30 = vsel %vm292_vm2, %v941_v26, 0.0 }
  0xa6   :  { %v387_v41 = vsel %vm292_vm2, %v368_v16, 0.0  ;;  %v426_v48 = vadd.f32 %v425_v33, %v424_v40  ;;  %v491_v40 = vsel %vm292_vm2, %v466_v63, 0.0  ;;  %v493_v26 = vsel %vm292_vm2, %v467_v27, 0.0 }
  0xa7   :  { %v479_v42 = vsel %vm292_vm2, %v460_v17, 0.0  ;;  %v388_v55 = vadd.f32 %v387_v41, %v386_v45  ;;  %v346_v41 = vsel %vm292_vm2, %v826_v34, 0.0 }
  0xa9   :  { %v860_v50 = vpop.f32.mrf.mxu2 }
  0xaa   :  { %v862_v51 = vpop.f32.mrf.mxu3  ;;  %305 = vst.msk [vmem:[%s1086_s4 + $0x60] sm:$0xff] %vm292_vm2, %v860_v50 }
  0xab   :  { %v131_v56 = vpop.f32.mrf.mxu0  ;;  %321 = vst.msk [vmem:[%s1087_s5 + $0x60] sm:$0xff] %vm292_vm2, %v862_v51  ;;  %v468_v34 = vmul.f32 %v862_v51, %v862_v51 }
  0xac   :  { %v264_v57 = vpop.f32.mrf.mxu1  ;;  %298 = vst.msk [vmem:[%s1086_s4 + $0x28] sm:$0xff] %vm292_vm2, %v131_v56  ;;  %v369_v38 = vmul.f32 %v131_v56, %v131_v56  ;;  %v334_v36 = vsel %vm292_vm2, %v131_v56, 0.0  ;;  %v480_v56 = vadd.f32 %v479_v42, %v478_v46  ;;  %v439_v42 = vsel %vm292_vm2, %v828_v35, 0.0 }
  0xad   :  { %314 = vst.msk [vmem:[%s1087_s5 + $0x28] sm:$0xff] %vm292_vm2, %v264_v57  ;;  %v461_v39 = vmul.f32 %v264_v57, %v264_v57  ;;  %v427_v37 = vsel %vm292_vm2, %v264_v57, 0.0  ;;  %v335_v57 = vadd.f32 %v334_v36, %v333_v47  ;;  %v441_v47 = vsel %vm292_vm2, %v862_v51, 0.0 }
  0xae   :  { %v389_v49 = vsel %vm292_vm2, %v369_v38, 0.0  ;;  %v428_v58 = vadd.f32 %v427_v37, %v426_v48 }
  0xaf   :  { %v481_v52 = vsel %vm292_vm2, %v461_v39, 0.0  ;;  %v390_v5 = vadd.f32 %v389_v49, %v388_v55 }
  0xb0   :  { %v482_v6 = vadd.f32 %v481_v52, %v480_v56 }
  0xb1   :  { %v930_v22 = vpop.f32.mrf.mxu2 }
  0xb2   :  { %v932_v23 = vpop.f32.mrf.mxu3  ;;  %306 = vst.msk [vmem:[%s1086_s4 + $0x68] sm:$0xff] %vm292_vm2, %v930_v22  ;;  %v377_v48 = vmul.f32 %v930_v22, %v930_v22  ;;  %v350_v51 = vsel %vm292_vm2, %v930_v22, 0.0 }
  0xb3   :  { %v134_v28 = vpop.f32.mrf.mxu0  ;;  %322 = vst.msk [vmem:[%s1087_s5 + $0x68] sm:$0xff] %vm292_vm2, %v932_v23 }
  0xb4   :  { %v267_v29 = vpop.f32.mrf.mxu1  ;;  %299 = vst.msk [vmem:[%s1086_s4 + $0x30] sm:$0xff] %vm292_vm2, %v134_v28  ;;  %v370_v43 = vmul.f32 %v134_v28, %v134_v28  ;;  %v336_v53 = vsel %vm292_vm2, %v134_v28, 0.0 }
  0xb5   :  { %315 = vst.msk [vmem:[%s1087_s5 + $0x30] sm:$0xff] %vm292_vm2, %v267_v29  ;;  %v462_v44 = vmul.f32 %v267_v29, %v267_v29  ;;  %v429_v54 = vsel %vm292_vm2, %v267_v29, 0.0  ;;  %v337_v7 = vadd.f32 %v336_v53, %v335_v57  ;;  %v495_v53 = vsel %vm292_vm2, %v468_v34, 0.0 }
  0xb6   :  { %v391_v0 = vsel %vm292_vm2, %v370_v43, 0.0  ;;  %v430_v8 = vadd.f32 %v429_v54, %v428_v58  ;;  %v401_v43 = vsel %vm292_vm2, %v375_v24, 0.0  ;;  %v443_v54 = vsel %vm292_vm2, %v932_v23, 0.0 }
  0xb7   :  { %v483_v1 = vsel %vm292_vm2, %v462_v44, 0.0  ;;  %v392_v18 = vadd.f32 %v391_v0, %v390_v5  ;;  %v376_v44 = vmul.f32 %v860_v50, %v860_v50 }
  0xb8   :  { %v484_v19 = vadd.f32 %v483_v1, %v482_v6 }
  0xb9   :  { %v980_v2 = vpop.f32.mrf.mxu2 }
  0xba   :  { %v982_v3 = vpop.f32.mrf.mxu3  ;;  %307 = vst.msk [vmem:[%s1086_s4 + $0x70] sm:$0xff] %vm292_vm2, %v980_v2  ;;  %v378_v0 = vmul.f32 %v980_v2, %v980_v2 }
  0xbb   :  { %v136_v9 = vpop.f32.mrf.mxu0  ;;  %323 = vst.msk [vmem:[%s1087_s5 + $0x70] sm:$0xff] %vm292_vm2, %v982_v3  ;;  %v470_v1 = vmul.f32 %v982_v3, %v982_v3 }
  0xbc   :  { %v269_v31 = vpop.f32.mrf.mxu1  ;;  %300 = vst.msk [vmem:[%s1086_s4 + $0x38] sm:$0xff] %vm292_vm2, %v136_v9  ;;  %v338_v10 = vsel %vm292_vm2, %v136_v9, 0.0  ;;  %v371_v14 = vmul.f32 %v136_v9, %v136_v9 }
  0xbd   :  { %v431_v16 = vsel %vm292_vm2, %v269_v31, 0.0  ;;  %v463_v17 = vmul.f32 %v269_v31, %v269_v31  ;;  %v339_v20 = vadd.f32 %v338_v10, %v337_v7  ;;  %316 = vst.msk [vmem:[%s1087_s5 + $0x38] sm:$0xff] %vm292_vm2, %v269_v31 }
  0xbe   :  { %v432_v21 = vadd.f32 %v431_v16, %v430_v8  ;;  %v393_v28 = vsel %vm292_vm2, %v371_v14, 0.0  ;;  %v445_v8 = vsel %vm292_vm2, %v982_v3, 0.0 }
  0xbf   :  { %v485_v29 = vsel %vm292_vm2, %v463_v17, 0.0  ;;  %v341_v32 = vadd.f32 %v872_v59, %v339_v20  ;;  %v394_v33 = vadd.f32 %v393_v28, %v392_v18  ;;  %v407_v18 = vsel %vm292_vm2, %v378_v0, 0.0 }
  0xc0   :  { %v434_v38 = vadd.f32 %v875_v60, %v432_v21  ;;  %v486_v39 = vadd.f32 %v485_v29, %v484_v19  ;;  %v499_v19 = vsel %vm292_vm2, %v470_v1, 0.0 }
  0xc1   :  { %v343_v36 = vadd.f32 %v910_v11, %v341_v32  ;;  %v396_v37 = vadd.f32 %v884_v62, %v394_v33  ;;  %v156_v45 = vpop.f32.mrf.mxu2 }
  0xc2   :  { %v436_v59 = vadd.f32 %v917_v13, %v434_v38  ;;  %v488_v60 = vadd.f32 %v894_v4, %v486_v39  ;;  %v289_v35 = vpop.f32.mrf.mxu3  ;;  %308 = vst.msk [vmem:[%s1086_s4 + $0x78] sm:$0xff] %vm292_vm2, %v156_v45  ;;  %v348_v4 = vsel %vm292_vm2, %v860_v50, 0.0  ;;  %v403_v50 = vsel %vm292_vm2, %v376_v44, 0.0 }
  0xc3   :  { %v345_v11 = vadd.f32 %v937_v25, %v343_v36  ;;  %v398_v62 = vadd.f32 %v913_v12, %v396_v37  ;;  %v469_v12 = vmul.f32 %v932_v23, %v932_v23  ;;  %324 = vst.msk [vmem:[%s1087_s5 + $0x78] sm:$0xff] %vm292_vm2, %v289_v35  ;;  %v352_v23 = vsel %vm292_vm2, %v980_v2, 0.0 }
  0xc4   :  { %v438_v46 = vadd.f32 %v437_v61, %v436_v59  ;;  %v490_v13 = vadd.f32 %v920_v15, %v488_v60  ;;  %v405_v61 = vsel %vm292_vm2, %v377_v48, 0.0  ;;  %v379_v9 = vmul.f32 %v156_v45, %v156_v45 }
  0xc5   :  { %v400_v15 = vadd.f32 %v399_v30, %v398_v62  ;;  %v347_v25 = vadd.f32 %v346_v41, %v345_v11  ;;  %v497_v63 = vsel %vm292_vm2, %v469_v12, 0.0  ;;  %v471_v31 = vmul.f32 %v289_v35, %v289_v35 }
  0xc6   :  { %v492_v49 = vadd.f32 %v491_v40, %v490_v13  ;;  %v440_v52 = vadd.f32 %v439_v42, %v438_v46  ;;  %v354_v20 = vsel %vm292_vm2, %v156_v45, 0.0  ;;  %v447_v21 = vsel %vm292_vm2, %v289_v35, 0.0 }
  0xc7   :  { %v349_v55 = vadd.f32 %v348_v4, %v347_v25  ;;  %v402_v56 = vadd.f32 %v401_v43, %v400_v15  ;;  %v409_v3 = vsel %vm292_vm2, %v379_v9, 0.0  ;;  %v501_v29 = vsel %vm292_vm2, %v471_v31, 0.0 }
  0xc8   :  { %v442_v57 = vadd.f32 %v441_v47, %v440_v52  ;;  %v494_v58 = vadd.f32 %v493_v26, %v492_v49 }
  0xc9   :  { %v351_v5 = vadd.f32 %v350_v51, %v349_v55  ;;  %v404_v6 = vadd.f32 %v403_v50, %v402_v56 }
  0xca   :  { %v444_v22 = vadd.f32 %v443_v54, %v442_v57  ;;  %v496_v7 = vadd.f32 %v495_v53, %v494_v58 }
  0xcb   :  { %v353_v10 = vadd.f32 %v352_v23, %v351_v5  ;;  %v406_v14 = vadd.f32 %v405_v61, %v404_v6 }
  0xcc   :  { %v446_v16 = vadd.f32 %v445_v8, %v444_v22  ;;  %v498_v17 = vadd.f32 %v497_v63, %v496_v7 }
  0xcd   :  { %v408_v24 = vadd.f32 %v407_v18, %v406_v14  ;;  %v355_v2 = vadd.f32 %v354_v20, %v353_v10 }
  0xce   :  { %v500_v27 = vadd.f32 %v499_v19, %v498_v17  ;;  %v448_v28 = vadd.f32 %v447_v21, %v446_v16 }
  0xcf   :  { %v356_v32 = vrot.slane %v355_v2, 4  ;;  %v410_v33 = vadd.f32 %v409_v3, %v408_v24 }
  0xd0   :  { %v449_v38 = vrot.slane %v448_v28, 4  ;;  %v502_v39 = vadd.f32 %v501_v29, %v500_v27 }
  0xd1   :  { %v357_v30 = vadd.f32 %v356_v32, %v355_v2  ;;  %v411_v40 = vrot.slane %v410_v33, 4 }
  0xd2   :  { %v450_v41 = vadd.f32 %v449_v38, %v448_v28  ;;  %v503_v42 = vrot.slane %v502_v39, 4 }
  0xd3   :  { %v358_v36 = vrot.slane %v357_v30, 2  ;;  %v412_v37 = vadd.f32 %v411_v40, %v410_v33 }
  0xd4   :  { %v451_v59 = vrot.slane %v450_v41, 2  ;;  %v504_v60 = vadd.f32 %v503_v42, %v502_v39 }
  0xd5   :  { %v359_v43 = vadd.f32 %v358_v36, %v357_v30  ;;  %v413_v26 = vrot.slane %v412_v37, 2 }
  0xd6   :  { %v452_v44 = vadd.f32 %v451_v59, %v450_v41  ;;  %v505_v34 = vrot.slane %v504_v60, 2 }
  0xd7   :  { %v360_v45 = vrot.slane %v359_v43, 1  ;;  %v414_v35 = vadd.f32 %v413_v26, %v412_v37 }
  0xd8   :  { %v453_v11 = vrot.slane %v452_v44, 1  ;;  %v506_v62 = vadd.f32 %v505_v34, %v504_v60 }
  0xd9   :  { %v361_v46 = vadd.f32 %v360_v45, %v359_v43  ;;  %v415_v13 = vrot.slane %v414_v35, 1 }
  0xda   :  { %v454_v4 = vadd.f32 %v453_v11, %v452_v44  ;;  %v507_v47 = vrot.slane %v506_v62, 1 }
  0xdb   :  { %363 = vst.msk [vmem:[%s1088_s6] sm:$0x1] %vm362_vm3, %v361_v46  ;;  %v416_v48 = vadd.f32 %v415_v13, %v414_v35 }
  0xdc   :  { %v508_v12 = vadd.f32 %v507_v47, %v506_v62  ;;  %455 = vst.msk [vmem:[%s1089_s8] sm:$0x1] %vm362_vm3, %v454_v4 }
  0xdd   :  { %417 = vst.msk [vmem:[%s1090_s7] sm:$0x1] %vm362_vm3, %v416_v48 }
  0xde   :  { %509 = vst.msk [vmem:[%s1091_s9] sm:$0x1] %vm362_vm3, %v508_v12 }

// kernel: bottleneck_forward.11
= control target key start
LH: loop header
LB: loop body
LE: loop exit
PB: predicated region body
PF: predicated region fallthrough
CT: control target
= control target key end

     0   :  { %vm168_vm0 = vcmask 130048   ;;  %s473_s0 = inlined_call_operand.vmem [shape: f32[128,16], index: 0, kind: input, shape index: {}]   ;;  %s474_s1 = inlined_call_operand.vmem [shape: f32[128,16], index: 1, kind: input, shape index: {}]   ;;  %s475_s2 = inlined_call_operand.vmem [shape: f32[1,16], index: 2, kind: input, shape index: {}]   ;;  %s476_s3 = inlined_call_operand.vmem [shape: f32[1,16], index: 3, kind: input, shape index: {}]   ;;  %s477_s4 = inlined_call_operand.vmem [shape: f32[1,16], index: 4, kind: input, shape index: {}]   ;;  %s478_s5 = inlined_call_operand.vmem [shape: f32[1,16], index: 5, kind: input, shape index: {}]   ;;  %s479_s6 = inlined_call_operand.hbm [shape: f32[128,16], index: 6, kind: output, shape index: {}]  }
   0x1   :  { %v24_v0 = vld [vmem:[%s473_s0] sm:$0xff]  ;;  %v25_v7 = vld [vmem:[%s473_s0 + $0x8] sm:$0xff]  ;;  %v26_v13 = vld [vmem:[%s473_s0 + $0x10] sm:$0xff] }
   0x2   :  { %v280_v1 = vld [vmem:[%s475_s2] ss:$0 sm:$0xff]  ;;  %v81_v8 = vld [vmem:[%s474_s1 + $0x8] sm:$0xff]  ;;  %v82_v14 = vld [vmem:[%s474_s1 + $0x10] sm:$0xff] }
   0x3   :  { %v285_v2 = vld [vmem:[%s476_s3] ss:$0 sm:$0xff]  ;;  %v44_v4 = vmul.f32 %v280_v1, %v24_v0  ;;  %v45_v11 = vmul.f32 %v280_v1, %v25_v7  ;;  %v27_v15 = vld [vmem:[%s473_s0 + $0x18] sm:$0xff]  ;;  %v46_v16 = vmul.f32 %v280_v1, %v26_v13  ;;  %v29_v26 = vld [vmem:[%s473_s0 + $0x28] sm:$0xff] }
   0x4   :  { %v80_v3 = vld [vmem:[%s474_s1] sm:$0xff]  ;;  %v47_v18 = vmul.f32 %v280_v1, %v27_v15  ;;  %v83_v19 = vld [vmem:[%s474_s1 + $0x18] sm:$0xff]  ;;  %v85_v27 = vld [vmem:[%s474_s1 + $0x28] sm:$0xff]  ;;  %v49_v32 = vmul.f32 %v280_v1, %v29_v26 }
   0x5   :  { %v294_v5 = vld [vmem:[%s477_s4] ss:$0 sm:$0xff]  ;;  %v64_v9 = vadd.f32 %v285_v2, %v44_v4  ;;  %v65_v23 = vadd.f32 %v285_v2, %v45_v11  ;;  %v30_v28 = vld [vmem:[%s473_s0 + $0x30] sm:$0xff]  ;;  %v66_v29 = vadd.f32 %v285_v2, %v46_v16  ;;  %v31_v42 = vld [vmem:[%s473_s0 + $0x38] sm:$0xff] }
   0x6   :  { %v299_v6 = vld [vmem:[%s478_s5] ss:$0 sm:$0xff]  ;;  %v100_v10 = vmul.f32 %v294_v5, %v80_v3  ;;  %v101_v12 = vmul.f32 %v294_v5, %v81_v8  ;;  %v102_v17 = vmul.f32 %v294_v5, %v82_v14  ;;  %v103_v24 = vmul.f32 %v294_v5, %v83_v19  ;;  %v86_v33 = vld [vmem:[%s474_s1 + $0x30] sm:$0xff]  ;;  %v87_v43 = vld [vmem:[%s474_s1 + $0x38] sm:$0xff] }
   0x7   :  { %v28_v20 = vld [vmem:[%s473_s0 + $0x20] sm:$0xff]  ;;  %v67_v30 = vadd.f32 %v285_v2, %v47_v18  ;;  %v105_v37 = vmul.f32 %v294_v5, %v85_v27  ;;  %v69_v40 = vadd.f32 %v285_v2, %v49_v32  ;;  %v50_v41 = vmul.f32 %v280_v1, %v30_v28  ;;  %v33_v58 = vld [vmem:[%s473_s0 + $0x48] sm:$0xff]  ;;  %v34_v0 = vld [vmem:[%s473_s0 + $0x50] sm:$0xff] }
   0x8   :  { %v84_v21 = vld [vmem:[%s474_s1 + $0x20] sm:$0xff]  ;;  %v116_v22 = vadd.f32 %v100_v10, %v64_v9  ;;  %v48_v25 = vmul.f32 %v280_v1, %v28_v20  ;;  %v117_v35 = vadd.f32 %v101_v12, %v65_v23  ;;  %v118_v38 = vadd.f32 %v102_v17, %v66_v29  ;;  %v89_v59 = vld [vmem:[%s474_s1 + $0x48] sm:$0xff]  ;;  %v90_v3 = vld [vmem:[%s474_s1 + $0x50] sm:$0xff] }
   0x9   :  { %v104_v31 = vmul.f32 %v294_v5, %v84_v21  ;;  %v119_v39 = vadd.f32 %v103_v24, %v67_v30  ;;  %v106_v47 = vmul.f32 %v294_v5, %v86_v33  ;;  %v121_v50 = vadd.f32 %v105_v37, %v69_v40  ;;  %v32_v52 = vld [vmem:[%s473_s0 + $0x40] sm:$0xff] }
   0xa   :  { %v136_v34 = vadd.f32 %v299_v6, %v116_v22  ;;  %v68_v36 = vadd.f32 %v285_v2, %v48_v25  ;;  %v137_v45 = vadd.f32 %v299_v6, %v117_v35  ;;  %v138_v48 = vadd.f32 %v299_v6, %v118_v38  ;;  %v88_v53 = vld [vmem:[%s474_s1 + $0x40] sm:$0xff] }
   0xb   :  { %v139_v49 = vadd.f32 %v299_v6, %v119_v39  ;;  %v70_v51 = vadd.f32 %v285_v2, %v50_v41  ;;  %v51_v56 = vmul.f32 %v280_v1, %v31_v42  ;;  %v107_v57 = vmul.f32 %v294_v5, %v87_v43 }
   0xc   :  { %v152_v44 = vmax.f32 %v136_v34, 0.0  ;;  %v120_v46 = vadd.f32 %v104_v31, %v68_v36  ;;  %v153_v54 = vmax.f32 %v137_v45, 0.0  ;;  %v154_v60 = vmax.f32 %v138_v48, 0.0 }
   0xd   :  { %v155_v61 = vmax.f32 %v139_v49, 0.0  ;;  %v141_v62 = vadd.f32 %v299_v6, %v121_v50  ;;  %v122_v63 = vadd.f32 %v106_v47, %v70_v51 }
   0xe   :  { %169 = vst.msk [vmem:[#allocation2] sm:$0xff] %vm168_vm0, %v152_v44  ;;  %v140_v55 = vadd.f32 %v299_v6, %v120_v46 }
   0xf   :  { %11 = vsyncpa [#allocation3], 0  ;;  %170 = vst.msk [vmem:[#allocation2 + $0x8] sm:$0xff] %vm168_vm0, %v153_v54  ;;  %v71_v7 = vadd.f32 %v285_v2, %v51_v56  ;;  %v52_v8 = vmul.f32 %v280_v1, %v32_v52  ;;  %v108_v9 = vmul.f32 %v294_v5, %v88_v53  ;;  %v35_v10 = vld [vmem:[%s473_s0 + $0x58] sm:$0xff]  ;;  %v157_v12 = vmax.f32 %v141_v62, 0.0  ;;  %v36_v16 = vld [vmem:[%s473_s0 + $0x60] sm:$0xff] }
  0x10   :  { %v156_v4 = vmax.f32 %v140_v55, 0.0  ;;  %v91_v11 = vld [vmem:[%s474_s1 + $0x58] sm:$0xff]  ;;  %171 = vst.msk [vmem:[#allocation2 + $0x10] sm:$0xff] %vm168_vm0, %v154_v60  ;;  %v142_v13 = vadd.f32 %v299_v6, %v122_v63  ;;  %v53_v14 = vmul.f32 %v280_v1, %v33_v58  ;;  %v109_v15 = vmul.f32 %v294_v5, %v89_v59  ;;  %v92_v21 = vld [vmem:[%s474_s1 + $0x60] sm:$0xff]  ;;  %v37_v22 = vld [vmem:[%s473_s0 + $0x68] sm:$0xff]  ;;  %s191_s5 = sshll.u32 %s479_s6, 4  ;;  %s192_s5 = int_to_ptr.hbm [resolvable:$true] %s191_s5 }
  0x11   :  { %172 = vst.msk [vmem:[#allocation2 + $0x18] sm:$0xff] %vm168_vm0, %v155_v61  ;;  %v123_v17 = vadd.f32 %v107_v57, %v71_v7  ;;  %v72_v18 = vadd.f32 %v285_v2, %v52_v8  ;;  %v54_v19 = vmul.f32 %v280_v1, %v34_v0  ;;  %v110_v20 = vmul.f32 %v294_v5, %v90_v3  ;;  %v93_v31 = vld [vmem:[%s474_s1 + $0x68] sm:$0xff]  ;;  %v38_v36 = vld [vmem:[%s473_s0 + $0x70] sm:$0xff]  ;;  %v39_v46 = vld [vmem:[%s473_s0 + $0x78] sm:$0xff]  ;;  %s236_s0 = smov [#allocation2]   ;;  %s237_s12 = smov 128  }
  0x12   :  { %173 = vst.msk [vmem:[#allocation2 + $0x20] sm:$0xff] %vm168_vm0, %v156_v4  ;;  %v158_v23 = vmax.f32 %v142_v13, 0.0  ;;  %v73_v24 = vadd.f32 %v285_v2, %v53_v14  ;;  %v55_v25 = vmul.f32 %v280_v1, %v35_v10  ;;  %v111_v26 = vmul.f32 %v294_v5, %v91_v11  ;;  %v94_v41 = vld [vmem:[%s474_s1 + $0x70] sm:$0xff]  ;;  %v95_v51 = vld [vmem:[%s474_s1 + $0x78] sm:$0xff]  ;;  %s189_s1 = sshll.u32 %s236_s0, 4  ;;  %s238_s13 = smov 8   ;;  %s190_s1 = int_to_ptr.vmem [resolvable:$true] %s189_s1 }
  0x13   :  { %174 = vst.msk [vmem:[#allocation2 + $0x28] sm:$0xff] %vm168_vm0, %v157_v12  ;;  %v143_v27 = vadd.f32 %v299_v6, %v123_v17  ;;  %v124_v28 = vadd.f32 %v108_v9, %v72_v18  ;;  %v74_v29 = vadd.f32 %v285_v2, %v54_v19  ;;  %v56_v30 = vmul.f32 %v280_v1, %v36_v16 }
  0x14   :  { %175 = vst.msk [vmem:[#allocation2 + $0x30] sm:$0xff] %vm168_vm0, %v158_v23  ;;  %v125_v32 = vadd.f32 %v109_v15, %v73_v24  ;;  %v75_v33 = vadd.f32 %v285_v2, %v55_v25  ;;  %v112_v34 = vmul.f32 %v294_v5, %v92_v21  ;;  %v57_v35 = vmul.f32 %v280_v1, %v37_v22 }
  0x15   :  { %v159_v37 = vmax.f32 %v143_v27, 0.0  ;;  %v144_v38 = vadd.f32 %v299_v6, %v124_v28  ;;  %v126_v39 = vadd.f32 %v110_v20, %v74_v29  ;;  %v76_v40 = vadd.f32 %v285_v2, %v56_v30 }
  0x16   :  { %v145_v42 = vadd.f32 %v299_v6, %v125_v32  ;;  %v127_v43 = vadd.f32 %v111_v26, %v75_v33  ;;  %v77_v44 = vadd.f32 %v285_v2, %v57_v35  ;;  %v113_v45 = vmul.f32 %v294_v5, %v93_v31 }
  0x17   :  { %176 = vst.msk [vmem:[#allocation2 + $0x38] sm:$0xff] %vm168_vm0, %v159_v37  ;;  %v160_v47 = vmax.f32 %v144_v38, 0.0  ;;  %v146_v48 = vadd.f32 %v299_v6, %v126_v39  ;;  %v128_v49 = vadd.f32 %v112_v34, %v76_v40  ;;  %v58_v50 = vmul.f32 %v280_v1, %v38_v36 }
  0x18   :  { %v161_v52 = vmax.f32 %v145_v42, 0.0  ;;  %v147_v53 = vadd.f32 %v299_v6, %v127_v43  ;;  %v129_v54 = vadd.f32 %v113_v45, %v77_v44  ;;  %v114_v55 = vmul.f32 %v294_v5, %v94_v41 }
  0x19   :  { %177 = vst.msk [vmem:[#allocation2 + $0x40] sm:$0xff] %vm168_vm0, %v160_v47  ;;  %v162_v56 = vmax.f32 %v146_v48, 0.0  ;;  %v148_v57 = vadd.f32 %v299_v6, %v128_v49  ;;  %v78_v58 = vadd.f32 %v285_v2, %v58_v50  ;;  %v59_v59 = vmul.f32 %v280_v1, %v39_v46 }
  0x1a   :  { %178 = vst.msk [vmem:[#allocation2 + $0x48] sm:$0xff] %vm168_vm0, %v161_v52  ;;  %v163_v60 = vmax.f32 %v147_v53, 0.0  ;;  %v149_v61 = vadd.f32 %v299_v6, %v129_v54  ;;  %v115_v62 = vmul.f32 %v294_v5, %v95_v51 }
  0x1b   :  { %179 = vst.msk [vmem:[#allocation2 + $0x50] sm:$0xff] %vm168_vm0, %v162_v56  ;;  %v164_v63 = vmax.f32 %v148_v57, 0.0  ;;  %v130_v0 = vadd.f32 %v114_v55, %v78_v58  ;;  %v79_v3 = vadd.f32 %v285_v2, %v59_v59 }
  0x1c   :  { %180 = vst.msk [vmem:[#allocation2 + $0x58] sm:$0xff] %vm168_vm0, %v163_v60  ;;  %v165_v4 = vmax.f32 %v149_v61, 0.0 }
  0x1d   :  { %181 = vst.msk [vmem:[#allocation2 + $0x60] sm:$0xff] %vm168_vm0, %v164_v63  ;;  %v150_v1 = vadd.f32 %v299_v6, %v130_v0  ;;  %v131_v7 = vadd.f32 %v115_v62, %v79_v3 }
  0x1e   :  { %182 = vst.msk [vmem:[#allocation2 + $0x68] sm:$0xff] %vm168_vm0, %v165_v4 }
  0x1f   :  { %v166_v5 = vmax.f32 %v150_v1, 0.0  ;;  %v151_v8 = vadd.f32 %v299_v6, %v131_v7 }
  0x21   :  { %183 = vst.msk [vmem:[#allocation2 + $0x70] sm:$0xff] %vm168_vm0, %v166_v5  ;;  %v167_v2 = vmax.f32 %v151_v8, 0.0 }
  0x23   :  { %184 = vst.msk [vmem:[#allocation2 + $0x78] sm:$0xff] %vm168_vm0, %v167_v2 }
  0x24   :  { %197 = dma.vmem_to_hbm [thread:$0]  %s190_s1, 2048, %s192_s5, [#allocation3], %s237_s12, %s237_s12, %s238_s13  }
  0x25   :  { %234 = dma.done.wait [#allocation3], 2048  }
  0x26   :  { %235 = vsyncadd [#allocation3], 4294965248 }
  0x27   :  { %202 = vsyncpa [#allocation3], 1 }

</bundles_post_ra>
